<compile_context>
chip_gen: v6e
topology: v6e:2x2x1
jax: 0.10.0
libtpu: 0.0.40
codegen_flags: <defaults>
</compile_context>

<pallas_src>
import functools

import jax
import jax.numpy as jnp
from jax import lax
from jax.experimental import pallas as pl
from jax.experimental.pallas import tpu as pltpu

NEG_SLOPE = 0.01  # PyTorch F.leaky_relu default negative_slope


def _leaky_relu(v):
    return jnp.where(v > 0, v, NEG_SLOPE * v)


def _fused_kernel(idx_ref, w1_ref, bp_ref, wm_ref, bm_ref, wo_ref, bo_ref,
                  o_ref, acc_ref):
    """One batch tile: fused (one-hot @ table·Wp) + 2x (Linear -> leaky_relu)."""
    idx = idx_ref[...]                       # (TB, P) int32, assumed in range
    tb, p_num = idx.shape
    pc, d1 = w1_ref.shape                    # (P*C, D1) bf16
    c_num = pc // p_num

    col_iota = lax.broadcasted_iota(jnp.int32, (tb, c_num), 1)   # hoisted

    # Layer 1:  x @ Wp == sum_p  onehot_p @ (table @ Wp[p*E:(p+1)*E])
    # One K=C matmul per position; f32 accumulation in VMEM scratch.
    for p in range(p_num):                   # static unroll (P is small)
        onehot = (idx[:, p:p + 1] == col_iota).astype(jnp.bfloat16)  # (TB, C)
        w1_p = w1_ref[p * c_num:(p + 1) * c_num, :]                   # (C, D1)
        contrib = jnp.dot(onehot, w1_p, preferred_element_type=jnp.float32)
        if p == 0:
            acc_ref[...] = contrib
        else:
            acc_ref[...] += contrib

    h = _leaky_relu(acc_ref[...] + bp_ref[...])                              # f32
    h = _leaky_relu(jnp.dot(h.astype(jnp.bfloat16), wm_ref[...],
                            preferred_element_type=jnp.float32) + bm_ref[...])
    o = _leaky_relu(jnp.dot(h.astype(jnp.bfloat16), wo_ref[...],
                            preferred_element_type=jnp.float32) + bo_ref[...])
    o_ref[...] = o.astype(o_ref.dtype)


def _round_up(x, m):
    return ((x + m - 1) // m) * m


def _choose_batch_tile(b, tile_b):
    """Even number of grid steps (>=2, for v7x's 2 TCs); tiles <= tile_b rows."""
    steps = max(2, -(-b // tile_b))
    if steps % 2:
        steps += 1
    tb = _round_up(-(-b // steps), 8)
    return tb, steps


@functools.partial(jax.jit, static_argnames=("tile_b", "out_dtype"))
def indexes_embed_forward(feature, params, *, tile_b=512, out_dtype=jnp.float32):
    """Forward pass of IndexesEmbed.

    feature: (B, P) int32 column-index ids (assumed in range, like nn.Embedding).
    params : dict with bf16 embedding table + transposed bf16 linear weights,
             f32 biases.
    """
    table = params["indexEmb"]               # (C, E) bf16, row 0 zero (padding_idx=0)
    B, P = feature.shape
    C, E = table.shape

    wp, bp = params["project_w"], params["project_b"]   # (D1, D1) bf16, (1, D1) f32
    wm, bm = params["mid1_w"], params["mid1_b"]         # (D1, H)  bf16, (1, H)  f32
    wo, bo = params["output_w"], params["output_b"]     # (H, E)   bf16, (1, E)  f32
    D1, H = wm.shape
    assert D1 == P * E

    # Fold the embedding table into the first Linear (exact, modulo one extra
    # bf16 rounding of the fused (P*C, D1) matrix).
    w1 = jnp.einsum(
        "ce,ped->pcd",
        table.astype(jnp.float32),
        wp.astype(jnp.float32).reshape(P, E, D1),
    ).reshape(P * C, D1).astype(jnp.bfloat16)

    # Lane-dense output: pad the final Linear's N dim up to a multiple of 128.
    e_pad = _round_up(E, 128)
    wo_p = jnp.pad(wo, ((0, 0), (0, e_pad - E)))
    bo_p = jnp.pad(bo, ((0, 0), (0, e_pad - E)))

    # Batch tiling: even "parallel" grid so v7x's two cores share the axis.
    tb, steps = _choose_batch_tile(B, tile_b)
    b_pad = tb * steps
    feat = feature if b_pad == B else jnp.pad(feature, ((0, b_pad - B), (0, 0)))

    out_itemsize = jnp.dtype(out_dtype).itemsize
    cost = pl.CostEstimate(
        flops=int(2 * b_pad * (P * C * D1 + D1 * H + H * e_pad)),
        transcendentals=0,
        bytes_accessed=int(
            b_pad * P * 4                       # indices
            + P * C * D1 * 2 + D1 * H * 2 + H * e_pad * 2   # bf16 weights
            + D1 * 4 + H * 4 + e_pad * 4        # f32 biases
            + b_pad * e_pad * out_itemsize      # padded output
        ),
    )

    out = pl.pallas_call(
        _fused_kernel,
        out_shape=jax.ShapeDtypeStruct((b_pad, e_pad), out_dtype),
        grid=(steps,),
        in_specs=[
            pl.BlockSpec((tb, P), lambda i: (i, 0)),        # indices (batch-tiled)
            pl.BlockSpec((P * C, D1), lambda i: (0, 0)),    # fused table·Wp
            pl.BlockSpec((1, D1), lambda i: (0, 0)),        # bp
            pl.BlockSpec((D1, H), lambda i: (0, 0)),        # Wm
            pl.BlockSpec((1, H), lambda i: (0, 0)),         # bm
            pl.BlockSpec((H, e_pad), lambda i: (0, 0)),     # Wo (lane-padded)
            pl.BlockSpec((1, e_pad), lambda i: (0, 0)),     # bo (lane-padded)
        ],
        out_specs=pl.BlockSpec((tb, e_pad), lambda i: (i, 0)),
        scratch_shapes=[pltpu.VMEM((tb, D1), jnp.float32)],
        compiler_params=pltpu.CompilerParams(
            dimension_semantics=("parallel",)),
        cost_estimate=cost,
    )(feat, w1, bp, wm, bm, wo_p, bo_p)
    return out[:B, :E]


def init_params(key, *, embed_size, columns, position_num, hid_dim):
    """Deterministic synthetic parameters (weights bf16, biases f32)."""
    d1 = embed_size * position_num
    ks = jax.random.split(key, 7)
    scale = 0.05
    table = scale * jax.random.normal(ks[0], (columns, embed_size), jnp.float32)
    table = table.at[0].set(0.0)            # padding_idx=0
    bf16 = lambda a: a.astype(jnp.bfloat16)
    return {
        "indexEmb": bf16(table),
        # Linear weights stored transposed (in, out) == PyTorch W.T, bf16.
        "project_w": bf16(scale * jax.random.normal(ks[1], (d1, d1), jnp.float32)),
        "project_b": scale * jax.random.normal(ks[2], (1, d1), jnp.float32),
        "mid1_w": bf16(scale * jax.random.normal(ks[3], (d1, hid_dim), jnp.float32)),
        "mid1_b": scale * jax.random.normal(ks[4], (1, hid_dim), jnp.float32),
        "output_w": bf16(scale * jax.random.normal(ks[5], (hid_dim, embed_size), jnp.float32)),
        "output_b": scale * jax.random.normal(ks[6], (1, embed_size), jnp.float32),
    }


def reference_forward(feature, params):
    """Pure-JAX reference using the same bf16-operand / f32-accumulate recipe."""
    table = params["indexEmb"]
    B, P = feature.shape
    E = table.shape[1]
    x = jnp.take(table, feature, axis=0).reshape(B, P * E)          # bf16
    h = _leaky_relu(jnp.dot(x, params["project_w"],
                            preferred_element_type=jnp.float32) + params["project_b"])
    h = _leaky_relu(jnp.dot(h.astype(jnp.bfloat16), params["mid1_w"],
                            preferred_element_type=jnp.float32) + params["mid1_b"])
    return _leaky_relu(jnp.dot(h.astype(jnp.bfloat16), params["output_w"],
                               preferred_element_type=jnp.float32) + params["output_b"])


if __name__ == "__main__":
    # Small shapes consistent with the module (scaled-down defaults).
    EMBED_SIZE = 32
    COLUMNS = 64
    POSITION_NUM = 8
    HID_DIM = 128
    BATCH = 256          # 2 tiles of 128 -> exercises the even "parallel" grid

    key = jax.random.PRNGKey(0)
    k_param, k_idx = jax.random.split(key)
    params = init_params(
        k_param,
        embed_size=EMBED_SIZE,
        columns=COLUMNS,
        position_num=POSITION_NUM,
        hid_dim=HID_DIM,
    )
    feature = jax.random.randint(k_idx, (BATCH, POSITION_NUM), 0, COLUMNS, jnp.int32)

    out = indexes_embed_forward(feature, params)
    out = jax.block_until_ready(out)

    ref = reference_forward(feature, params)
    assert out.shape == (BATCH, EMBED_SIZE)
    assert jnp.allclose(out, ref, atol=2e-3, rtol=2e-2), float(jnp.max(jnp.abs(out - ref)))

    print("KERNEL_OK")
</pallas_src>

<mosaic_0001>
module attributes {stable_mosaic.version = 11 : i64} {
  func.func @_fused_kernel(%arg0: i32, %arg1: memref<128x8xi32, #tpu.memory_space<vmem>>, %arg2: memref<512x256xbf16, #tpu.memory_space<vmem>>, %arg3: memref<1x256xf32, #tpu.memory_space<vmem>>, %arg4: memref<256x128xbf16, #tpu.memory_space<vmem>>, %arg5: memref<1x128xf32, #tpu.memory_space<vmem>>, %arg6: memref<128x128xbf16, #tpu.memory_space<vmem>>, %arg7: memref<1x128xf32, #tpu.memory_space<vmem>>, %arg8: memref<128x128xf32, #tpu.memory_space<vmem>>, %arg9: memref<128x256xf32, #tpu.memory_space<vmem>>) attributes {dimension_semantics = [#tpu.dimension_semantics<parallel>], iteration_bounds = array<i64: 2>, scalar_prefetch = 0 : i64, scratch_operands = 1 : i64, tpu.core_type = #tpu.core_type<tc>, window_params = [{transform_indices = @transform_0, window_bounds = array<i64: 128, 8>}, {pipeline_mode = #tpu.pipeline_mode<synchronous>, transform_indices = @transform_1, window_bounds = array<i64: 512, 256>}, {pipeline_mode = #tpu.pipeline_mode<synchronous>, transform_indices = @transform_2, window_bounds = array<i64: 1, 256>}, {pipeline_mode = #tpu.pipeline_mode<synchronous>, transform_indices = @transform_3, window_bounds = array<i64: 256, 128>}, {pipeline_mode = #tpu.pipeline_mode<synchronous>, transform_indices = @transform_4, window_bounds = array<i64: 1, 128>}, {pipeline_mode = #tpu.pipeline_mode<synchronous>, transform_indices = @transform_5, window_bounds = array<i64: 128, 128>}, {pipeline_mode = #tpu.pipeline_mode<synchronous>, transform_indices = @transform_6, window_bounds = array<i64: 1, 128>}, {transform_indices = @transform_7, window_bounds = array<i64: 128, 128>}]} {
    %c0 = arith.constant 0 : index
    %c0_0 = arith.constant 0 : index
    %0 = vector.load %arg1[%c0, %c0_0] : memref<128x8xi32, #tpu.memory_space<vmem>>, vector<128x8xi32>
    %1 = tpu.iota {dimensions = array<i32: 1>} : vector<128x64xi32>
    %2 = vector.extract_strided_slice %0 {offsets = [0, 0], sizes = [128, 1], strides = [1, 1]} : vector<128x8xi32> to vector<128x1xi32>
    %3 = vector.broadcast %2 : vector<128x1xi32> to vector<128x64xi32>
    %4 = arith.cmpi eq, %3, %1 : vector<128x64xi32>
    %5 = arith.extui %4 : vector<128x64xi1> to vector<128x64xi32>
    %6 = arith.sitofp %5 : vector<128x64xi32> to vector<128x64xf32>
    %7 = arith.truncf %6 : vector<128x64xf32> to vector<128x64xbf16>
    %c0_1 = arith.constant 0 : index
    %c0_2 = arith.constant 0 : index
    %8 = vector.load %arg2[%c0_1, %c0_2] : memref<512x256xbf16, #tpu.memory_space<vmem>>, vector<64x256xbf16>
    %cst = arith.constant dense<0.000000e+00> : vector<128x256xf32>
    %9 = tpu.matmul %7, %8, %cst {dimension_numbers = #tpu.dot_dimension_numbers<[1], [0], [0], [1], [0, 0, 1, 1], [], []>} : vector<128x64xbf16>, vector<64x256xbf16>, vector<128x256xf32> -> vector<128x256xf32>
    %c0_3 = arith.constant 0 : index
    %c0_4 = arith.constant 0 : index
    %10 = vector.load %arg9[%c0_3, %c0_4] : memref<128x256xf32, #tpu.memory_space<vmem>>, vector<128x256xf32>
    tpu.vector_store %arg9[%c0_3, %c0_4], %9 {strides = array<i32>} : memref<128x256xf32, #tpu.memory_space<vmem>>, vector<128x256xf32>,
    %11 = vector.extract_strided_slice %0 {offsets = [0, 1], sizes = [128, 1], strides = [1, 1]} : vector<128x8xi32> to vector<128x1xi32>
    %12 = vector.broadcast %11 : vector<128x1xi32> to vector<128x64xi32>
    %13 = arith.cmpi eq, %12, %1 : vector<128x64xi32>
    %14 = arith.extui %13 : vector<128x64xi1> to vector<128x64xi32>
    %15 = arith.sitofp %14 : vector<128x64xi32> to vector<128x64xf32>
    %16 = arith.truncf %15 : vector<128x64xf32> to vector<128x64xbf16>
    %c64 = arith.constant 64 : index
    %c0_5 = arith.constant 0 : index
    %17 = vector.load %arg2[%c64, %c0_5] : memref<512x256xbf16, #tpu.memory_space<vmem>>, vector<64x256xbf16>
    %cst_6 = arith.constant dense<0.000000e+00> : vector<128x256xf32>
    %18 = tpu.matmul %16, %17, %cst_6 {dimension_numbers = #tpu.dot_dimension_numbers<[1], [0], [0], [1], [0, 0, 1, 1], [], []>} : vector<128x64xbf16>, vector<64x256xbf16>, vector<128x256xf32> -> vector<128x256xf32>
    %c0_7 = arith.constant 0 : index
    %c0_8 = arith.constant 0 : index
    %19 = vector.load %arg9[%c0_7, %c0_8] : memref<128x256xf32, #tpu.memory_space<vmem>>, vector<128x256xf32>
    %20 = arith.addf %19, %18 : vector<128x256xf32>
    %c0_9 = arith.constant 0 : index
    %c0_10 = arith.constant 0 : index
    %21 = vector.load %arg9[%c0_9, %c0_10] : memref<128x256xf32, #tpu.memory_space<vmem>>, vector<128x256xf32>
    tpu.vector_store %arg9[%c0_9, %c0_10], %20 {strides = array<i32>} : memref<128x256xf32, #tpu.memory_space<vmem>>, vector<128x256xf32>,
    %22 = vector.extract_strided_slice %0 {offsets = [0, 2], sizes = [128, 1], strides = [1, 1]} : vector<128x8xi32> to vector<128x1xi32>
    %23 = vector.broadcast %22 : vector<128x1xi32> to vector<128x64xi32>
    %24 = arith.cmpi eq, %23, %1 : vector<128x64xi32>
    %25 = arith.extui %24 : vector<128x64xi1> to vector<128x64xi32>
    %26 = arith.sitofp %25 : vector<128x64xi32> to vector<128x64xf32>
    %27 = arith.truncf %26 : vector<128x64xf32> to vector<128x64xbf16>
    %c128 = arith.constant 128 : index
    %c0_11 = arith.constant 0 : index
    %28 = vector.load %arg2[%c128, %c0_11] : memref<512x256xbf16, #tpu.memory_space<vmem>>, vector<64x256xbf16>
    %cst_12 = arith.constant dense<0.000000e+00> : vector<128x256xf32>
    %29 = tpu.matmul %27, %28, %cst_12 {dimension_numbers = #tpu.dot_dimension_numbers<[1], [0], [0], [1], [0, 0, 1, 1], [], []>} : vector<128x64xbf16>, vector<64x256xbf16>, vector<128x256xf32> -> vector<128x256xf32>
    %c0_13 = arith.constant 0 : index
    %c0_14 = arith.constant 0 : index
    %30 = vector.load %arg9[%c0_13, %c0_14] : memref<128x256xf32, #tpu.memory_space<vmem>>, vector<128x256xf32>
    %31 = arith.addf %30, %29 : vector<128x256xf32>
    %c0_15 = arith.constant 0 : index
    %c0_16 = arith.constant 0 : index
    %32 = vector.load %arg9[%c0_15, %c0_16] : memref<128x256xf32, #tpu.memory_space<vmem>>, vector<128x256xf32>
    tpu.vector_store %arg9[%c0_15, %c0_16], %31 {strides = array<i32>} : memref<128x256xf32, #tpu.memory_space<vmem>>, vector<128x256xf32>,
    %33 = vector.extract_strided_slice %0 {offsets = [0, 3], sizes = [128, 1], strides = [1, 1]} : vector<128x8xi32> to vector<128x1xi32>
    %34 = vector.broadcast %33 : vector<128x1xi32> to vector<128x64xi32>
    %35 = arith.cmpi eq, %34, %1 : vector<128x64xi32>
    %36 = arith.extui %35 : vector<128x64xi1> to vector<128x64xi32>
    %37 = arith.sitofp %36 : vector<128x64xi32> to vector<128x64xf32>
    %38 = arith.truncf %37 : vector<128x64xf32> to vector<128x64xbf16>
    %c192 = arith.constant 192 : index
    %c0_17 = arith.constant 0 : index
    %39 = vector.load %arg2[%c192, %c0_17] : memref<512x256xbf16, #tpu.memory_space<vmem>>, vector<64x256xbf16>
    %cst_18 = arith.constant dense<0.000000e+00> : vector<128x256xf32>
    %40 = tpu.matmul %38, %39, %cst_18 {dimension_numbers = #tpu.dot_dimension_numbers<[1], [0], [0], [1], [0, 0, 1, 1], [], []>} : vector<128x64xbf16>, vector<64x256xbf16>, vector<128x256xf32> -> vector<128x256xf32>
    %c0_19 = arith.constant 0 : index
    %c0_20 = arith.constant 0 : index
    %41 = vector.load %arg9[%c0_19, %c0_20] : memref<128x256xf32, #tpu.memory_space<vmem>>, vector<128x256xf32>
    %42 = arith.addf %41, %40 : vector<128x256xf32>
    %c0_21 = arith.constant 0 : index
    %c0_22 = arith.constant 0 : index
    %43 = vector.load %arg9[%c0_21, %c0_22] : memref<128x256xf32, #tpu.memory_space<vmem>>, vector<128x256xf32>
    tpu.vector_store %arg9[%c0_21, %c0_22], %42 {strides = array<i32>} : memref<128x256xf32, #tpu.memory_space<vmem>>, vector<128x256xf32>,
    %44 = vector.extract_strided_slice %0 {offsets = [0, 4], sizes = [128, 1], strides = [1, 1]} : vector<128x8xi32> to vector<128x1xi32>
    %45 = vector.broadcast %44 : vector<128x1xi32> to vector<128x64xi32>
    %46 = arith.cmpi eq, %45, %1 : vector<128x64xi32>
    %47 = arith.extui %46 : vector<128x64xi1> to vector<128x64xi32>
    %48 = arith.sitofp %47 : vector<128x64xi32> to vector<128x64xf32>
    %49 = arith.truncf %48 : vector<128x64xf32> to vector<128x64xbf16>
    %c256 = arith.constant 256 : index
    %c0_23 = arith.constant 0 : index
    %50 = vector.load %arg2[%c256, %c0_23] : memref<512x256xbf16, #tpu.memory_space<vmem>>, vector<64x256xbf16>
    %cst_24 = arith.constant dense<0.000000e+00> : vector<128x256xf32>
    %51 = tpu.matmul %49, %50, %cst_24 {dimension_numbers = #tpu.dot_dimension_numbers<[1], [0], [0], [1], [0, 0, 1, 1], [], []>} : vector<128x64xbf16>, vector<64x256xbf16>, vector<128x256xf32> -> vector<128x256xf32>
    %c0_25 = arith.constant 0 : index
    %c0_26 = arith.constant 0 : index
    %52 = vector.load %arg9[%c0_25, %c0_26] : memref<128x256xf32, #tpu.memory_space<vmem>>, vector<128x256xf32>
    %53 = arith.addf %52, %51 : vector<128x256xf32>
    %c0_27 = arith.constant 0 : index
    %c0_28 = arith.constant 0 : index
    %54 = vector.load %arg9[%c0_27, %c0_28] : memref<128x256xf32, #tpu.memory_space<vmem>>, vector<128x256xf32>
    tpu.vector_store %arg9[%c0_27, %c0_28], %53 {strides = array<i32>} : memref<128x256xf32, #tpu.memory_space<vmem>>, vector<128x256xf32>,
    %55 = vector.extract_strided_slice %0 {offsets = [0, 5], sizes = [128, 1], strides = [1, 1]} : vector<128x8xi32> to vector<128x1xi32>
    %56 = vector.broadcast %55 : vector<128x1xi32> to vector<128x64xi32>
    %57 = arith.cmpi eq, %56, %1 : vector<128x64xi32>
    %58 = arith.extui %57 : vector<128x64xi1> to vector<128x64xi32>
    %59 = arith.sitofp %58 : vector<128x64xi32> to vector<128x64xf32>
    %60 = arith.truncf %59 : vector<128x64xf32> to vector<128x64xbf16>
    %c320 = arith.constant 320 : index
    %c0_29 = arith.constant 0 : index
    %61 = vector.load %arg2[%c320, %c0_29] : memref<512x256xbf16, #tpu.memory_space<vmem>>, vector<64x256xbf16>
    %cst_30 = arith.constant dense<0.000000e+00> : vector<128x256xf32>
    %62 = tpu.matmul %60, %61, %cst_30 {dimension_numbers = #tpu.dot_dimension_numbers<[1], [0], [0], [1], [0, 0, 1, 1], [], []>} : vector<128x64xbf16>, vector<64x256xbf16>, vector<128x256xf32> -> vector<128x256xf32>
    %c0_31 = arith.constant 0 : index
    %c0_32 = arith.constant 0 : index
    %63 = vector.load %arg9[%c0_31, %c0_32] : memref<128x256xf32, #tpu.memory_space<vmem>>, vector<128x256xf32>
    %64 = arith.addf %63, %62 : vector<128x256xf32>
    %c0_33 = arith.constant 0 : index
    %c0_34 = arith.constant 0 : index
    %65 = vector.load %arg9[%c0_33, %c0_34] : memref<128x256xf32, #tpu.memory_space<vmem>>, vector<128x256xf32>
    tpu.vector_store %arg9[%c0_33, %c0_34], %64 {strides = array<i32>} : memref<128x256xf32, #tpu.memory_space<vmem>>, vector<128x256xf32>,
    %66 = vector.extract_strided_slice %0 {offsets = [0, 6], sizes = [128, 1], strides = [1, 1]} : vector<128x8xi32> to vector<128x1xi32>
    %67 = vector.broadcast %66 : vector<128x1xi32> to vector<128x64xi32>
    %68 = arith.cmpi eq, %67, %1 : vector<128x64xi32>
    %69 = arith.extui %68 : vector<128x64xi1> to vector<128x64xi32>
    %70 = arith.sitofp %69 : vector<128x64xi32> to vector<128x64xf32>
    %71 = arith.truncf %70 : vector<128x64xf32> to vector<128x64xbf16>
    %c384 = arith.constant 384 : index
    %c0_35 = arith.constant 0 : index
    %72 = vector.load %arg2[%c384, %c0_35] : memref<512x256xbf16, #tpu.memory_space<vmem>>, vector<64x256xbf16>
    %cst_36 = arith.constant dense<0.000000e+00> : vector<128x256xf32>
    %73 = tpu.matmul %71, %72, %cst_36 {dimension_numbers = #tpu.dot_dimension_numbers<[1], [0], [0], [1], [0, 0, 1, 1], [], []>} : vector<128x64xbf16>, vector<64x256xbf16>, vector<128x256xf32> -> vector<128x256xf32>
    %c0_37 = arith.constant 0 : index
    %c0_38 = arith.constant 0 : index
    %74 = vector.load %arg9[%c0_37, %c0_38] : memref<128x256xf32, #tpu.memory_space<vmem>>, vector<128x256xf32>
    %75 = arith.addf %74, %73 : vector<128x256xf32>
    %c0_39 = arith.constant 0 : index
    %c0_40 = arith.constant 0 : index
    %76 = vector.load %arg9[%c0_39, %c0_40] : memref<128x256xf32, #tpu.memory_space<vmem>>, vector<128x256xf32>
    tpu.vector_store %arg9[%c0_39, %c0_40], %75 {strides = array<i32>} : memref<128x256xf32, #tpu.memory_space<vmem>>, vector<128x256xf32>,
    %77 = vector.extract_strided_slice %0 {offsets = [0, 7], sizes = [128, 1], strides = [1, 1]} : vector<128x8xi32> to vector<128x1xi32>
    %78 = vector.broadcast %77 : vector<128x1xi32> to vector<128x64xi32>
    %79 = arith.cmpi eq, %78, %1 : vector<128x64xi32>
    %80 = arith.extui %79 : vector<128x64xi1> to vector<128x64xi32>
    %81 = arith.sitofp %80 : vector<128x64xi32> to vector<128x64xf32>
    %82 = arith.truncf %81 : vector<128x64xf32> to vector<128x64xbf16>
    %c448 = arith.constant 448 : index
    %c0_41 = arith.constant 0 : index
    %83 = vector.load %arg2[%c448, %c0_41] : memref<512x256xbf16, #tpu.memory_space<vmem>>, vector<64x256xbf16>
    %cst_42 = arith.constant dense<0.000000e+00> : vector<128x256xf32>
    %84 = tpu.matmul %82, %83, %cst_42 {dimension_numbers = #tpu.dot_dimension_numbers<[1], [0], [0], [1], [0, 0, 1, 1], [], []>} : vector<128x64xbf16>, vector<64x256xbf16>, vector<128x256xf32> -> vector<128x256xf32>
    %c0_43 = arith.constant 0 : index
    %c0_44 = arith.constant 0 : index
    %85 = vector.load %arg9[%c0_43, %c0_44] : memref<128x256xf32, #tpu.memory_space<vmem>>, vector<128x256xf32>
    %86 = arith.addf %85, %84 : vector<128x256xf32>
    %c0_45 = arith.constant 0 : index
    %c0_46 = arith.constant 0 : index
    %87 = vector.load %arg9[%c0_45, %c0_46] : memref<128x256xf32, #tpu.memory_space<vmem>>, vector<128x256xf32>
    tpu.vector_store %arg9[%c0_45, %c0_46], %86 {strides = array<i32>} : memref<128x256xf32, #tpu.memory_space<vmem>>, vector<128x256xf32>,
    %c0_47 = arith.constant 0 : index
    %c0_48 = arith.constant 0 : index
    %88 = vector.load %arg9[%c0_47, %c0_48] : memref<128x256xf32, #tpu.memory_space<vmem>>, vector<128x256xf32>
    %c0_49 = arith.constant 0 : index
    %c0_50 = arith.constant 0 : index
    %89 = vector.load %arg3[%c0_49, %c0_50] : memref<1x256xf32, #tpu.memory_space<vmem>>, vector<1x256xf32>
    %90 = vector.broadcast %89 : vector<1x256xf32> to vector<128x256xf32>
    %91 = arith.addf %88, %90 : vector<128x256xf32>
    %cst_51 = arith.constant 0.000000e+00 : f32
    %92 = vector.broadcast %cst_51 : f32 to vector<128x256xf32>
    %93 = arith.cmpf ogt, %91, %92 : vector<128x256xf32>
    %cst_52 = arith.constant 0.00999999977 : f32
    %94 = vector.broadcast %cst_52 : f32 to vector<128x256xf32>
    %95 = arith.mulf %94, %91 : vector<128x256xf32>
    %96 = arith.select %93, %91, %95 : vector<128x256xi1>, vector<128x256xf32>
    %97 = arith.truncf %96 : vector<128x256xf32> to vector<128x256xbf16>
    %c0_53 = arith.constant 0 : index
    %c0_54 = arith.constant 0 : index
    %98 = vector.load %arg4[%c0_53, %c0_54] : memref<256x128xbf16, #tpu.memory_space<vmem>>, vector<256x128xbf16>
    %cst_55 = arith.constant dense<0.000000e+00> : vector<128x128xf32>
    %99 = tpu.matmul %97, %98, %cst_55 {dimension_numbers = #tpu.dot_dimension_numbers<[1], [0], [0], [1], [0, 0, 1, 1], [], []>} : vector<128x256xbf16>, vector<256x128xbf16>, vector<128x128xf32> -> vector<128x128xf32>
    %c0_56 = arith.constant 0 : index
    %c0_57 = arith.constant 0 : index
    %100 = vector.load %arg5[%c0_56, %c0_57] : memref<1x128xf32, #tpu.memory_space<vmem>>, vector<1x128xf32>
    %101 = vector.broadcast %100 : vector<1x128xf32> to vector<128x128xf32>
    %102 = arith.addf %99, %101 : vector<128x128xf32>
    %cst_58 = arith.constant 0.000000e+00 : f32
    %103 = vector.broadcast %cst_58 : f32 to vector<128x128xf32>
    %104 = arith.cmpf ogt, %102, %103 : vector<128x128xf32>
    %cst_59 = arith.constant 0.00999999977 : f32
    %105 = vector.broadcast %cst_59 : f32 to vector<128x128xf32>
    %106 = arith.mulf %105, %102 : vector<128x128xf32>
    %107 = arith.select %104, %102, %106 : vector<128x128xi1>, vector<128x128xf32>
    %108 = arith.truncf %107 : vector<128x128xf32> to vector<128x128xbf16>
    %c0_60 = arith.constant 0 : index
    %c0_61 = arith.constant 0 : index
    %109 = vector.load %arg6[%c0_60, %c0_61] : memref<128x128xbf16, #tpu.memory_space<vmem>>, vector<128x128xbf16>
    %cst_62 = arith.constant dense<0.000000e+00> : vector<128x128xf32>
    %110 = tpu.matmul %108, %109, %cst_62 {dimension_numbers = #tpu.dot_dimension_numbers<[1], [0], [0], [1], [0, 0, 1, 1], [], []>} : vector<128x128xbf16>, vector<128x128xbf16>, vector<128x128xf32> -> vector<128x128xf32>
    %c0_63 = arith.constant 0 : index
    %c0_64 = arith.constant 0 : index
    %111 = vector.load %arg7[%c0_63, %c0_64] : memref<1x128xf32, #tpu.memory_space<vmem>>, vector<1x128xf32>
    %112 = vector.broadcast %111 : vector<1x128xf32> to vector<128x128xf32>
    %113 = arith.addf %110, %112 : vector<128x128xf32>
    %cst_65 = arith.constant 0.000000e+00 : f32
    %114 = vector.broadcast %cst_65 : f32 to vector<128x128xf32>
    %115 = arith.cmpf ogt, %113, %114 : vector<128x128xf32>
    %cst_66 = arith.constant 0.00999999977 : f32
    %116 = vector.broadcast %cst_66 : f32 to vector<128x128xf32>
    %117 = arith.mulf %116, %113 : vector<128x128xf32>
    %118 = arith.select %115, %113, %117 : vector<128x128xi1>, vector<128x128xf32>
    %c0_67 = arith.constant 0 : index
    %c0_68 = arith.constant 0 : index
    %119 = vector.load %arg8[%c0_67, %c0_68] : memref<128x128xf32, #tpu.memory_space<vmem>>, vector<128x128xf32>
    tpu.vector_store %arg8[%c0_67, %c0_68], %118 {strides = array<i32>} : memref<128x128xf32, #tpu.memory_space<vmem>>, vector<128x128xf32>,
    return
  }
  func.func @transform_0(%arg0: i32) -> (i32, i32) {
    %c0_i32 = arith.constant 0 : i32
    %c0_i32_0 = arith.constant 0 : i32
    return %arg0, %c0_i32 : i32, i32
  }
  func.func @transform_1(%arg0: i32) -> (i32, i32) {
    %c0_i32 = arith.constant 0 : i32
    %c0_i32_0 = arith.constant 0 : i32
    %c0_i32_1 = arith.constant 0 : i32
    return %c0_i32, %c0_i32_0 : i32, i32
  }
  func.func @transform_2(%arg0: i32) -> (i32, i32) {
    %c0_i32 = arith.constant 0 : i32
    %c0_i32_0 = arith.constant 0 : i32
    %c0_i32_1 = arith.constant 0 : i32
    return %c0_i32, %c0_i32_0 : i32, i32
  }
  func.func @transform_3(%arg0: i32) -> (i32, i32) {
    %c0_i32 = arith.constant 0 : i32
    %c0_i32_0 = arith.constant 0 : i32
    %c0_i32_1 = arith.constant 0 : i32
    return %c0_i32, %c0_i32_0 : i32, i32
  }
  func.func @transform_4(%arg0: i32) -> (i32, i32) {
    %c0_i32 = arith.constant 0 : i32
    %c0_i32_0 = arith.constant 0 : i32
    %c0_i32_1 = arith.constant 0 : i32
    return %c0_i32, %c0_i32_0 : i32, i32
  }
  func.func @transform_5(%arg0: i32) -> (i32, i32) {
    %c0_i32 = arith.constant 0 : i32
    %c0_i32_0 = arith.constant 0 : i32
    %c0_i32_1 = arith.constant 0 : i32
    return %c0_i32, %c0_i32_0 : i32, i32
  }
  func.func @transform_6(%arg0: i32) -> (i32, i32) {
    %c0_i32 = arith.constant 0 : i32
    %c0_i32_0 = arith.constant 0 : i32
    %c0_i32_1 = arith.constant 0 : i32
    return %c0_i32, %c0_i32_0 : i32, i32
  }
  func.func @transform_7(%arg0: i32) -> (i32, i32) {
    %c0_i32 = arith.constant 0 : i32
    %c0_i32_0 = arith.constant 0 : i32
    return %arg0, %c0_i32 : i32, i32
  }
}

</mosaic_0001>

<bundles_post_ra>
// kernel: indexes_embed_forward.1
= control target key start
LH: loop header
LB: loop body
LE: loop exit
PB: predicated region body
PF: predicated region fallthrough
CT: control target
= control target key end

     0   :  { %s4782_s24 = smov 0   ;;  %s6185_s0 = inlined_call_operand.vmem [shape: s32[256,8], index: 0, kind: input, shape index: {}]   ;;  %s6186_s1 = inlined_call_operand.vmem [shape: bf16[512,256], index: 1, kind: input, shape index: {}]   ;;  %s6187_s2 = inlined_call_operand.vmem [shape: f32[1,256], index: 2, kind: input, shape index: {}]   ;;  %s6188_s3 = inlined_call_operand.vmem [shape: bf16[256,128], index: 3, kind: input, shape index: {}]   ;;  %s6189_s4 = inlined_call_operand.vmem [shape: f32[1,128], index: 4, kind: input, shape index: {}]   ;;  %s6190_s5 = inlined_call_operand.vmem [shape: bf16[128,128], index: 5, kind: input, shape index: {}]   ;;  %s6191_s6 = inlined_call_operand.vmem [shape: f32[1,128], index: 6, kind: input, shape index: {}]   ;;  %s6192_s7 = inlined_call_operand.vmem [shape: f32[256,128], index: 7, kind: output, shape index: {}]  }
   0x1 LB: > { %s4082_s25 = sadd.s32 4294967295, %s4731_s24   ;;  %p4086_p0 = scmp.ge.s32.totalorder %s4731_s24, 1  ;;  %s4731_s24 = sphi %s4782_s24, %s17_s24  }
   0x2   : > { %p238_p1 = scmp.lt.s32.totalorder %s4731_s24, 3 }
   0x4   : > { %p239_p2 = pnand %p4086_p0, %p238_p1 }
   0x6   : > { %242 = sbr.rel (%p239_p2) target bundleno = 1141 (0x475), region = 48 }
   0xb   : > { %s4087_s26 = sshll.u32 %s4082_s25, 4  ;;  %v6194_v0 = vmov 0   ;;  %v4593_v1 = vld [vmem:[%s6186_s1 + $0x34] ss:$8 sps:$4 sm:$0xff]   ;;  %v4595_v2 = vld [vmem:[%s6186_s1 + $0x30] ss:$8 sps:$4 sm:$0xff]   ;;  %v6193_v32 = vlaneseq }
   0xc   : > { %4513 = vset.pattern.permute.xlu1 %v6194_v0  ;;  %4512 = vset.pattern.permute.xlu0 %v6194_v0  ;;  %p271_p3 = scmp.lt.s32.totalorder %s4087_s26, 31  ;;  %v4596_v3 = vld [vmem:[%s6186_s1 + $0x24] ss:$8 sps:$4 sm:$0xff]   ;;  %v4598_v4 = vld [vmem:[%s6186_s1 + $0x20] ss:$8 sps:$4 sm:$0xff]   ;;  %v4734_v16 = vmov 1  }
   0xd   : > { %570 = vmatprep.mubr.bf16.mxu1 %v6194_v0  ;;  %510 = vmatprep.mubr.bf16.mxu0 %v6194_v0  ;;  %v4599_v5 = vld [vmem:[%s6186_s1 + $0x14] ss:$8 sps:$4 sm:$0xff]   ;;  %v4601_v10 = vld [vmem:[%s6186_s1 + $0x10] ss:$8 sps:$4 sm:$0xff]   ;;  %v4602_v11 = vld [vmem:[%s6186_s1 + $0x4] ss:$8 sps:$4 sm:$0xff]  }
   0xe   : > { %s6216_s26 = smov (!%p271_p3, %s4087_s26), 31  ;;  %4487 = vmatprep.subr.bf16.mxu1 %v4593_v1  ;;  %486 = vmatprep.subr.bf16.mxu0 %v4593_v1  ;;  %v4604_v14 = vld [vmem:[%s6186_s1] ss:$8 sps:$4 sm:$0xff]   ;;  %v4607_v15 = vld [vmem:[%s6186_s1 + $0x74] ss:$8 sps:$4 sm:$0xff]   ;;  %v4735_v26 = vmov 2  }
   0xf   : > { %4491 = vmatpush1.bf16.msra.mxu1 %v4595_v2  ;;  %487 = vmatpush1.bf16.msra.mxu0 %v4595_v2  ;;  %s4088_s12 = sshll.u32 %s6216_s26, 3  ;;  %v4736_v28 = vmov 3   ;;  %v4619_v29 = vld [vmem:[%s6186_s1 + $0xb4] ss:$8 sps:$4 sm:$0xff]   ;;  %v4737_v30 = vmov 5   ;;  %v4738_v31 = vmov 4  }
  0x10   : > { %4488 = vmatprep.subr.bf16.mxu1 %v4596_v3  ;;  %488 = vmatprep.subr.bf16.mxu0 %v4596_v3  ;;  %s4814_s15 = scalar_lea.vmem %s6185_s0, %s4088_s12  ;;  %v4966_v33 = vand.u32 127, %v6193_v32  ;;  %v6196_v36 = vmov 0.0   ;;  %vm453_vm2 = vcmask 523264   ;;  %v4605_v41 = vld [vmem:[%s6186_s1 + $0x70] ss:$8 sps:$4 sm:$0xff]   ;;  %s6149_s18 = scalar_lea.vmem %s6192_s7, %s4088_s12 }
  0x11   : > { %v4820_v6 = vld [vmem:[%s4814_s15 + $0x70] sm:$0xff]  ;;  %v4823_v7 = vld [vmem:[%s4814_s15 + $0x60] sm:$0xff]  ;;  %v4828_v8 = vld [vmem:[%s4814_s15 + $0x78] sm:$0xff] }
  0x12   : > { %344 = vperm.xlu1 %4513, %v4820_v6   ;;  %338 = vperm.xlu0 %4512, %v4823_v7   ;;  %v4831_v9 = vld [vmem:[%s4814_s15 + $0x68] sm:$0xff]  ;;  %v4845_v13 = vld [vmem:[%s4814_s15] sm:$0xff]  ;;  %v4856_v17 = vld [vmem:[%s4814_s15 + $0x10] sm:$0xff] }
  0x13   : > { %4492 = vmatpush1.bf16.msra.mxu1 %v4598_v4  ;;  %489 = vmatpush1.bf16.msra.mxu0 %v4598_v4  ;;  %v4842_v12 = vld [vmem:[%s4814_s15 + $0x8] sm:$0xff]  ;;  %v4861_v18 = vld [vmem:[%s4814_s15 + $0x18] sm:$0xff]  ;;  %v4866_v19 = vld [vmem:[%s4814_s15 + $0x30] sm:$0xff] }
  0x14   : > { %4489 = vmatprep.subr.bf16.mxu1 %v4599_v5  ;;  %490 = vmatprep.subr.bf16.mxu0 %v4599_v5  ;;  %v4872_v20 = vld [vmem:[%s4814_s15 + $0x20] sm:$0xff]  ;;  %v4878_v21 = vld [vmem:[%s4814_s15 + $0x28] sm:$0xff]  ;;  %v4887_v22 = vld [vmem:[%s4814_s15 + $0x38] sm:$0xff] }
  0x15   : > { %v4890_v23 = vld [vmem:[%s4814_s15 + $0x48] sm:$0xff]  ;;  %v4896_v24 = vld [vmem:[%s4814_s15 + $0x50] sm:$0xff]  ;;  %v4903_v25 = vld [vmem:[%s4814_s15 + $0x40] sm:$0xff] }
  0x16   : > { %347 = vperm.xlu1 %4513, %v4828_v8   ;;  %341 = vperm.xlu0 %4512, %v4831_v9   ;;  %v4916_v27 = vld [vmem:[%s4814_s15 + $0x58] sm:$0xff]  ;;  %v4610_v43 = vld [vmem:[%s6186_s1 + $0x64] ss:$8 sps:$4 sm:$0xff]   ;;  %v4608_v46 = vld [vmem:[%s6186_s1 + $0x60] ss:$8 sps:$4 sm:$0xff]  }
  0x17   : > { %4493 = vmatpush1.bf16.msra.mxu1 %v4601_v10  ;;  %491 = vmatpush1.bf16.msra.mxu0 %v4601_v10  ;;  %v4613_v47 = vld [vmem:[%s6186_s1 + $0x54] ss:$8 sps:$4 sm:$0xff]   ;;  %v4611_v52 = vld [vmem:[%s6186_s1 + $0x50] ss:$8 sps:$4 sm:$0xff]   ;;  %v4616_v54 = vld [vmem:[%s6186_s1 + $0x44] ss:$8 sps:$4 sm:$0xff]  }
  0x18   : > { %4490 = vmatprep.subr.bf16.mxu1 %v4602_v11  ;;  %492 = vmatprep.subr.bf16.mxu0 %v4602_v11  ;;  %v4614_v57 = vld [vmem:[%s6186_s1 + $0x40] ss:$8 sps:$4 sm:$0xff]   ;;  %v4628_v58 = vld [vmem:[%s6186_s1 + $0xf4] ss:$8 sps:$4 sm:$0xff]   ;;  %v4626_v62 = vld [vmem:[%s6186_s1 + $0xf0] ss:$8 sps:$4 sm:$0xff]  }
  0x19   : > { %v4634_v2 = vld [vmem:[%s6186_s1 + $0xe4] ss:$8 sps:$4 sm:$0xff]   ;;  %v4617_v10 = vld [vmem:[%s6186_s1 + $0xb0] ss:$8 sps:$4 sm:$0xff]  }
  0x1a   : > { %4515 = vset.pattern.permute.xlu1 %v4734_v16  ;;  %4514 = vset.pattern.permute.xlu0 %v4734_v16 }
  0x1b   : > { %627 = vperm.xlu1 %4515, %v4842_v12   ;;  %624 = vperm.xlu0 %4514, %v4845_v13  }
  0x1c   : > { %4494 = vmatpush1.bf16.msra.mxu1 %v4604_v14  ;;  %493 = vmatpush1.bf16.msra.mxu0 %v4604_v14  ;;  %v4622_v14 = vld [vmem:[%s6186_s1 + $0xa4] ss:$8 sps:$4 sm:$0xff]  }
  0x1d   : > { %807 = vmatprep.subr.bf16.mxu1 %v4607_v15  ;;  %1192 = vmatprep.subr.bf16.mxu0 %v4619_v29  ;;  %v4632_v15 = vld [vmem:[%s6186_s1 + $0xe0] ss:$8 sps:$4 sm:$0xff]   ;;  %v4637_v29 = vld [vmem:[%s6186_s1 + $0xd4] ss:$8 sps:$4 sm:$0xff]  }
  0x1f   : > { %630 = vperm.xlu1 %4515, %v4856_v17   ;;  %633 = vperm.xlu0 %4514, %v4861_v18  }
  0x23   : > { %4516 = vset.pattern.permute.xlu1 %v6194_v0  ;;  %642 = vperm.xlu0 %4514, %v4866_v19  }
  0x24   : > { %302 = vperm.xlu1 %4516, %v4845_v13  }
  0x27   : > { %4519 = vset.pattern.permute.xlu0 %v6194_v0 }
  0x28   : > { %4517 = vset.pattern.permute.xlu1 %v4734_v16  ;;  %305 = vperm.xlu0 %4519, %v4842_v12  }
  0x29   : > { %636 = vperm.xlu1 %4517, %v4872_v20  }
  0x2c   : > { %308 = vperm.xlu0 %4519, %v4856_v17  }
  0x2d   : > { %639 = vperm.xlu1 %4517, %v4878_v21  }
  0x30   : > { %317 = vperm.xlu0 %4519, %v4878_v21  }
  0x31   : > { %4518 = vset.pattern.permute.xlu1 %v6194_v0 }
  0x32   : > { %311 = vperm.xlu1 %4518, %v4861_v18  }
  0x34   : > { %320 = vperm.xlu0 %4519, %v4866_v19  }
  0x36   : > { %4520 = vset.pattern.permute.xlu1 %v4734_v16 }
  0x37   : > { %645 = vperm.xlu1 %4520, %v4887_v22  }
  0x38   : > { %329 = vperm.xlu0 %4519, %v4890_v23  }
  0x3b   : > { %4521 = vset.pattern.permute.xlu1 %v6194_v0 }
  0x3c   : > { %314 = vperm.xlu1 %4521, %v4872_v20   ;;  %332 = vperm.xlu0 %4519, %v4896_v24  }
  0x40   : > { %4522 = vset.pattern.permute.xlu1 %v4734_v16  ;;  %4527 = vset.pattern.permute.xlu0 %v4734_v16 }
  0x41   : > { %648 = vperm.xlu1 %4522, %v4903_v25   ;;  %654 = vperm.xlu0 %4527, %v4896_v24  }
  0x45   : > { %651 = vperm.xlu1 %4522, %v4890_v23   ;;  %666 = vperm.xlu0 %4527, %v4820_v6  }
  0x49   : > { %4523 = vset.pattern.permute.xlu1 %v6194_v0  ;;  %4531 = vset.pattern.permute.xlu0 %v4735_v26 }
  0x4a   : > { %323 = vperm.xlu1 %4523, %v4887_v22   ;;  %1012 = vperm.xlu0 %4531, %v4842_v12  }
  0x4e   : > { %4524 = vset.pattern.permute.xlu1 %v4734_v16  ;;  %1015 = vperm.xlu0 %4531, %v4856_v17  }
  0x4f   : > { %657 = vperm.xlu1 %4524, %v4916_v27  }
  0x52   : > { %4534 = vset.pattern.permute.xlu0 %v4736_v28 }
  0x53   : > { %4525 = vset.pattern.permute.xlu1 %v6194_v0  ;;  %1400 = vperm.xlu0 %4534, %v4856_v17  }
  0x54   : > { %326 = vperm.xlu1 %4525, %v4903_v25  }
  0x57   : > { %1412 = vperm.xlu0 %4534, %v4866_v19  }
  0x58   : > { %4526 = vset.pattern.permute.xlu1 %v4734_v16 }
  0x59   : > { %660 = vperm.xlu1 %4526, %v4823_v7  }
  0x5b   : > { %4539 = vset.pattern.permute.xlu0 %v4735_v26 }
  0x5c   : > { %1024 = vperm.xlu0 %4539, %v4878_v21  }
  0x5d   : > { %663 = vperm.xlu1 %4526, %v4831_v9  }
  0x60   : > { %1027 = vperm.xlu0 %4539, %v4866_v19  }
  0x61   : > { %4528 = vset.pattern.permute.xlu1 %v6194_v0 }
  0x62   : > { %335 = vperm.xlu1 %4528, %v4916_v27  }
  0x64   : > { %1036 = vperm.xlu0 %4539, %v4890_v23  }
  0x66   : > { %4529 = vset.pattern.permute.xlu1 %v4734_v16 }
  0x67   : > { %669 = vperm.xlu1 %4529, %v4828_v8  }
  0x68   : > { %1039 = vperm.xlu0 %4539, %v4896_v24  }
  0x6b   : > { %4530 = vset.pattern.permute.xlu1 %v4735_v26 }
  0x6c   : > { %1009 = vperm.xlu1 %4530, %v4845_v13   ;;  %1048 = vperm.xlu0 %4539, %v4831_v9  }
  0x70   : > { %4532 = vset.pattern.permute.xlu1 %v4736_v28  ;;  %1051 = vperm.xlu0 %4539, %v4820_v6  }
  0x71   : > { %1394 = vperm.xlu1 %4532, %v4845_v13  }
  0x74   : > { %4547 = vset.pattern.permute.xlu0 %v4736_v28 }
  0x75   : > { %1397 = vperm.xlu1 %4532, %v4842_v12   ;;  %1424 = vperm.xlu0 %4547, %v4896_v24  }
  0x79   : > { %4533 = vset.pattern.permute.xlu1 %v4735_v26  ;;  %1436 = vperm.xlu0 %4547, %v4820_v6  }
  0x7a   : > { %1018 = vperm.xlu1 %4533, %v4861_v18  }
  0x7d   : > { %4553 = vset.pattern.permute.xlu0 %v4737_v30 }
  0x7e   : > { %4535 = vset.pattern.permute.xlu1 %v4736_v28  ;;  %2170 = vperm.xlu0 %4553, %v4856_v17  }
  0x7f   : > { %1403 = vperm.xlu1 %4535, %v4861_v18  }
  0x82   : > { %4554 = vset.pattern.permute.xlu0 %v4738_v31 }
  0x83   : > { %4536 = vset.pattern.permute.xlu1 %v4735_v26  ;;  %1782 = vperm.xlu0 %4554, %v4842_v12  }
  0x84   : > { %1021 = vperm.xlu1 %4536, %v4872_v20  }
  0x87   : > { %1785 = vperm.xlu0 %4554, %v4856_v17  }
  0x88   : > { %4537 = vset.pattern.permute.xlu1 %v4736_v28 }
  0x89   : > { %1406 = vperm.xlu1 %4537, %v4872_v20  }
  0x8b   : > { %1794 = vperm.xlu0 %4554, %v4878_v21  }
  0x8d   : > { %v345_v34 = vpop.permute.xlu1 %344  ;;  %v339_v35 = vpop.permute.xlu0 %338  ;;  %1409 = vperm.xlu1 %4537, %v4878_v21  }
  0x8e   : > { %vm361_vm0 = vcmp.eq.s32.totalorder %v339_v35, %v4966_v33  ;;  %vm363_vm4 = vcmp.eq.s32.totalorder %v345_v34, %v4966_v33 }
  0x8f   : > { %1797 = vperm.xlu0 %4554, %v4866_v19   ;;  %v4103_v37 = vsel %vm361_vm0, 1.0, %v6196_v36  ;;  %v4105_v51 = vsel %vm363_vm4, 1.0, %v6196_v36 }
  0x91   : > { %v348_v38 = vpop.permute.xlu1 %347  ;;  %v342_v39 = vpop.permute.xlu0 %341  ;;  %4538 = vset.pattern.permute.xlu1 %v4735_v26 }
  0x92   : > { %vm362_vm1 = vcmp.eq.s32.totalorder %v342_v39, %v4966_v33  ;;  %1030 = vperm.xlu1 %4538, %v4887_v22   ;;  %vm364_vm3 = vcmp.eq.s32.totalorder %v348_v38, %v4966_v33  ;;  %v4620_v38 = vld [vmem:[%s6186_s1 + $0xa0] ss:$8 sps:$4 sm:$0xff]   ;;  %v4635_v39 = vld [vmem:[%s6186_s1 + $0xd0] ss:$8 sps:$4 sm:$0xff]  }
  0x93   : > { %v4104_v40 = vsel %vm362_vm1, 1.0, %v6196_v36  ;;  %4559 = vset.pattern.permute.xlu0 %v4737_v30  ;;  %v4106_v48 = vsel %vm364_vm3, 1.0, %v6196_v36 }
  0x94   : > { %v403_v42 = vpack.c.bf16 %v4104_v40, %v4103_v37  ;;  %2182 = vperm.xlu0 %4559, %v4866_v19   ;;  %v404_v53 = vpack.c.bf16 %v4106_v48, %v4105_v51 }
  0x96   : > { %4121 = vmatmul.mubr.msk.bf16.vlgmr.msra.gmra.mxu1 %vm453_vm2, %v403_v42  ;;  %v628_v44 = vpop.permute.xlu1 %627  ;;  %4540 = vset.pattern.permute.xlu1 %v4736_v28  ;;  %v625_v45 = vpop.permute.xlu0 %624  ;;  %v4625_v42 = vld [vmem:[%s6186_s1 + $0x94] ss:$8 sps:$4 sm:$0xff]  }
  0x97   : > { %808 = vmatpush1.bf16.msra.mxu1 %v4605_v41  ;;  %1415 = vperm.xlu1 %4540, %v4887_v22   ;;  %vm672_vm5 = vcmp.eq.s32.totalorder %v628_v44, %v4966_v33  ;;  %vm671_vm6 = vcmp.eq.s32.totalorder %v625_v45, %v4966_v33 }
  0x98   : > { %809 = vmatprep.subr.bf16.mxu1 %v4610_v43  ;;  %580 = vmatprep.mubr.bf16.mxu1 %v6194_v0  ;;  %v4124_v59 = vsel %vm672_vm5, 1.0, %v6196_v36  ;;  %v4123_v60 = vsel %vm671_vm6, 1.0, %v6196_v36  ;;  %v4640_v43 = vld [vmem:[%s6186_s1 + $0xc4] ss:$8 sps:$4 sm:$0xff]  }
  0x99   : > { %2194 = vperm.xlu0 %4559, %v4896_v24   ;;  %v719_v63 = vpack.c.bf16 %v4124_v59, %v4123_v60 }
  0x9a   : > { %v631_v49 = vpop.permute.xlu1 %630  ;;  %v634_v50 = vpop.permute.xlu0 %633 }
  0x9b   : > { %810 = vmatpush1.bf16.msra.mxu1 %v4608_v46  ;;  %4541 = vset.pattern.permute.xlu1 %v4735_v26  ;;  %vm673_vm9 = vcmp.eq.s32.totalorder %v631_v49, %v4966_v33  ;;  %vm674_vm10 = vcmp.eq.s32.totalorder %v634_v50, %v4966_v33  ;;  %v4631_v49 = vld [vmem:[%s6186_s1 + $0x84] ss:$8 sps:$4 sm:$0xff]   ;;  %v4638_v50 = vld [vmem:[%s6186_s1 + $0xc0] ss:$8 sps:$4 sm:$0xff]  }
  0x9c   : > { %1033 = vperm.xlu1 %4541, %v4903_v25   ;;  %811 = vmatprep.subr.bf16.mxu1 %v4613_v47  ;;  %v4125_v34 = vsel %vm673_vm9, 1.0, %v6196_v36  ;;  %v4126_v35 = vsel %vm674_vm10, 1.0, %v6196_v36  ;;  %v4623_v47 = vld [vmem:[%s6186_s1 + $0x90] ss:$8 sps:$4 sm:$0xff]  }
  0x9d   : > { %4564 = vset.pattern.permute.xlu0 %v4738_v31  ;;  %v720_v37 = vpack.c.bf16 %v4126_v35, %v4125_v34  ;;  %v4741_v35 = vmov 7  }
  0x9e   : > { %4122 = vmatmul.mubr.msk.bf16.gmra.mxu1 %vm453_vm2, %v404_v53  ;;  %v5011_v55 = vpop.permute.xlu0 %642  ;;  %1806 = vperm.xlu0 %4564, %v4890_v23  }
  0x9f   : > { %812 = vmatpush1.bf16.msra.mxu1 %v4611_v52  ;;  %v303_v56 = vpop.permute.xlu1 %302  ;;  %831 = vmatprep.mubr.bf16.mxu1 %v6194_v0  ;;  %vm677_vm0 = vcmp.eq.s32.totalorder %v5011_v55, %v4966_v33 }
  0xa0   : > { %4542 = vset.pattern.permute.xlu1 %v4736_v28  ;;  %813 = vmatprep.subr.bf16.mxu1 %v4616_v54  ;;  %vm349_vm7 = vcmp.eq.s32.totalorder %v303_v56, %v4966_v33  ;;  %v4629_v56 = vld [vmem:[%s6186_s1 + $0x80] ss:$8 sps:$4 sm:$0xff]   ;;  %v4129_v60 = vsel %vm677_vm0, 1.0, %v6196_v36 }
  0xa1   : > { %1418 = vperm.xlu1 %4542, %v4903_v25   ;;  %v4091_v3 = vsel %vm349_vm7, 1.0, %v6196_v36 }
  0xa2   : > { %1809 = vperm.xlu0 %4564, %v4896_v24  }
  0xa3   : > { %814 = vmatpush1.bf16.msra.mxu1 %v4614_v57  ;;  %v306_v61 = vpop.permute.xlu0 %305 }
  0xa4   : > { %vm350_vm8 = vcmp.eq.s32.totalorder %v306_v61, %v4966_v33  ;;  %v637_v1 = vpop.permute.xlu1 %636  ;;  %1577 = vmatprep.subr.bf16.mxu1 %v4628_v58 }
  0xa5   : > { %v4092_v4 = vsel %vm350_vm8, 1.0, %v6196_v36  ;;  %1421 = vperm.xlu1 %4542, %v4890_v23   ;;  %vm675_vm14 = vcmp.eq.s32.totalorder %v637_v1, %v4966_v33  ;;  %v4643_v1 = vld [vmem:[%s6186_s1 + $0x134] ss:$8 sps:$4 sm:$0xff]  }
  0xa6   : > { %v397_v5 = vpack.c.bf16 %v4092_v4, %v4091_v3  ;;  %4147 = vmatmul.mubr.msk.bf16.vlgmr.msra.gmra.mxu1 %vm453_vm2, %v719_v63  ;;  %1818 = vperm.xlu0 %4564, %v4831_v9   ;;  %v4127_v53 = vsel %vm675_vm14, 1.0, %v6196_v36  ;;  %v4740_v63 = vmov 6  }
  0xa7   : > { %841 = vmatprep.mubr.bf16.mxu1 %v6194_v0  ;;  %v309_v11 = vpop.permute.xlu0 %308  ;;  %1578 = vmatpush1.bf16.msra.mxu1 %v4626_v62 }
  0xa8   : > { %v640_v16 = vpop.permute.xlu1 %639  ;;  %4115 = vmatmul.mubr.msk.bf16.vlgmr.msra.gmra.mxu0 %vm453_vm2, %v397_v5  ;;  %1579 = vmatprep.subr.bf16.mxu1 %v4634_v2  ;;  %vm351_vm11 = vcmp.eq.s32.totalorder %v309_v11, %v4966_v33 }
  0xa9   : > { %4543 = vset.pattern.permute.xlu1 %v4735_v26  ;;  %520 = vmatprep.mubr.bf16.mxu0 %v6194_v0  ;;  %v4093_v41 = vsel %vm351_vm11, 1.0, %v6196_v36  ;;  %vm676_vm12 = vcmp.eq.s32.totalorder %v640_v16, %v4966_v33 }
  0xaa   : > { %1042 = vperm.xlu1 %4543, %v4916_v27   ;;  %1193 = vmatpush1.bf16.msra.mxu0 %v4617_v10  ;;  %v4128_v48 = vsel %vm676_vm12, 1.0, %v6196_v36 }
  0xab   : > { %1194 = vmatprep.subr.bf16.mxu0 %v4622_v14  ;;  %1580 = vmatpush1.bf16.msra.mxu1 %v4632_v15  ;;  %v318_v44 = vpop.permute.xlu0 %317  ;;  %v721_v54 = vpack.c.bf16 %v4128_v48, %v4127_v53  ;;  %v4652_v14 = vld [vmem:[%s6186_s1 + $0x174] ss:$8 sps:$4 sm:$0xff]  }
  0xac   : > { %1581 = vmatprep.subr.bf16.mxu1 %v4637_v29  ;;  %1821 = vperm.xlu0 %4564, %v4820_v6   ;;  %vm354_vm15 = vcmp.eq.s32.totalorder %v318_v44, %v4966_v33 }
  0xad   : > { %v312_v40 = vpop.permute.xlu1 %311  ;;  %v4096_v58 = vsel %vm354_vm15, 1.0, %v6196_v36 }
  0xae   : > { %vm352_vm13 = vcmp.eq.s32.totalorder %v312_v40, %v4966_v33  ;;  %4544 = vset.pattern.permute.xlu1 %v4736_v28  ;;  %4148 = vmatmul.mubr.msk.bf16.gmra.mxu1 %vm453_vm2, %v720_v37 }
  0xaf   : > { %v4094_v45 = vsel %vm352_vm13, 1.0, %v6196_v36  ;;  %1427 = vperm.xlu1 %4544, %v4916_v27   ;;  %851 = vmatprep.mubr.bf16.mxu1 %v6194_v0  ;;  %v321_v52 = vpop.permute.xlu0 %320 }
  0xb0   : > { %v398_v46 = vpack.c.bf16 %v4094_v45, %v4093_v41  ;;  %1195 = vmatpush1.bf16.msra.mxu0 %v4620_v38  ;;  %1582 = vmatpush1.bf16.msra.mxu1 %v4635_v39  ;;  %vm355_vm6 = vcmp.eq.s32.totalorder %v321_v52, %v4966_v33 }
  0xb1   : > { %1196 = vmatprep.subr.bf16.mxu0 %v4625_v42  ;;  %1583 = vmatprep.subr.bf16.mxu1 %v4640_v43  ;;  %v4097_v16 = vsel %vm355_vm6, 1.0, %v6196_v36 }
  0xb2   : > { %v646_v51 = vpop.permute.xlu1 %645  ;;  %4116 = vmatmul.mubr.msk.bf16.gmra.mxu0 %vm453_vm2, %v398_v46  ;;  %4569 = vset.pattern.permute.xlu0 %v4737_v30 }
  0xb3   : > { %4545 = vset.pattern.permute.xlu1 %v4735_v26  ;;  %530 = vmatprep.mubr.bf16.mxu0 %v6194_v0  ;;  %vm678_vm1 = vcmp.eq.s32.totalorder %v646_v51, %v4966_v33  ;;  %v330_v59 = vpop.permute.xlu0 %329 }
  0xb4   : > { %1045 = vperm.xlu1 %4545, %v4823_v7   ;;  %1197 = vmatpush1.bf16.msra.mxu0 %v4623_v47  ;;  %v4130_v55 = vsel %vm678_vm1, 1.0, %v6196_v36  ;;  %vm358_vm10 = vcmp.eq.s32.totalorder %v330_v59, %v4966_v33 }
  0xb5   : > { %1198 = vmatprep.subr.bf16.mxu0 %v4631_v49  ;;  %1584 = vmatpush1.bf16.msra.mxu1 %v4638_v50  ;;  %v722_v2 = vpack.c.bf16 %v4130_v55, %v4129_v60  ;;  %v4649_v55 = vld [vmem:[%s6186_s1 + $0x114] ss:$8 sps:$4 sm:$0xff]  }
  0xb6   : > { %4149 = vmatmul.mubr.msk.bf16.gmra.mxu1 %vm453_vm2, %v721_v54  ;;  %2206 = vperm.xlu0 %4569, %v4820_v6  }
  0xb7   : > { %v315_v57 = vpop.permute.xlu1 %314  ;;  %861 = vmatprep.mubr.bf16.mxu1 %v6194_v0  ;;  %2347 = vmatprep.subr.bf16.mxu1 %v4652_v14 }
  0xb8   : > { %vm353_vm3 = vcmp.eq.s32.totalorder %v315_v57, %v4966_v33  ;;  %4546 = vset.pattern.permute.xlu1 %v4736_v28  ;;  %1199 = vmatpush1.bf16.msra.mxu0 %v4629_v56 }
  0xb9   : > { %v4095_v61 = vsel %vm353_vm3, 1.0, %v6196_v36  ;;  %1430 = vperm.xlu1 %4546, %v4823_v7   ;;  %1962 = vmatprep.subr.bf16.mxu0 %v4643_v1  ;;  %v5125_v7 = vpop.permute.xlu0 %332 }
  0xba   : > { %v399_v62 = vpack.c.bf16 %v4096_v58, %v4095_v61  ;;  %4572 = vset.pattern.permute.xlu0 %v4740_v63  ;;  %vm359_vm14 = vcmp.eq.s32.totalorder %v5125_v7, %v4966_v33  ;;  %v4646_v58 = vld [vmem:[%s6186_s1 + $0x124] ss:$8 sps:$4 sm:$0xff]  }
  0xbb   : > { %2552 = vperm.xlu0 %4572, %v4842_v12   ;;  %v4101_v45 = vsel %vm359_vm14, 1.0, %v6196_v36  ;;  %v4655_v7 = vld [vmem:[%s6186_s1 + $0x104] ss:$8 sps:$4 sm:$0xff]  }
  0xbc   : > { %v649_v3 = vpop.permute.xlu1 %648  ;;  %4117 = vmatmul.mubr.msk.bf16.gmra.mxu0 %vm453_vm2, %v399_v62 }
  0xbd   : > { %1433 = vperm.xlu1 %4546, %v4831_v9   ;;  %540 = vmatprep.mubr.bf16.mxu0 %v6194_v0  ;;  %vm679_vm4 = vcmp.eq.s32.totalorder %v649_v3, %v4966_v33  ;;  %v655_v15 = vpop.permute.xlu0 %654  ;;  %v4650_v3 = vld [vmem:[%s6186_s1 + $0x170] ss:$8 sps:$4 sm:$0xff]  }
  0xbe   : > { %4150 = vmatmul.mubr.msk.bf16.gmra.mxu1 %vm453_vm2, %v722_v2  ;;  %v4131_v5 = vsel %vm679_vm4, 1.0, %v6196_v36  ;;  %vm681_vm8 = vcmp.eq.s32.totalorder %v655_v15, %v4966_v33  ;;  %v4653_v15 = vld [vmem:[%s6186_s1 + $0x100] ss:$8 sps:$4 sm:$0xff]  }
  0xbf   : > { %871 = vmatprep.mubr.bf16.mxu1 %v6194_v0  ;;  %2555 = vperm.xlu0 %4572, %v4856_v17  }
  0xc0   : > { %v652_v4 = vpop.permute.xlu1 %651 }
  0xc1   : > { %vm680_vm5 = vcmp.eq.s32.totalorder %v652_v4, %v4966_v33  ;;  %4548 = vset.pattern.permute.xlu1 %v4735_v26  ;;  %v667_v44 = vpop.permute.xlu0 %666 }
  0xc2   : > { %v4132_v10 = vsel %vm680_vm5, 1.0, %v6196_v36  ;;  %1054 = vperm.xlu1 %4548, %v4828_v8   ;;  %vm685_vm0 = vcmp.eq.s32.totalorder %v667_v44, %v4966_v33 }
  0xc3   : > { %v723_v11 = vpack.c.bf16 %v4132_v10, %v4131_v5  ;;  %2564 = vperm.xlu0 %4572, %v4878_v21   ;;  %v4137_v51 = vsel %vm685_vm0, 1.0, %v6196_v36  ;;  %v4658_v10 = vld [vmem:[%s6186_s1 + $0x164] ss:$8 sps:$4 sm:$0xff]  }
  0xc5   : > { %v324_v29 = vpop.permute.xlu1 %323  ;;  %v1013_v49 = vpop.permute.xlu0 %1012 }
  0xc6   : > { %vm356_vm7 = vcmp.eq.s32.totalorder %v324_v29, %v4966_v33  ;;  %4549 = vset.pattern.permute.xlu1 %v4736_v28  ;;  %4151 = vmatmul.mubr.msk.bf16.gmra.mxu1 %vm453_vm2, %v723_v11  ;;  %v4133_v28 = vsel %vm681_vm8, 1.0, %v6196_v36  ;;  %vm1057_vm3 = vcmp.eq.s32.totalorder %v1013_v49, %v4966_v33  ;;  %v4656_v29 = vld [vmem:[%s6186_s1 + $0x160] ss:$8 sps:$4 sm:$0xff]   ;;  %v4670_v49 = vld [vmem:[%s6186_s1 + $0x1f4] ss:$8 sps:$4 sm:$0xff]  }
  0xc7   : > { %v4098_v26 = vsel %vm356_vm7, 1.0, %v6196_v36  ;;  %1439 = vperm.xlu1 %4549, %v4828_v8   ;;  %881 = vmatprep.mubr.bf16.mxu1 %v6194_v0  ;;  %v4156_v53 = vsel %vm1057_vm3, 1.0, %v6196_v36 }
  0xc8   : > { %v400_v34 = vpack.c.bf16 %v4098_v26, %v4097_v16  ;;  %4577 = vset.pattern.permute.xlu0 %v4741_v35 }
  0xc9   : > { %2940 = vperm.xlu0 %4577, %v4856_v17   ;;  %v4100_v17 = vsel %vm358_vm10, 1.0, %v6196_v36  ;;  %v1016_v54 = vpop.permute.xlu0 %1015 }
  0xca   : > { %v658_v37 = vpop.permute.xlu1 %657  ;;  %4118 = vmatmul.mubr.msk.bf16.gmra.mxu0 %vm453_vm2, %v400_v34  ;;  %vm1058_vm7 = vcmp.eq.s32.totalorder %v1016_v54, %v4966_v33 }
  0xcb   : > { %vm682_vm9 = vcmp.eq.s32.totalorder %v658_v37, %v4966_v33  ;;  %4550 = vset.pattern.permute.xlu1 %v4738_v31  ;;  %550 = vmatprep.mubr.bf16.mxu0 %v6194_v0  ;;  %v4157_v4 = vsel %vm1058_vm7, 1.0, %v6196_v36 }
  0xcc   : > { %v4134_v8 = vsel %vm682_vm9, 1.0, %v6196_v36  ;;  %1779 = vperm.xlu1 %4550, %v4845_v13  }
  0xcd   : > { %v724_v38 = vpack.c.bf16 %v4134_v8, %v4133_v28  ;;  %2952 = vperm.xlu0 %4577, %v4866_v19   ;;  %v4659_v8 = vld [vmem:[%s6186_s1 + $0x150] ss:$8 sps:$4 sm:$0xff]  }
  0xce   : > { %v1401_v60 = vpop.permute.xlu0 %1400 }
  0xcf   : > { %v327_v39 = vpop.permute.xlu1 %326  ;;  %4152 = vmatmul.mubr.msk.bf16.gmra.mxu1 %vm453_vm2, %v724_v38  ;;  %vm1443_vm9 = vcmp.eq.s32.totalorder %v1401_v60, %v4966_v33  ;;  %v4664_v38 = vld [vmem:[%s6186_s1 + $0x144] ss:$8 sps:$4 sm:$0xff]  }
  0xd0   : > { %vm357_vm11 = vcmp.eq.s32.totalorder %v327_v39, %v4966_v33  ;;  %4551 = vset.pattern.permute.xlu1 %v4737_v30  ;;  %891 = vmatprep.mubr.bf16.mxu1 %v6194_v0  ;;  %v4189_v26 = vsel %vm1443_vm9, 1.0, %v6196_v36  ;;  %v5333_v60 = vld [vmem:[%s4814_s15 + $0x68] sm:$0xff] }
  0xd1   : > { %v4099_v40 = vsel %vm357_vm11, 1.0, %v6196_v36  ;;  %2164 = vperm.xlu1 %4551, %v4845_v13   ;;  %4580 = vset.pattern.permute.xlu0 %v4740_v63 }
  0xd2   : > { %v401_v41 = vpack.c.bf16 %v4100_v17, %v4099_v40  ;;  %2567 = vperm.xlu0 %4580, %v4866_v19   ;;  %v5233_v2 = vpop.permute.xlu0 %1412 }
  0xd4   : > { %v661_v42 = vpop.permute.xlu1 %660  ;;  %4119 = vmatmul.mubr.msk.bf16.gmra.mxu0 %vm453_vm2, %v401_v41 }
  0xd5   : > { %2167 = vperm.xlu1 %4551, %v4842_v12   ;;  %560 = vmatprep.mubr.bf16.mxu0 %v6194_v0  ;;  %vm683_vm12 = vcmp.eq.s32.totalorder %v661_v42, %v4966_v33  ;;  %v4662_v42 = vld [vmem:[%s6186_s1 + $0x140] ss:$8 sps:$4 sm:$0xff]  }
  0xd6   : > { %2576 = vperm.xlu0 %4580, %v4890_v23   ;;  %v4135_v13 = vsel %vm683_vm12, 1.0, %v6196_v36 }
  0xd7   : > { %v1025_v16 = vpop.permute.xlu0 %1024 }
  0xd8   : > { %v664_v43 = vpop.permute.xlu1 %663  ;;  %vm1061_vm11 = vcmp.eq.s32.totalorder %v1025_v16, %v4966_v33 }
  0xd9   : > { %vm684_vm13 = vcmp.eq.s32.totalorder %v664_v43, %v4966_v33  ;;  %4552 = vset.pattern.permute.xlu1 %v4738_v31  ;;  %v4160_v39 = vsel %vm1061_vm11, 1.0, %v6196_v36 }
  0xda   : > { %v4136_v19 = vsel %vm684_vm13, 1.0, %v6196_v36  ;;  %1788 = vperm.xlu1 %4552, %v4861_v18   ;;  %2579 = vperm.xlu0 %4580, %v4896_v24  }
  0xdb   : > { %v725_v12 = vpack.c.bf16 %v4136_v19, %v4135_v13  ;;  %v1028_v13 = vpop.permute.xlu0 %1027 }
  0xdd   : > { %v336_v46 = vpop.permute.xlu1 %335  ;;  %4153 = vmatmul.mubr.msk.bf16.gmra.mxu1 %vm453_vm2, %v725_v12 }
  0xde   : > { %vm360_vm15 = vcmp.eq.s32.totalorder %v336_v46, %v4966_v33  ;;  %4555 = vset.pattern.permute.xlu1 %v4737_v30  ;;  %901 = vmatprep.mubr.bf16.mxu1 %v6194_v0  ;;  %v4667_v46 = vld [vmem:[%s6186_s1 + $0x1b4] ss:$8 sps:$4 sm:$0xff]  }
  0xdf   : > { %v4102_v47 = vsel %vm360_vm15, 1.0, %v6196_v36  ;;  %2173 = vperm.xlu1 %4555, %v4861_v18   ;;  %4585 = vset.pattern.permute.xlu0 %v4741_v35  ;;  %vm1062_vm15 = vcmp.eq.s32.totalorder %v1028_v13, %v4966_v33 }
  0xe0   : > { %v402_v48 = vpack.c.bf16 %v4102_v47, %v4101_v45  ;;  %2964 = vperm.xlu0 %4585, %v4896_v24   ;;  %v4161_v45 = vsel %vm1062_vm15, 1.0, %v6196_v36  ;;  %v1037_v47 = vpop.permute.xlu0 %1036 }
  0xe2   : > { %v670_v50 = vpop.permute.xlu1 %669  ;;  %4120 = vmatmul.mubr.msk.bf16.gmra.mxu0 %vm453_vm2, %v402_v48 }
  0xe3   : > { %vm686_vm1 = vcmp.eq.s32.totalorder %v670_v50, %v4966_v33  ;;  %4556 = vset.pattern.permute.xlu1 %v4738_v31  ;;  %1216 = vmatprep.mubr.bf16.mxu0 %v6194_v0 }
  0xe4   : > { %v4138_v18 = vsel %vm686_vm1, 1.0, %v6196_v36  ;;  %1791 = vperm.xlu1 %4556, %v4872_v20   ;;  %4588 = vset.pattern.permute.xlu0 %v4740_v63  ;;  %vm1447_vm1 = vcmp.eq.s32.totalorder %v5233_v2, %v4966_v33 }
  0xe5   : > { %v726_v24 = vpack.c.bf16 %v4138_v18, %v4137_v51  ;;  %2588 = vperm.xlu0 %4588, %v4831_v9   ;;  %v4641_v9 = vld [vmem:[%s6186_s1 + $0x130] ss:$8 sps:$4 sm:$0xff]   ;;  %v4193_v51 = vsel %vm1447_vm1, 1.0, %v6196_v36 }
  0xe7   : > { %v1010_v52 = vpop.permute.xlu1 %1009  ;;  %4154 = vmatmul.mubr.msk.bf16.gmra.mxu1 %vm453_vm2, %v726_v24  ;;  %v1040_v24 = vpop.permute.xlu0 %1039 }
  0xe8   : > { %vm1056_vm4 = vcmp.eq.s32.totalorder %v1010_v52, %v4966_v33  ;;  %4557 = vset.pattern.permute.xlu1 %v4737_v30  ;;  %1601 = vmatprep.mubr.bf16.mxu1 %v6194_v0  ;;  %v5320_v52 = vld [vmem:[%s4814_s15 + $0x60] sm:$0xff] }
  0xe9   : > { %v4155_v56 = vsel %vm1056_vm4, 1.0, %v6196_v36  ;;  %2176 = vperm.xlu1 %4557, %v4872_v20   ;;  %2591 = vperm.xlu0 %4588, %v4820_v6   ;;  %v4644_v20 = vld [vmem:[%s6186_s1 + $0x120] ss:$8 sps:$4 sm:$0xff]   ;;  %vm1065_vm4 = vcmp.eq.s32.totalorder %v1037_v47, %v4966_v33 }
  0xea   : > { %v1104_v57 = vpack.c.bf16 %v4156_v53, %v4155_v56  ;;  %v4164_v56 = vsel %vm1065_vm4, 1.0, %v6196_v36 }
  0xec   : > { %v1395_v59 = vpop.permute.xlu1 %1394  ;;  %4179 = vmatmul.mubr.msk.bf16.vlgmr.msra.gmra.mxu0 %vm453_vm2, %v1104_v57  ;;  %v1049_v57 = vpop.permute.xlu0 %1048 }
  0xed   : > { %2179 = vperm.xlu1 %4557, %v4878_v21   ;;  %1226 = vmatprep.mubr.bf16.mxu0 %v6194_v0  ;;  %vm1441_vm5 = vcmp.eq.s32.totalorder %v1395_v59, %v4966_v33 }
  0xee   : > { %1963 = vmatpush1.bf16.msra.mxu0 %v4641_v9  ;;  %4591 = vset.pattern.permute.xlu0 %v4741_v35  ;;  %v4187_v61 = vsel %vm1441_vm5, 1.0, %v6196_v36 }
  0xef   : > { %1964 = vmatprep.subr.bf16.mxu0 %v4646_v58  ;;  %2976 = vperm.xlu0 %4591, %v4820_v6   ;;  %v4647_v6 = vld [vmem:[%s6186_s1 + $0x110] ss:$8 sps:$4 sm:$0xff]  }
  0xf0   : > { %v1398_v21 = vpop.permute.xlu1 %1397 }
  0xf1   : > { %vm1442_vm6 = vcmp.eq.s32.totalorder %v1398_v21, %v4966_v33  ;;  %4558 = vset.pattern.permute.xlu1 %v4738_v31 }
  0xf2   : > { %v4188_v62 = vsel %vm1442_vm6, 1.0, %v6196_v36  ;;  %1800 = vperm.xlu1 %4558, %v4887_v22   ;;  %1965 = vmatpush1.bf16.msra.mxu0 %v4644_v20  ;;  %v1052_v20 = vpop.permute.xlu0 %1051 }
  0xf3   : > { %v1489_v1 = vpack.c.bf16 %v4188_v62, %v4187_v61  ;;  %1966 = vmatprep.subr.bf16.mxu0 %v4649_v55  ;;  %v5344_v62 = vld [vmem:[%s4814_s15 + $0x78] sm:$0xff] }
  0xf5   : > { %v1019_v5 = vpop.permute.xlu1 %1018  ;;  %4211 = vmatmul.mubr.msk.bf16.vlgmr.msra.gmra.mxu1 %vm453_vm2, %v1489_v1 }
  0xf6   : > { %vm1059_vm8 = vcmp.eq.s32.totalorder %v1019_v5, %v4966_v33  ;;  %4560 = vset.pattern.permute.xlu1 %v4737_v30  ;;  %1611 = vmatprep.mubr.bf16.mxu1 %v6194_v0  ;;  %v1425_v2 = vpop.permute.xlu0 %1424 }
  0xf7   : > { %v4158_v11 = vsel %vm1059_vm8, 1.0, %v6196_v36  ;;  %2185 = vperm.xlu1 %4560, %v4887_v22   ;;  %1967 = vmatpush1.bf16.msra.mxu0 %v4647_v6  ;;  %v4661_v22 = vld [vmem:[%s6186_s1 + $0x154] ss:$8 sps:$4 sm:$0xff]   ;;  %vm1066_vm8 = vcmp.eq.s32.totalorder %v1040_v24, %v4966_v33  ;;  %v4671_v24 = vld [vmem:[%s6186_s1 + $0x1a0] ss:$8 sps:$4 sm:$0xff]  }
  0xf8   : > { %v1105_v14 = vpack.c.bf16 %v4158_v11, %v4157_v4  ;;  %2348 = vmatpush1.bf16.msra.mxu1 %v4650_v3  ;;  %1968 = vmatprep.subr.bf16.mxu0 %v4655_v7  ;;  %v4165_v6 = vsel %vm1066_vm8, 1.0, %v6196_v36 }
  0xf9   : > { %2349 = vmatprep.subr.bf16.mxu1 %v4658_v10  ;;  %v4716_v10 = vld [vmem:[%s4814_s15] sm:$0xff] }
  0xfa   : > { %v1404_v34 = vpop.permute.xlu1 %1403  ;;  %4180 = vmatmul.mubr.msk.bf16.gmra.mxu0 %vm453_vm2, %v1105_v14 }
  0xfb   : > { %vm1444_vm10 = vcmp.eq.s32.totalorder %v1404_v34, %v4966_v33  ;;  %4561 = vset.pattern.permute.xlu1 %v4738_v31  ;;  %1236 = vmatprep.mubr.bf16.mxu0 %v6194_v0  ;;  %v4717_v34 = vld [vmem:[%s4814_s15 + $0x8] sm:$0xff] }
  0xfc   : > { %v4190_v37 = vsel %vm1444_vm10, 1.0, %v6196_v36  ;;  %1803 = vperm.xlu1 %4561, %v4903_v25   ;;  %1969 = vmatpush1.bf16.msra.mxu0 %v4653_v15  ;;  %vm1451_vm10 = vcmp.eq.s32.totalorder %v1425_v2, %v4966_v33 }
  0xfd   : > { %v1490_v28 = vpack.c.bf16 %v4190_v37, %v4189_v26  ;;  %2350 = vmatpush1.bf16.msra.mxu1 %v4656_v29  ;;  %2732 = vmatprep.subr.bf16.mxu0 %v4667_v46  ;;  %v4197_v5 = vsel %vm1451_vm10, 1.0, %v6196_v36 }
  0xfe   : > { %2351 = vmatprep.subr.bf16.mxu1 %v4661_v22  ;;  %v1437_v22 = vpop.permute.xlu0 %1436 }
  0xff   : > { %v1022_v17 = vpop.permute.xlu1 %1021  ;;  %4212 = vmatmul.mubr.msk.bf16.gmra.mxu1 %vm453_vm2, %v1490_v28 }
 0x100   : > { %vm1060_vm12 = vcmp.eq.s32.totalorder %v1022_v17, %v4966_v33  ;;  %4562 = vset.pattern.permute.xlu1 %v4737_v30  ;;  %1621 = vmatprep.mubr.bf16.mxu1 %v6194_v0 }
 0x101   : > { %v4159_v40 = vsel %vm1060_vm12, 1.0, %v6196_v36  ;;  %2188 = vperm.xlu1 %4562, %v4903_v25   ;;  %2352 = vmatpush1.bf16.msra.mxu1 %v4659_v8  ;;  %vm1069_vm12 = vcmp.eq.s32.totalorder %v1049_v57, %v4966_v33 }
 0x102   : > { %v1106_v41 = vpack.c.bf16 %v4160_v39, %v4159_v40  ;;  %2353 = vmatprep.subr.bf16.mxu1 %v4664_v38  ;;  %v4168_v14 = vsel %vm1069_vm12, 1.0, %v6196_v36  ;;  %v4718_v38 = vld [vmem:[%s4814_s15 + $0x18] sm:$0xff]  ;;  %v5379_v39 = vpop.permute.xlu0 %2170 }
 0x104   : > { %v1407_v43 = vpop.permute.xlu1 %1406  ;;  %4181 = vmatmul.mubr.msk.bf16.gmra.mxu0 %vm453_vm2, %v1106_v41 }
 0x105   : > { %2191 = vperm.xlu1 %4562, %v4890_v23   ;;  %1246 = vmatprep.mubr.bf16.mxu0 %v6194_v0  ;;  %vm1445_vm13 = vcmp.eq.s32.totalorder %v1407_v43, %v4966_v33 }
 0x106   : > { %2354 = vmatpush1.bf16.msra.mxu1 %v4662_v42  ;;  %v4191_v25 = vsel %vm1445_vm13, 1.0, %v6196_v36  ;;  %v1783_v13 = vpop.permute.xlu0 %1782 }
 0x107   : > { %3117 = vmatprep.subr.bf16.mxu1 %v4670_v49  ;;  %v4665_v49 = vld [vmem:[%s6186_s1 + $0x1b0] ss:$8 sps:$4 sm:$0xff]  }
 0x108   : > { %v1410_v19 = vpop.permute.xlu1 %1409 }
 0x109   : > { %vm1446_vm14 = vcmp.eq.s32.totalorder %v1410_v19, %v4966_v33  ;;  %4563 = vset.pattern.permute.xlu1 %v4738_v31 }
 0x10a   : > { %v4192_v12 = vsel %vm1446_vm14, 1.0, %v6196_v36  ;;  %1812 = vperm.xlu1 %4563, %v4916_v27  }
 0x10b   : > { %v1491_v23 = vpack.c.bf16 %v4192_v12, %v4191_v25 }
 0x10d   : > { %v1031_v44 = vpop.permute.xlu1 %1030  ;;  %4213 = vmatmul.mubr.msk.bf16.gmra.mxu1 %vm453_vm2, %v1491_v23  ;;  %v4719_v23 = vld [vmem:[%s4814_s15 + $0x20] sm:$0xff] }
 0x10e   : > { %vm1063_vm0 = vcmp.eq.s32.totalorder %v1031_v44, %v4966_v33  ;;  %4565 = vset.pattern.permute.xlu1 %v4737_v30  ;;  %1631 = vmatprep.mubr.bf16.mxu1 %v6194_v0 }
 0x10f   : > { %v4162_v48 = vsel %vm1063_vm0, 1.0, %v6196_v36  ;;  %2197 = vperm.xlu1 %4565, %v4916_v27   ;;  %vm1070_vm0 = vcmp.eq.s32.totalorder %v1052_v20, %v4966_v33  ;;  %v4676_v20 = vld [vmem:[%s6186_s1 + $0x1e4] ss:$8 sps:$4 sm:$0xff]  }
 0x110   : > { %v1107_v50 = vpack.c.bf16 %v4162_v48, %v4161_v45  ;;  %v4169_v40 = vsel %vm1070_vm0, 1.0, %v6196_v36 }
 0x112   : > { %v1416_v18 = vpop.permute.xlu1 %1415  ;;  %4182 = vmatmul.mubr.msk.bf16.gmra.mxu0 %vm453_vm2, %v1107_v50  ;;  %v4673_v50 = vld [vmem:[%s6186_s1 + $0x1a4] ss:$8 sps:$4 sm:$0xff]  }
 0x113   : > { %vm1448_vm3 = vcmp.eq.s32.totalorder %v1416_v18, %v4966_v33  ;;  %4566 = vset.pattern.permute.xlu1 %v4738_v31  ;;  %1256 = vmatprep.mubr.bf16.mxu0 %v6194_v0  ;;  %v4720_v18 = vld [vmem:[%s4814_s15 + $0x28] sm:$0xff] }
 0x114   : > { %v4194_v27 = vsel %vm1448_vm3, 1.0, %v6196_v36  ;;  %1815 = vperm.xlu1 %4566, %v5320_v52   ;;  %vm1455_vm3 = vcmp.eq.s32.totalorder %v1437_v22, %v4966_v33 }
 0x115   : > { %v1492_v53 = vpack.c.bf16 %v4194_v27, %v4193_v51  ;;  %v4201_v19 = vsel %vm1455_vm3, 1.0, %v6196_v36  ;;  %v1786_v27 = vpop.permute.xlu0 %1785 }
 0x117   : > { %v1034_v54 = vpop.permute.xlu1 %1033  ;;  %4214 = vmatmul.mubr.msk.bf16.gmra.mxu1 %vm453_vm2, %v1492_v53  ;;  %v4679_v53 = vld [vmem:[%s6186_s1 + $0x194] ss:$8 sps:$4 sm:$0xff]  }
 0x118   : > { %vm1064_vm5 = vcmp.eq.s32.totalorder %v1034_v54, %v4966_v33  ;;  %4567 = vset.pattern.permute.xlu1 %v4737_v30  ;;  %1641 = vmatprep.mubr.bf16.mxu1 %v6194_v0 }
 0x119   : > { %v4163_v9 = vsel %vm1064_vm5, 1.0, %v6196_v36  ;;  %2200 = vperm.xlu1 %4567, %v5320_v52   ;;  %vm1827_vm5 = vcmp.eq.s32.totalorder %v1783_v13, %v4966_v33 }
 0x11a   : > { %v1108_v58 = vpack.c.bf16 %v4164_v56, %v4163_v9  ;;  %v4220_v46 = vsel %vm1827_vm5, 1.0, %v6196_v36  ;;  %v4721_v9 = vld [vmem:[%s4814_s15 + $0x38] sm:$0xff] }
 0x11c   : > { %v1419_v59 = vpop.permute.xlu1 %1418  ;;  %4183 = vmatmul.mubr.msk.bf16.gmra.mxu0 %vm453_vm2, %v1108_v58 }
 0x11d   : > { %2203 = vperm.xlu1 %4567, %v5333_v60   ;;  %1266 = vmatprep.mubr.bf16.mxu0 %v6194_v0  ;;  %vm1449_vm6 = vcmp.eq.s32.totalorder %v1419_v59, %v4966_v33  ;;  %v4668_v59 = vld [vmem:[%s6186_s1 + $0x1f0] ss:$8 sps:$4 sm:$0xff]  }
 0x11e   : > { %v4195_v21 = vsel %vm1449_vm6, 1.0, %v6196_v36 }
 0x120   : > { %v1422_v55 = vpop.permute.xlu1 %1421 }
 0x121   : > { %vm1450_vm7 = vcmp.eq.s32.totalorder %v1422_v55, %v4966_v33  ;;  %4568 = vset.pattern.permute.xlu1 %v4738_v31  ;;  %v4677_v55 = vld [vmem:[%s6186_s1 + $0x190] ss:$8 sps:$4 sm:$0xff]  }
 0x122   : > { %v4196_v61 = vsel %vm1450_vm7, 1.0, %v6196_v36  ;;  %1824 = vperm.xlu1 %4568, %v5344_v62  }
 0x123   : > { %v1493_v1 = vpack.c.bf16 %v4196_v61, %v4195_v21 }
 0x125   : > { %v1043_v3 = vpop.permute.xlu1 %1042  ;;  %4215 = vmatmul.mubr.msk.bf16.gmra.mxu1 %vm453_vm2, %v1493_v1  ;;  %v4682_v1 = vld [vmem:[%s6186_s1 + $0x184] ss:$8 sps:$4 sm:$0xff]  }
 0x126   : > { %vm1067_vm9 = vcmp.eq.s32.totalorder %v1043_v3, %v4966_v33  ;;  %4570 = vset.pattern.permute.xlu1 %v4737_v30  ;;  %1651 = vmatprep.mubr.bf16.mxu1 %v6194_v0 }
 0x127   : > { %v4166_v31 = vsel %vm1067_vm9, 1.0, %v6196_v36  ;;  %2209 = vperm.xlu1 %4570, %v5344_v62   ;;  %vm1828_vm9 = vcmp.eq.s32.totalorder %v1786_v27, %v4966_v33 }
 0x128   : > { %v1109_v7 = vpack.c.bf16 %v4166_v31, %v4165_v6  ;;  %v4221_v61 = vsel %vm1828_vm9, 1.0, %v6196_v36 }
 0x12a   : > { %v1428_v4 = vpop.permute.xlu1 %1427  ;;  %4184 = vmatmul.mubr.msk.bf16.gmra.mxu0 %vm453_vm2, %v1109_v7  ;;  %v4674_v7 = vld [vmem:[%s6186_s1 + $0x1e0] ss:$8 sps:$4 sm:$0xff]  }
 0x12b   : > { %vm1452_vm11 = vcmp.eq.s32.totalorder %v1428_v4, %v4966_v33  ;;  %4571 = vset.pattern.permute.xlu1 %v4740_v63  ;;  %1276 = vmatprep.mubr.bf16.mxu0 %v6194_v0  ;;  %v1795_v4 = vpop.permute.xlu0 %1794 }
 0x12c   : > { %v4198_v30 = vsel %vm1452_vm11, 1.0, %v6196_v36  ;;  %2549 = vperm.xlu1 %4571, %v4716_v10   ;;  %vm2213_vm11 = vcmp.eq.s32.totalorder %v5379_v39, %v4966_v33 }
 0x12d   : > { %v1494_v11 = vpack.c.bf16 %v4198_v30, %v4197_v5  ;;  %v4680_v5 = vld [vmem:[%s6186_s1 + $0x180] ss:$8 sps:$4 sm:$0xff]   ;;  %v4685_v30 = vld [vmem:[%s6186_s1 + $0x1d4] ss:$8 sps:$4 sm:$0xff]  }
 0x12f   : > { %v1046_v15 = vpop.permute.xlu1 %1045  ;;  %4216 = vmatmul.mubr.msk.bf16.gmra.mxu1 %vm453_vm2, %v1494_v11 }
 0x130   : > { %vm1068_vm13 = vcmp.eq.s32.totalorder %v1046_v15, %v4966_v33  ;;  %4573 = vset.pattern.permute.xlu1 %v4741_v35  ;;  %1661 = vmatprep.mubr.bf16.mxu1 %v6194_v0 }
 0x131   : > { %v4167_v16 = vsel %vm1068_vm13, 1.0, %v6196_v36  ;;  %2934 = vperm.xlu1 %4573, %v4716_v10   ;;  %v4253_v10 = vsel %vm2213_vm11, 1.0, %v6196_v36  ;;  %vm1831_vm13 = vcmp.eq.s32.totalorder %v1795_v4, %v4966_v33 }
 0x132   : > { %v1110_v29 = vpack.c.bf16 %v4168_v14, %v4167_v16 }
 0x134   : > { %v1431_v26 = vpop.permute.xlu1 %1430  ;;  %4185 = vmatmul.mubr.msk.bf16.gmra.mxu0 %vm453_vm2, %v1110_v29  ;;  %v4722_v29 = vld [vmem:[%s4814_s15 + $0x40] sm:$0xff] }
 0x135   : > { %2937 = vperm.xlu1 %4573, %v4717_v34   ;;  %1286 = vmatprep.mubr.bf16.mxu0 %v6194_v0  ;;  %vm1453_vm14 = vcmp.eq.s32.totalorder %v1431_v26, %v4966_v33  ;;  %v4683_v34 = vld [vmem:[%s6186_s1 + $0x1d0] ss:$8 sps:$4 sm:$0xff]  }
 0x136   : > { %v4199_v28 = vsel %vm1453_vm14, 1.0, %v6196_v36 }
 0x138   : > { %v1434_v37 = vpop.permute.xlu1 %1433 }
 0x139   : > { %vm1454_vm15 = vcmp.eq.s32.totalorder %v1434_v37, %v4966_v33  ;;  %4574 = vset.pattern.permute.xlu1 %v4740_v63  ;;  %v4688_v37 = vld [vmem:[%s6186_s1 + $0x1c4] ss:$8 sps:$4 sm:$0xff]  }
 0x13a   : > { %v4200_v8 = vsel %vm1454_vm15, 1.0, %v6196_v36  ;;  %2558 = vperm.xlu1 %4574, %v4718_v38  }
 0x13b   : > { %v1495_v17 = vpack.c.bf16 %v4200_v8, %v4199_v28  ;;  %v4224_v8 = vsel %vm1831_vm13, 1.0, %v6196_v36 }
 0x13d   : > { %v1055_v41 = vpop.permute.xlu1 %1054  ;;  %4217 = vmatmul.mubr.msk.bf16.gmra.mxu1 %vm453_vm2, %v1495_v17 }
 0x13e   : > { %vm1071_vm1 = vcmp.eq.s32.totalorder %v1055_v41, %v4966_v33  ;;  %4575 = vset.pattern.permute.xlu1 %v4741_v35  ;;  %1671 = vmatprep.mubr.bf16.mxu1 %v6194_v0 }
 0x13f   : > { %v4170_v42 = vsel %vm1071_vm1, 1.0, %v6196_v36  ;;  %2943 = vperm.xlu1 %4575, %v4718_v38   ;;  %v1798_v38 = vpop.permute.xlu0 %1797 }
 0x140   : > { %v1111_v43 = vpack.c.bf16 %v4170_v42, %v4169_v40  ;;  %v4686_v42 = vld [vmem:[%s6186_s1 + $0x1c0] ss:$8 sps:$4 sm:$0xff]   ;;  %vm1832_vm1 = vcmp.eq.s32.totalorder %v1798_v38, %v4966_v33 }
 0x142   : > { %v1440_v25 = vpop.permute.xlu1 %1439  ;;  %4186 = vmatmul.mubr.msk.bf16.gmra.mxu0 %vm453_vm2, %v1111_v43 }
 0x143   : > { %vm1456_vm4 = vcmp.eq.s32.totalorder %v1440_v25, %v4966_v33  ;;  %4576 = vset.pattern.permute.xlu1 %v4740_v63  ;;  %1986 = vmatprep.mubr.bf16.mxu0 %v6194_v0  ;;  %v2183_v25 = vpop.permute.xlu0 %2182 }
 0x144   : > { %v4202_v12 = vsel %vm1456_vm4, 1.0, %v6196_v36  ;;  %2561 = vperm.xlu1 %4576, %v4719_v23   ;;  %vm2217_vm4 = vcmp.eq.s32.totalorder %v2183_v25, %v4966_v33 }
 0x145   : > { %v1496_v44 = vpack.c.bf16 %v4202_v12, %v4201_v19  ;;  %v4723_v19 = vld [vmem:[%s4814_s15 + $0x48] sm:$0xff] }
 0x147   : > { %v1780_v45 = vpop.permute.xlu1 %1779  ;;  %4218 = vmatmul.mubr.msk.bf16.gmra.mxu1 %vm453_vm2, %v1496_v44  ;;  %v5506_v27 = vpop.permute.xlu0 %2194 }
 0x148   : > { %vm1826_vm6 = vcmp.eq.s32.totalorder %v1780_v45, %v4966_v33  ;;  %4578 = vset.pattern.permute.xlu1 %v4741_v35  ;;  %2371 = vmatprep.mubr.bf16.mxu1 %v6194_v0 }
 0x149   : > { %v4219_v47 = vsel %vm1826_vm6, 1.0, %v6196_v36  ;;  %2946 = vperm.xlu1 %4578, %v4719_v23  }
 0x14a   : > { %v1874_v48 = vpack.c.bf16 %v4220_v46, %v4219_v47 }
 0x14c   : > { %v2165_v51 = vpop.permute.xlu1 %2164  ;;  %4243 = vmatmul.mubr.msk.bf16.vlgmr.msra.gmra.mxu0 %vm453_vm2, %v1874_v48 }
 0x14d   : > { %2949 = vperm.xlu1 %4578, %v4720_v18   ;;  %1996 = vmatprep.mubr.bf16.mxu0 %v6194_v0  ;;  %vm2211_vm7 = vcmp.eq.s32.totalorder %v2165_v51, %v4966_v33 }
 0x14e   : > { %2733 = vmatpush1.bf16.msra.mxu0 %v4665_v49  ;;  %v4251_v56 = vsel %vm2211_vm7, 1.0, %v6196_v36  ;;  %v4724_v49 = vld [vmem:[%s4814_s15 + $0x58] sm:$0xff] }
 0x14f   : > { %2734 = vmatprep.subr.bf16.mxu0 %v4673_v50 }
 0x150   : > { %v2168_v54 = vpop.permute.xlu1 %2167 }
 0x151   : > { %vm2212_vm8 = vcmp.eq.s32.totalorder %v2168_v54, %v4966_v33  ;;  %4579 = vset.pattern.permute.xlu1 %v4740_v63  ;;  %v4225_v54 = vsel %vm1832_vm1, 1.0, %v6196_v36 }
 0x152   : > { %v4252_v57 = vsel %vm2212_vm8, 1.0, %v6196_v36  ;;  %2570 = vperm.xlu1 %4579, %v4721_v9   ;;  %2735 = vmatpush1.bf16.msra.mxu0 %v4671_v24 }
 0x153   : > { %v2259_v58 = vpack.c.bf16 %v4252_v57, %v4251_v56  ;;  %2736 = vmatprep.subr.bf16.mxu0 %v4679_v53 }
 0x155   : > { %v1789_v21 = vpop.permute.xlu1 %1788  ;;  %4275 = vmatmul.mubr.msk.bf16.vlgmr.msra.gmra.mxu1 %vm453_vm2, %v2259_v58 }
 0x156   : > { %vm1829_vm10 = vcmp.eq.s32.totalorder %v1789_v21, %v4966_v33  ;;  %v5439_v2 = vpop.f32.mrf.mxu1  ;;  %4581 = vset.pattern.permute.xlu1 %v4741_v35  ;;  %2381 = vmatprep.mubr.bf16.mxu1 %v6194_v0 }
 0x157   : > { %v4222_v6 = vsel %vm1829_vm10, 1.0, %v6196_v36  ;;  %2955 = vperm.xlu1 %4581, %v4721_v9   ;;  %3118 = vmatpush1.bf16.msra.mxu1 %v4668_v59 }
 0x158   : > { %v1875_v3 = vpack.c.bf16 %v4222_v6, %v4221_v61  ;;  %v5446_v31 = vpop.f32.mrf.mxu1  ;;  %3119 = vmatprep.subr.bf16.mxu1 %v4676_v20  ;;  %2737 = vmatpush1.bf16.msra.mxu0 %v4677_v55  ;;  %v1807_v61 = vpop.permute.xlu0 %1806 }
 0x159   : > { %2738 = vmatprep.subr.bf16.mxu0 %v4682_v1  ;;  %v4257_v1 = vsel %vm2217_vm4, 1.0, %v6196_v36  ;;  %vm1835_vm6 = vcmp.eq.s32.totalorder %v1807_v61, %v4966_v33 }
 0x15a   : > { %v5458_v11 = vpop.f32.mrf.mxu1  ;;  %v2174_v14 = vpop.permute.xlu1 %2173  ;;  %4244 = vmatmul.mubr.msk.bf16.gmra.mxu0 %vm453_vm2, %v1875_v3 }
 0x15b   : > { %vm2214_vm12 = vcmp.eq.s32.totalorder %v2174_v14, %v4966_v33  ;;  %4582 = vset.pattern.permute.xlu1 %v4740_v63  ;;  %2006 = vmatprep.mubr.bf16.mxu0 %v6194_v0 }
 0x15c   : > { %v4254_v15 = vsel %vm2214_vm12, 1.0, %v6196_v36  ;;  %v5465_v16 = vpop.f32.mrf.mxu1  ;;  %2573 = vperm.xlu1 %4582, %v4722_v29   ;;  %3120 = vmatpush1.bf16.msra.mxu1 %v4674_v7  ;;  %vm2221_vm12 = vcmp.eq.s32.totalorder %v5506_v27, %v4966_v33 }
 0x15d   : > { %v2260_v26 = vpack.c.bf16 %v4254_v15, %v4253_v10  ;;  %2739 = vmatpush1.bf16.msra.mxu0 %v4680_v5  ;;  %3121 = vmatprep.subr.bf16.mxu1 %v4685_v30 }
 0x15e   : > { %v5472_v22 = vpop.f32.mrf.mxu1 }
 0x15f   : > { %v1792_v28 = vpop.permute.xlu1 %1791  ;;  %4276 = vmatmul.mubr.msk.bf16.gmra.mxu1 %vm453_vm2, %v2260_v26 }
 0x160   : > { %vm1830_vm14 = vcmp.eq.s32.totalorder %v1792_v28, %v4966_v33  ;;  %v5480_v17 = vpop.f32.mrf.mxu1  ;;  %4583 = vset.pattern.permute.xlu1 %v4741_v35  ;;  %2391 = vmatprep.mubr.bf16.mxu1 %v6194_v0  ;;  %v4228_v28 = vsel %vm1835_vm6, 1.0, %v6196_v36 }
 0x161   : > { %v4223_v39 = vsel %vm1830_vm14, 1.0, %v6196_v36  ;;  %2958 = vperm.xlu1 %4583, %v4722_v29   ;;  %3122 = vmatpush1.bf16.msra.mxu1 %v4683_v34 }
 0x162   : > { %v1876_v40 = vpack.c.bf16 %v4224_v8, %v4223_v39  ;;  %v5485_v41 = vpop.f32.mrf.mxu1  ;;  %3123 = vmatprep.subr.bf16.mxu1 %v4688_v37 }
 0x164   : > { %v5490_v43 = vpop.f32.mrf.mxu1  ;;  %v2177_v13 = vpop.permute.xlu1 %2176  ;;  %4245 = vmatmul.mubr.msk.bf16.gmra.mxu0 %vm453_vm2, %v1876_v40 }
 0x165   : > { %2961 = vperm.xlu1 %4583, %v4723_v19   ;;  %2016 = vmatprep.mubr.bf16.mxu0 %v6194_v0  ;;  %vm2215_vm15 = vcmp.eq.s32.totalorder %v2177_v13, %v4966_v33 }
 0x166   : > { %v833_v12 = vpop.f32.mrf.mxu1  ;;  %3124 = vmatpush1.bf16.msra.mxu1 %v4686_v42  ;;  %v4255_v47 = vsel %vm2215_vm15, 1.0, %v6196_v36 }
 0x168   : > { %v2180_v23 = vpop.permute.xlu1 %2179  ;;  %v512_v44 = vpop.f32.mrf.mxu0 }
 0x169   : > { %vm2216_vm0 = vcmp.eq.s32.totalorder %v2180_v23, %v4966_v33  ;;  %v5497_v45 = vadd.f32 %v833_v12, %v512_v44  ;;  %v835_v46 = vpop.f32.mrf.mxu1  ;;  %4584 = vset.pattern.permute.xlu1 %v4740_v63 }
 0x16a   : > { %v4256_v48 = vsel %vm2216_vm0, 1.0, %v6196_v36  ;;  %2582 = vperm.xlu1 %4584, %v4724_v49   ;;  %v514_v50 = vpop.f32.mrf.mxu0 }
 0x16b   : > { %v2261_v51 = vpack.c.bf16 %v4256_v48, %v4255_v47  ;;  %v5504_v18 = vadd.f32 %v835_v46, %v514_v50  ;;  %v837_v24 = vpop.f32.mrf.mxu1  ;;  %v1810_v46 = vpop.permute.xlu0 %1809 }
 0x16c   : > { %v516_v53 = vpop.f32.mrf.mxu0  ;;  %vm1836_vm10 = vcmp.eq.s32.totalorder %v1810_v46, %v4966_v33 }
 0x16d   : > { %v5509_v56 = vadd.f32 %v837_v24, %v516_v53  ;;  %v5511_v57 = vpop.f32.mrf.mxu1  ;;  %v1801_v9 = vpop.permute.xlu1 %1800  ;;  %4277 = vmatmul.mubr.msk.bf16.gmra.mxu1 %vm453_vm2, %v2261_v51 }
 0x16e   : > { %vm1833_vm3 = vcmp.eq.s32.totalorder %v1801_v9, %v4966_v33  ;;  %4586 = vset.pattern.permute.xlu1 %v4741_v35  ;;  %2401 = vmatprep.mubr.bf16.mxu1 %v6194_v0  ;;  %v5519_v55 = vpop.f32.mrf.mxu0 }
 0x16f   : > { %v4226_v58 = vsel %vm1833_vm3, 1.0, %v6196_v36  ;;  %v843_v59 = vpop.f32.mrf.mxu1  ;;  %2967 = vperm.xlu1 %4586, %v4724_v49  }
 0x170   : > { %v1877_v20 = vpack.c.bf16 %v4226_v58, %v4225_v54  ;;  %v4229_v58 = vsel %vm1836_vm10, 1.0, %v6196_v36 }
 0x171   : > { %v845_v21 = vpop.f32.mrf.mxu1 }
 0x172   : > { %v2186_v6 = vpop.permute.xlu1 %2185  ;;  %v522_v3 = vpop.f32.mrf.mxu0  ;;  %4246 = vmatmul.mubr.msk.bf16.gmra.mxu0 %vm453_vm2, %v1877_v20 }
 0x173   : > { %vm2218_vm5 = vcmp.eq.s32.totalorder %v2186_v6, %v4966_v33  ;;  %v5524_v7 = vadd.f32 %v843_v59, %v522_v3  ;;  %v847_v4 = vpop.f32.mrf.mxu1  ;;  %4587 = vset.pattern.permute.xlu1 %v4740_v63  ;;  %2026 = vmatprep.mubr.bf16.mxu0 %v6194_v0  ;;  %v4261_v6 = vsel %vm2221_vm12, 1.0, %v6196_v36 }
 0x174   : > { %v4258_v5 = vsel %vm2218_vm5, 1.0, %v6196_v36  ;;  %2585 = vperm.xlu1 %4587, %v5320_v52   ;;  %v524_v30 = vpop.f32.mrf.mxu0 }
 0x175   : > { %v2262_v10 = vpack.c.bf16 %v4258_v5, %v4257_v1  ;;  %v5531_v14 = vadd.f32 %v845_v21, %v524_v30  ;;  %v5533_v15 = vpop.f32.mrf.mxu1  ;;  %v1819_v1 = vpop.permute.xlu0 %1818 }
 0x176   : > { %6198 = vst [vmem:[#allocation3_spill] sm:$0xff] %v5533_v15  ;;  %v526_v29 = vpop.f32.mrf.mxu0  ;;  %vm1839_vm14 = vcmp.eq.s32.totalorder %v1819_v1, %v4966_v33 }
 0x177   : > { %v5535_v26 = vadd.f32 %v847_v4, %v526_v29  ;;  %v853_v34 = vpop.f32.mrf.mxu1  ;;  %v1804_v37 = vpop.permute.xlu1 %1803  ;;  %4278 = vmatmul.mubr.msk.bf16.gmra.mxu1 %vm453_vm2, %v2262_v10 }
 0x178   : > { %vm1834_vm7 = vcmp.eq.s32.totalorder %v1804_v37, %v4966_v33  ;;  %4589 = vset.pattern.permute.xlu1 %v4741_v35  ;;  %2411 = vmatprep.mubr.bf16.mxu1 %v6194_v0  ;;  %v5544_v40 = vpop.f32.mrf.mxu0 }
 0x179   : > { %v4227_v8 = vsel %vm1834_vm7, 1.0, %v6196_v36  ;;  %v855_v38 = vpop.f32.mrf.mxu1  ;;  %2970 = vperm.xlu1 %4589, %v5320_v52   ;;  %6199 = vst [vmem:[#allocation4_spill] sm:$0xff] %v5544_v40 }
 0x17a   : > { %v1878_v39 = vpack.c.bf16 %v4228_v28, %v4227_v8 }
 0x17b   : > { %v857_v42 = vpop.f32.mrf.mxu1 }
 0x17c   : > { %v2189_v13 = vpop.permute.xlu1 %2188  ;;  %v532_v19 = vpop.f32.mrf.mxu0  ;;  %4247 = vmatmul.mubr.msk.bf16.gmra.mxu0 %vm453_vm2, %v1878_v39 }
 0x17d   : > { %v5547_v25 = vadd.f32 %v853_v34, %v532_v19  ;;  %v5549_v12 = vpop.f32.mrf.mxu1  ;;  %2973 = vperm.xlu1 %4589, %v5333_v60   ;;  %2036 = vmatprep.mubr.bf16.mxu0 %v6194_v0  ;;  %vm2219_vm8 = vcmp.eq.s32.totalorder %v2189_v13, %v4966_v33 }
 0x17e   : > { %v534_v23 = vpop.f32.mrf.mxu0  ;;  %v4259_v60 = vsel %vm2219_vm8, 1.0, %v6196_v36 }
 0x17f   : > { %v5554_v52 = vadd.f32 %v855_v38, %v534_v23  ;;  %v863_v44 = vpop.f32.mrf.mxu1  ;;  %v4232_v38 = vsel %vm1839_vm14, 1.0, %v6196_v36 }
 0x180   : > { %v2192_v47 = vpop.permute.xlu1 %2191  ;;  %v536_v48 = vpop.f32.mrf.mxu0 }
 0x181   : > { %vm2220_vm9 = vcmp.eq.s32.totalorder %v2192_v47, %v4966_v33  ;;  %v5557_v49 = vadd.f32 %v857_v42, %v536_v48  ;;  %v865_v50 = vpop.f32.mrf.mxu1  ;;  %4590 = vset.pattern.permute.xlu1 %v4740_v63  ;;  %v1822_v47 = vpop.permute.xlu0 %1821 }
 0x182   : > { %v4260_v51 = vsel %vm2220_vm9, 1.0, %v6196_v36  ;;  %2594 = vperm.xlu1 %4590, %v5344_v62   ;;  %v5575_v20 = vpop.f32.mrf.mxu0  ;;  %vm1840_vm3 = vcmp.eq.s32.totalorder %v1822_v47, %v4966_v33 }
 0x183   : > { %v2263_v24 = vpack.c.bf16 %v4260_v51, %v4259_v60  ;;  %v867_v53 = vpop.f32.mrf.mxu1 }
 0x185   : > { %v5564_v54 = vpop.f32.mrf.mxu1  ;;  %v1813_v9 = vpop.permute.xlu1 %1812  ;;  %4279 = vmatmul.mubr.msk.bf16.gmra.mxu1 %vm453_vm2, %v2263_v24 }
 0x186   : > { %vm1837_vm11 = vcmp.eq.s32.totalorder %v1813_v9, %v4966_v33  ;;  %4592 = vset.pattern.permute.xlu1 %v4741_v35  ;;  %2421 = vmatprep.mubr.bf16.mxu1 %v6194_v0 }
 0x187   : > { %v4230_v63 = vsel %vm1837_vm11, 1.0, %v6196_v36  ;;  %v873_v59 = vpop.f32.mrf.mxu1  ;;  %2979 = vperm.xlu1 %4592, %v5344_v62  }
 0x188   : > { %v1879_v21 = vpack.c.bf16 %v4230_v63, %v4229_v58 }
 0x189   : > { %v875_v61 = vpop.f32.mrf.mxu1 }
 0x18a   : > { %v2198_v3 = vpop.permute.xlu1 %2197  ;;  %v542_v4 = vpop.f32.mrf.mxu0  ;;  %4248 = vmatmul.mubr.msk.bf16.gmra.mxu0 %vm453_vm2, %v1879_v21 }
 0x18b   : > { %vm2222_vm13 = vcmp.eq.s32.totalorder %v2198_v3, %v4966_v33  ;;  %v5580_v35 = vadd.f32 %v863_v44, %v542_v4  ;;  %v877_v27 = vpop.f32.mrf.mxu1  ;;  %2046 = vmatprep.mubr.bf16.mxu0 %v6194_v0  ;;  %v2207_v21 = vpop.permute.xlu0 %2206 }
 0x18c   : > { %v4262_v62 = vsel %vm2222_vm13, 1.0, %v6196_v36  ;;  %v544_v5 = vpop.f32.mrf.mxu0  ;;  %vm2225_vm5 = vcmp.eq.s32.totalorder %v2207_v21, %v4966_v33 }
 0x18d   : > { %v2264_v30 = vpack.c.bf16 %v4262_v62, %v4261_v6  ;;  %v5585_v10 = vadd.f32 %v865_v50, %v544_v5  ;;  %v5587_v29 = vpop.f32.mrf.mxu1 }
 0x18e   : > { %v546_v34 = vpop.f32.mrf.mxu0 }
 0x18f   : > { %v5589_v37 = vadd.f32 %v867_v53, %v546_v34  ;;  %v1816_v28 = vpop.permute.xlu1 %1815  ;;  %v883_v8 = vpop.f32.mrf.mxu1  ;;  %4280 = vmatmul.mubr.msk.bf16.gmra.mxu1 %vm453_vm2, %v2264_v30 }
 0x190   : > { %vm1838_vm15 = vcmp.eq.s32.totalorder %v1816_v28, %v4966_v33  ;;  %2431 = vmatprep.mubr.bf16.mxu1 %v6194_v0  ;;  %v5596_v13 = vpop.f32.mrf.mxu0  ;;  %v2553_v30 = vpop.permute.xlu0 %2552 }
 0x191   : > { %v4231_v39 = vsel %vm1838_vm15, 1.0, %v6196_v36  ;;  %v885_v19 = vpop.f32.mrf.mxu1  ;;  %vm2597_vm7 = vcmp.eq.s32.totalorder %v2553_v30, %v4966_v33 }
 0x192   : > { %v1880_v42 = vpack.c.bf16 %v4232_v38, %v4231_v39  ;;  %v4265_v38 = vsel %vm2225_vm5, 1.0, %v6196_v36 }
 0x193   : > { %v887_v50 = vpop.f32.mrf.mxu1 }
 0x194   : > { %v2201_v23 = vpop.permute.xlu1 %2200  ;;  %v552_v44 = vpop.f32.mrf.mxu0  ;;  %4249 = vmatmul.mubr.msk.bf16.gmra.mxu0 %vm453_vm2, %v1880_v42 }
 0x195   : > { %v5599_v46 = vadd.f32 %v873_v59, %v552_v44  ;;  %2056 = vmatprep.mubr.bf16.mxu0 %v6194_v0  ;;  %vm2223_vm0 = vcmp.eq.s32.totalorder %v2201_v23, %v4966_v33  ;;  %v5611_v63 = vpop.f32.mrf.mxu1 }
 0x196   : > { %v554_v48 = vpop.f32.mrf.mxu0  ;;  %v4263_v9 = vsel %vm2223_vm0, 1.0, %v6196_v36 }
 0x197   : > { %v5603_v60 = vadd.f32 %v875_v61, %v554_v48  ;;  %v4233_v61 = vsel %vm1840_vm3, 1.0, %v6196_v36 }
 0x198   : > { %v2204_v51 = vpop.permute.xlu1 %2203  ;;  %v556_v24 = vpop.f32.mrf.mxu0 }
 0x199   : > { %vm2224_vm1 = vcmp.eq.s32.totalorder %v2204_v51, %v4966_v33  ;;  %v5606_v53 = vadd.f32 %v877_v27, %v556_v24 }
 0x19a   : > { %v4264_v58 = vsel %vm2224_vm1, 1.0, %v6196_v36  ;;  %v5623_v27 = vpop.f32.mrf.mxu0 }
 0x19b   : > { %v2265_v59 = vpack.c.bf16 %v4264_v58, %v4263_v9 }
 0x19d   : > { %v1825_v1 = vpop.permute.xlu1 %1824  ;;  %v5613_v6 = vpop.f32.mrf.mxu1  ;;  %4281 = vmatmul.mubr.msk.bf16.gmra.mxu1 %vm453_vm2, %v2265_v59 }
 0x19e   : > { %vm1841_vm4 = vcmp.eq.s32.totalorder %v1825_v1, %v4966_v33  ;;  %2441 = vmatprep.mubr.bf16.mxu1 %v6194_v0  ;;  %v2556_v59 = vpop.permute.xlu0 %2555 }
 0x19f   : > { %v4234_v3 = vsel %vm1841_vm4, 1.0, %v6196_v36  ;;  %v5620_v4 = vpop.f32.mrf.mxu1  ;;  %vm2598_vm11 = vcmp.eq.s32.totalorder %v2556_v59, %v4966_v33 }
 0x1a0   : > { %v1881_v62 = vpack.c.bf16 %v4234_v3, %v4233_v61 }
 0x1a1   : > { %v5625_v5 = vpop.f32.mrf.mxu1 }
 0x1a2   : > { %v2210_v34 = vpop.permute.xlu1 %2209  ;;  %v562_v28 = vpop.f32.mrf.mxu0  ;;  %4250 = vmatmul.mubr.msk.bf16.gmra.mxu0 %vm453_vm2, %v1881_v62 }
 0x1a3   : > { %vm2226_vm6 = vcmp.eq.s32.totalorder %v2210_v34, %v4966_v33  ;;  %v5630_v39 = vadd.f32 %v883_v8, %v562_v28  ;;  %2756 = vmatprep.mubr.bf16.mxu0 %v6194_v0  ;;  %v5635_v47 = vpop.f32.mrf.mxu1  ;;  %v4284_v8 = vsel %vm2597_vm7, 1.0, %v6196_v36  ;;  %v2565_v34 = vpop.permute.xlu0 %2564 }
 0x1a4   : > { %v4266_v42 = vsel %vm2226_vm6, 1.0, %v6196_v36  ;;  %v564_v23 = vpop.f32.mrf.mxu0  ;;  %vm2601_vm15 = vcmp.eq.s32.totalorder %v2565_v34, %v4966_v33 }
 0x1a5   : > { %v2266_v44 = vpack.c.bf16 %v4266_v42, %v4265_v38  ;;  %v5637_v48 = vadd.f32 %v885_v19, %v564_v23 }
 0x1a6   : > { %v566_v51 = vpop.f32.mrf.mxu0 }
 0x1a7   : > { %v5639_v24 = vadd.f32 %v887_v50, %v566_v51  ;;  %v2550_v9 = vpop.permute.xlu1 %2549  ;;  %v5641_v58 = vpop.f32.mrf.mxu1  ;;  %4282 = vmatmul.mubr.msk.bf16.gmra.mxu1 %vm453_vm2, %v2266_v44 }
 0x1a8   : > { %vm2596_vm8 = vcmp.eq.s32.totalorder %v2550_v9, %v4966_v33  ;;  %3141 = vmatprep.mubr.bf16.mxu1 %v6194_v0  ;;  %v5648_v19 = vpop.f32.mrf.mxu0 }
 0x1a9   : > { %v4283_v21 = vsel %vm2596_vm8, 1.0, %v6196_v36  ;;  %v5650_v61 = vpop.f32.mrf.mxu1 }
 0x1aa   : > { %v2644_v1 = vpack.c.bf16 %v4284_v8, %v4283_v21  ;;  %v2941_v21 = vpop.permute.xlu0 %2940 }
 0x1ab   : > { %v5655_v28 = vpop.f32.mrf.mxu1  ;;  %vm2983_vm13 = vcmp.eq.s32.totalorder %v2941_v21, %v4966_v33 }
 0x1ac   : > { %v2935_v50 = vpop.permute.xlu1 %2934  ;;  %v1218_v3 = vpop.f32.mrf.mxu0  ;;  %4307 = vmatmul.mubr.msk.bf16.vlgmr.msra.gmra.mxu0 %vm453_vm2, %v2644_v1  ;;  %v4285_v1 = vsel %vm2598_vm11, 1.0, %v6196_v36 }
 0x1ad   : > { %v1329_v62 = vadd.f32 %v1218_v3, %v5497_v45  ;;  %2766 = vmatprep.mubr.bf16.mxu0 %v6194_v0  ;;  %vm2981_vm9 = vcmp.eq.s32.totalorder %v2935_v50, %v4966_v33  ;;  %v5664_v9 = vpop.f32.mrf.mxu1 }
 0x1ae   : > { %v1220_v30 = vpop.f32.mrf.mxu0  ;;  %v4315_v51 = vsel %vm2981_vm9, 1.0, %v6196_v36 }
 0x1af   : > { %v1330_v38 = vadd.f32 %v1220_v30, %v5504_v18 }
 0x1b0   : > { %v2938_v42 = vpop.permute.xlu1 %2937  ;;  %v1222_v23 = vpop.f32.mrf.mxu0 }
 0x1b1   : > { %vm2982_vm10 = vcmp.eq.s32.totalorder %v2938_v42, %v4966_v33  ;;  %v1331_v44 = vadd.f32 %v1222_v23, %v5509_v56 }
 0x1b2   : > { %v4316_v45 = vsel %vm2982_vm10, 1.0, %v6196_v36  ;;  %v5674_v59 = vpop.f32.mrf.mxu0 }
 0x1b3   : > { %v3029_v8 = vpack.c.bf16 %v4316_v45, %v4315_v51  ;;  %6200 = vst [vmem:[#allocation5_spill] sm:$0xff] %v5674_v59 }
 0x1b5   : > { %v2559_v50 = vpop.permute.xlu1 %2558  ;;  %v1603_v18 = vpop.f32.mrf.mxu1  ;;  %4339 = vmatmul.mubr.msk.bf16.vlgmr.msra.gmra.mxu1 %vm453_vm2, %v3029_v8 }
 0x1b6   : > { %vm2599_vm12 = vcmp.eq.s32.totalorder %v2559_v50, %v4966_v33  ;;  %v5669_v3 = vadd.f32 %v1603_v18, %v1329_v62  ;;  %3151 = vmatprep.mubr.bf16.mxu1 %v6194_v0  ;;  %v4317_v62 = vsel %vm2983_vm13, 1.0, %v6196_v36 }
 0x1b7   : > { %v4286_v56 = vsel %vm2599_vm12, 1.0, %v6196_v36  ;;  %v1605_v30 = vpop.f32.mrf.mxu1 }
 0x1b8   : > { %v2645_v42 = vpack.c.bf16 %v4286_v56, %v4285_v1  ;;  %v5676_v23 = vadd.f32 %v1605_v30, %v1330_v38  ;;  %v4288_v30 = vsel %vm2601_vm15, 1.0, %v6196_v36 }
 0x1b9   : > { %v1607_v51 = vpop.f32.mrf.mxu1 }
 0x1ba   : > { %v5678_v45 = vadd.f32 %v1607_v51, %v1331_v44  ;;  %v2944_v8 = vpop.permute.xlu1 %2943  ;;  %v1228_v32 = vpop.f32.mrf.mxu0  ;;  %4308 = vmatmul.mubr.msk.bf16.gmra.mxu0 %vm453_vm2, %v2645_v42 }
 0x1bb   : > { %vm2984_vm14 = vcmp.eq.s32.totalorder %v2944_v8, %v4966_v33  ;;  %v1333_v50 = vadd.f32 %v1228_v32, %v5524_v7  ;;  %2776 = vmatprep.mubr.bf16.mxu0 %v6194_v0  ;;  %v5687_v44 = vpop.f32.mrf.mxu1 }
 0x1bc   : > { %6201 = vst [vmem:[#allocation6_spill] sm:$0xff] %v5678_v45  ;;  %v4318_v38 = vsel %vm2984_vm14, 1.0, %v6196_v36  ;;  %v1230_v21 = vpop.f32.mrf.mxu0  ;;  %6202 = vst [vmem:[#allocation7_spill] sm:$0xff] %v5687_v44 }
 0x1bd   : > { %v3030_v1 = vpack.c.bf16 %v4318_v38, %v4317_v62  ;;  %v1334_v18 = vadd.f32 %v1230_v21, %v5531_v14  ;;  %v2953_v62 = vpop.permute.xlu0 %2952 }
 0x1be   : > { %v1232_v56 = vpop.f32.mrf.mxu0  ;;  %vm2987_vm6 = vcmp.eq.s32.totalorder %v2953_v62, %v4966_v33 }
 0x1bf   : > { %v1335_v42 = vadd.f32 %v1232_v56, %v5535_v26  ;;  %v2562_v51 = vpop.permute.xlu1 %2561  ;;  %v1613_v8 = vpop.f32.mrf.mxu1  ;;  %4340 = vmatmul.mubr.msk.bf16.gmra.mxu1 %vm453_vm2, %v3030_v1 }
 0x1c0   : > { %vm2600_vm0 = vcmp.eq.s32.totalorder %v2562_v51, %v4966_v33  ;;  %v5694_v32 = vadd.f32 %v1613_v8, %v1333_v50  ;;  %3161 = vmatprep.mubr.bf16.mxu1 %v6194_v0  ;;  %v5698_v38 = vpop.f32.mrf.mxu0 }
 0x1c1   : > { %v4287_v7 = vsel %vm2600_vm0, 1.0, %v6196_v36  ;;  %v1615_v34 = vpop.f32.mrf.mxu1  ;;  %6203 = vst [vmem:[#allocation8_spill] sm:$0xff] %v5698_v38  ;;  %v2568_v8 = vpop.permute.xlu0 %2567 }
 0x1c2   : > { %v2646_v14 = vpack.c.bf16 %v4288_v30, %v4287_v7  ;;  %v5700_v21 = vadd.f32 %v1615_v34, %v1334_v18  ;;  %vm2602_vm4 = vcmp.eq.s32.totalorder %v2568_v8, %v4966_v33 }
 0x1c3   : > { %v1617_v26 = vpop.f32.mrf.mxu1 }
 0x1c4   : > { %v5702_v56 = vadd.f32 %v1617_v26, %v1335_v42  ;;  %v2947_v15 = vpop.permute.xlu1 %2946  ;;  %v1238_v1 = vpop.f32.mrf.mxu0  ;;  %4309 = vmatmul.mubr.msk.bf16.gmra.mxu0 %vm453_vm2, %v2646_v14 }
 0x1c5   : > { %v1337_v50 = vadd.f32 %v1238_v1, %v5547_v25  ;;  %2786 = vmatprep.mubr.bf16.mxu0 %v6194_v0  ;;  %vm2985_vm1 = vcmp.eq.s32.totalorder %v2947_v15, %v4966_v33  ;;  %v5714_v25 = vpop.f32.mrf.mxu1 }
 0x1c6   : > { %v1240_v51 = vpop.f32.mrf.mxu0  ;;  %v4319_v34 = vsel %vm2985_vm1, 1.0, %v6196_v36  ;;  %6204 = vst [vmem:[#allocation9_spill] sm:$0xff] %v5714_v25  ;;  %v4321_v25 = vsel %vm2987_vm6, 1.0, %v6196_v36 }
 0x1c7   : > { %v1338_v30 = vadd.f32 %v1240_v51, %v5554_v52  ;;  %v4289_v52 = vsel %vm2602_vm4, 1.0, %v6196_v36 }
 0x1c8   : > { %v2950_v7 = vpop.permute.xlu1 %2949  ;;  %v1242_v18 = vpop.f32.mrf.mxu0 }
 0x1c9   : > { %vm2986_vm3 = vcmp.eq.s32.totalorder %v2950_v7, %v4966_v33  ;;  %v1339_v42 = vadd.f32 %v1242_v18, %v5557_v49 }
 0x1ca   : > { %v4320_v14 = vsel %vm2986_vm3, 1.0, %v6196_v36  ;;  %v5724_v7 = vpop.f32.mrf.mxu0 }
 0x1cb   : > { %v3031_v26 = vpack.c.bf16 %v4320_v14, %v4319_v34 }
 0x1cd   : > { %v2571_v1 = vpop.permute.xlu1 %2570  ;;  %v1623_v15 = vpop.f32.mrf.mxu1  ;;  %4341 = vmatmul.mubr.msk.bf16.gmra.mxu1 %vm453_vm2, %v3031_v26 }
 0x1ce   : > { %vm2603_vm5 = vcmp.eq.s32.totalorder %v2571_v1, %v4966_v33  ;;  %v5719_v51 = vadd.f32 %v1623_v15, %v1337_v50  ;;  %3171 = vmatprep.mubr.bf16.mxu1 %v6194_v0  ;;  %v2577_v26 = vpop.permute.xlu0 %2576 }
 0x1cf   : > { %v4290_v49 = vsel %vm2603_vm5, 1.0, %v6196_v36  ;;  %v1625_v8 = vpop.f32.mrf.mxu1  ;;  %vm2605_vm8 = vcmp.eq.s32.totalorder %v2577_v26, %v4966_v33 }
 0x1d0   : > { %v2647_v18 = vpack.c.bf16 %v4290_v49, %v4289_v52  ;;  %v5726_v34 = vadd.f32 %v1625_v8, %v1338_v30 }
 0x1d1   : > { %v1627_v14 = vpop.f32.mrf.mxu1 }
 0x1d2   : > { %v5729_v38 = vadd.f32 %v1627_v14, %v1339_v42  ;;  %v2956_v50 = vpop.permute.xlu1 %2955  ;;  %v1248_v1 = vpop.f32.mrf.mxu0  ;;  %4310 = vmatmul.mubr.msk.bf16.gmra.mxu0 %vm453_vm2, %v2647_v18 }
 0x1d3   : > { %vm2988_vm7 = vcmp.eq.s32.totalorder %v2956_v50, %v4966_v33  ;;  %v1341_v62 = vadd.f32 %v1248_v1, %v5580_v35  ;;  %2796 = vmatprep.mubr.bf16.mxu0 %v6194_v0  ;;  %v5737_v49 = vpop.f32.mrf.mxu1  ;;  %v4292_v35 = vsel %vm2605_vm8, 1.0, %v6196_v36 }
 0x1d4   : > { %v4322_v15 = vsel %vm2988_vm7, 1.0, %v6196_v36  ;;  %v1250_v30 = vpop.f32.mrf.mxu0 }
 0x1d5   : > { %v3032_v52 = vpack.c.bf16 %v4322_v15, %v4321_v25  ;;  %v1342_v42 = vadd.f32 %v1250_v30, %v5585_v10 }
 0x1d6   : > { %v1252_v8 = vpop.f32.mrf.mxu0 }
 0x1d7   : > { %v1343_v14 = vadd.f32 %v1252_v8, %v5589_v37  ;;  %v2574_v18 = vpop.permute.xlu1 %2573  ;;  %v1633_v40 = vpop.f32.mrf.mxu1  ;;  %4342 = vmatmul.mubr.msk.bf16.gmra.mxu1 %vm453_vm2, %v3032_v52 }
 0x1d8   : > { %vm2604_vm9 = vcmp.eq.s32.totalorder %v2574_v18, %v4966_v33  ;;  %v5744_v50 = vadd.f32 %v1633_v40, %v1341_v62  ;;  %3181 = vmatprep.mubr.bf16.mxu1 %v6194_v0  ;;  %v5748_v10 = vpop.f32.mrf.mxu0 }
 0x1d9   : > { %v4291_v25 = vsel %vm2604_vm9, 1.0, %v6196_v36  ;;  %v1635_v26 = vpop.f32.mrf.mxu1 }
 0x1da   : > { %v2648_v1 = vpack.c.bf16 %v4292_v35, %v4291_v25  ;;  %v5750_v15 = vadd.f32 %v1635_v26, %v1342_v42  ;;  %v2580_v35 = vpop.permute.xlu0 %2579  ;;  %v4690_v26 = vld [vmem:[%s6188_s3 + $0x38] sm:$0xff]  }
 0x1db   : > { %v1637_v37 = vpop.f32.mrf.mxu1  ;;  %vm2606_vm12 = vcmp.eq.s32.totalorder %v2580_v35, %v4966_v33  ;;  %v963_v35 = vadd.f32 %v5587_v29, %v5623_v27  ;;  %v6206_v29 = vmov 0.0  }
 0x1dc   : > { %v5752_v30 = vadd.f32 %v1637_v37, %v1343_v14  ;;  %v2959_v52 = vpop.permute.xlu1 %2958  ;;  %v1258_v8 = vpop.f32.mrf.mxu0  ;;  %4311 = vmatmul.mubr.msk.bf16.gmra.mxu0 %vm453_vm2, %v2648_v1  ;;  %v4689_v14 = vld [vmem:[%s6188_s3 + $0x78] sm:$0xff]  }
 0x1dd   : > { %v1345_v40 = vadd.f32 %v1258_v8, %v5599_v46  ;;  %2806 = vmatprep.mubr.bf16.mxu0 %v6194_v0  ;;  %vm2989_vm10 = vcmp.eq.s32.totalorder %v2959_v52, %v4966_v33  ;;  %4375 = vmatprep.subr.bf16.mxu0 %v4689_v14 }
 0x1de   : > { %v1260_v62 = vpop.f32.mrf.mxu0  ;;  %v4323_v1 = vsel %vm2989_vm10, 1.0, %v6196_v36  ;;  %v2965_v8 = vpop.permute.xlu0 %2964  ;;  %4376 = vmatpush3.bf16.msra.mxu0 %v4690_v26 }
 0x1df   : > { %v1346_v18 = vadd.f32 %v1260_v62, %v5603_v60  ;;  %v5769_v60 = vpop.f32.mrf.mxu1  ;;  %vm2991_vm14 = vcmp.eq.s32.totalorder %v2965_v8, %v4966_v33 }
 0x1e0   : > { %v2962_v25 = vpop.permute.xlu1 %2961  ;;  %v1262_v42 = vpop.f32.mrf.mxu0  ;;  %v4325_v27 = vsel %vm2991_vm14, 1.0, %v6206_v29 }
 0x1e1   : > { %vm2990_vm11 = vcmp.eq.s32.totalorder %v2962_v25, %v4966_v33  ;;  %v1347_v46 = vadd.f32 %v1262_v42, %v5606_v53  ;;  %v6205_v53 = vmov 0   ;;  %v4293_v42 = vsel %vm2606_vm12, 1.0, %v6196_v36 }
 0x1e2   : > { %v4324_v37 = vsel %vm2990_vm11, 1.0, %v6196_v36  ;;  %v1264_v14 = vpop.f32.mrf.mxu0 }
 0x1e3   : > { %v3033_v52 = vpack.c.bf16 %v4324_v37, %v4323_v1 }
 0x1e5   : > { %v2583_v62 = vpop.permute.xlu1 %2582  ;;  %v1643_v0 = vpop.f32.mrf.mxu1  ;;  %4343 = vmatmul.mubr.msk.bf16.gmra.mxu1 %vm453_vm2, %v3033_v52 }
 0x1e6   : > { %vm2607_vm13 = vcmp.eq.s32.totalorder %v2583_v62, %v4966_v33  ;;  %v5774_v25 = vadd.f32 %v1643_v0, %v1345_v40  ;;  %3191 = vmatprep.mubr.bf16.mxu1 %v6205_v53  ;;  %v4691_v0 = vld [vmem:[%s6188_s3 + $0x70] sm:$0xff]   ;;  %v2589_v52 = vpop.permute.xlu0 %2588 }
 0x1e7   : > { %v4294_v44 = vsel %vm2607_vm13, 1.0, %v6196_v36  ;;  %v1645_v1 = vpop.f32.mrf.mxu1  ;;  %v4692_v62 = vld [vmem:[%s6188_s3 + $0x30] sm:$0xff]   ;;  %v1348_v36 = vadd.f32 %v1264_v14, %v963_v35  ;;  %4377 = vmatprep.subr.bf16.mxu0 %v4691_v0  ;;  %vm2609_vm0 = vcmp.eq.s32.totalorder %v2589_v52, %v4966_v33 }
 0x1e8   : > { %v2649_v26 = vpack.c.bf16 %v4294_v44, %v4293_v42  ;;  %v5782_v37 = vadd.f32 %v1645_v1, %v1346_v18  ;;  %4378 = vmatpush3.bf16.msra.mxu0 %v4692_v62  ;;  %v4296_v52 = vsel %vm2609_vm0, 1.0, %v6206_v29 }
 0x1e9   : > { %v1647_v40 = vpop.f32.mrf.mxu1 }
 0x1ea   : > { %v5790_v45 = vadd.f32 %v1647_v40, %v1347_v46  ;;  %v2968_v8 = vpop.permute.xlu1 %2967  ;;  %v1268_v59 = vpop.f32.mrf.mxu0  ;;  %4312 = vmatmul.mubr.msk.bf16.gmra.mxu0 %vm453_vm2, %v2649_v26  ;;  %v4693_v26 = vld [vmem:[%s6188_s3 + $0x68] sm:$0xff]  }
 0x1eb   : > { %vm2992_vm15 = vcmp.eq.s32.totalorder %v2968_v8, %v4966_v33  ;;  %v1349_v44 = vadd.f32 %v1268_v59, %v5630_v39  ;;  %v1649_v18 = vpop.f32.mrf.mxu1  ;;  %2816 = vmatprep.mubr.bf16.mxu0 %v6205_v53  ;;  %v4694_v39 = vld [vmem:[%s6188_s3 + $0x28] sm:$0xff]   ;;  %4379 = vmatprep.subr.bf16.mxu0 %v4693_v26 }
 0x1ec   : > { %v4326_v42 = vsel %vm2992_vm15, 1.0, %v6206_v29  ;;  %v5798_v14 = vadd.f32 %v1649_v18, %v1348_v36  ;;  %v1270_v46 = vpop.f32.mrf.mxu0  ;;  %4380 = vmatpush3.bf16.msra.mxu0 %v4694_v39  ;;  %v967_v18 = vadd.f32 %v5611_v63, %v5648_v19  ;;  %v969_v63 = vadd.f32 %v5620_v4, %v5446_v31  ;;  %v2592_v4 = vpop.permute.xlu0 %2591 }
 0x1ed   : > { %v3034_v1 = vpack.c.bf16 %v4326_v42, %v4325_v27  ;;  %v1350_v35 = vadd.f32 %v1270_v46, %v5637_v48  ;;  %vm2610_vm5 = vcmp.eq.s32.totalorder %v2592_v4, %v4966_v33 }
 0x1ee   : > { %v1272_v0 = vpop.f32.mrf.mxu0 }
 0x1ef   : > { %v1351_v59 = vadd.f32 %v1272_v0, %v5639_v24  ;;  %v2586_v40 = vpop.permute.xlu1 %2585  ;;  %v1653_v36 = vpop.f32.mrf.mxu1  ;;  %4344 = vmatmul.mubr.msk.bf16.gmra.mxu1 %vm453_vm2, %v3034_v1  ;;  %v4695_v24 = vld [vmem:[%s6188_s3 + $0x60] sm:$0xff]   ;;  %v968_v1 = vadd.f32 %v5613_v6, %v5439_v2  ;;  %v4697_v2 = vld [vmem:[%s6188_s3 + $0x58] sm:$0xff]  }
 0x1f0   : > { %vm2608_vm1 = vcmp.eq.s32.totalorder %v2586_v40, %v4966_v33  ;;  %v5812_v48 = vadd.f32 %v1653_v36, %v1349_v44  ;;  %3201 = vmatprep.mubr.bf16.mxu1 %v6205_v53  ;;  %v1274_v8 = vpop.f32.mrf.mxu0  ;;  %v4696_v44 = vld [vmem:[%s6188_s3 + $0x20] sm:$0xff]   ;;  %4381 = vmatprep.subr.bf16.mxu0 %v4695_v24 }
 0x1f1   : > { %v4295_v62 = vsel %vm2608_vm1, 1.0, %v6206_v29  ;;  %v1655_v27 = vpop.f32.mrf.mxu1  ;;  %v1352_v0 = vadd.f32 %v1274_v8, %v967_v18  ;;  %4382 = vmatpush3.bf16.msra.mxu0 %v4696_v44  ;;  %v4699_v18 = vld [vmem:[%s6188_s3 + $0x50] sm:$0xff]  }
 0x1f2   : > { %v2650_v42 = vpack.c.bf16 %v4296_v52, %v4295_v62  ;;  %v5821_v46 = vadd.f32 %v1655_v27, %v1350_v35  ;;  %v4698_v52 = vld [vmem:[%s6188_s3 + $0x18] sm:$0xff]   ;;  %v970_v62 = vadd.f32 %v5625_v5, %v5458_v11  ;;  %4383 = vmatprep.subr.bf16.mxu0 %v4697_v2  ;;  %v4700_v11 = vld [vmem:[%s6188_s3 + $0x10] sm:$0xff]  }
 0x1f3   : > { %v1657_v26 = vpop.f32.mrf.mxu1 }
 0x1f4   : > { %v5828_v39 = vadd.f32 %v1657_v26, %v1351_v59  ;;  %v2971_v40 = vpop.permute.xlu1 %2970  ;;  %v1278_v36 = vpop.f32.mrf.mxu0  ;;  %4313 = vmatmul.mubr.msk.bf16.gmra.mxu0 %vm453_vm2, %v2650_v42 }
 0x1f5   : > { %v1353_v19 = vadd.f32 %v1278_v36, %v968_v1  ;;  %v1659_v35 = vpop.f32.mrf.mxu1  ;;  %2826 = vmatprep.mubr.bf16.mxu0 %v6205_v53  ;;  %vm2993_vm3 = vcmp.eq.s32.totalorder %v2971_v40, %v4966_v33  ;;  %4384 = vmatpush3.bf16.msra.mxu0 %v4698_v52  ;;  %v2977_v1 = vpop.permute.xlu0 %2976  ;;  %v4701_v40 = vld [vmem:[%s6188_s3 + $0x48] sm:$0xff]  }
 0x1f6   : > { %v5837_v6 = vadd.f32 %v1659_v35, %v1352_v0  ;;  %v1280_v59 = vpop.f32.mrf.mxu0  ;;  %v4327_v42 = vsel %vm2993_vm3, 1.0, %v6206_v29  ;;  %4385 = vmatprep.subr.bf16.mxu0 %v4699_v18  ;;  %v4297_v35 = vsel %vm2610_vm5, 1.0, %v6206_v29  ;;  %vm2995_vm7 = vcmp.eq.s32.totalorder %v2977_v1, %v4966_v33 }
 0x1f7   : > { %v1354_v31 = vadd.f32 %v1280_v59, %v969_v63  ;;  %v4702_v63 = vld [vmem:[%s6188_s3 + $0x8] sm:$0xff]  }
 0x1f8   : > { %v2974_v8 = vpop.permute.xlu1 %2973  ;;  %v1282_v27 = vpop.f32.mrf.mxu0 }
 0x1f9   : > { %vm2994_vm4 = vcmp.eq.s32.totalorder %v2974_v8, %v4966_v33  ;;  %v1355_v24 = vadd.f32 %v1282_v27, %v970_v62  ;;  %4386 = vmatpush3.bf16.msra.mxu0 %v4700_v11  ;;  %v971_v62 = vadd.f32 %v5635_v47, %v5465_v16  ;;  %v4703_v27 = vld [vmem:[%s6188_s3 + $0x40] sm:$0xff]   ;;  %v4329_v16 = vsel %vm2995_vm7, 1.0, %v6206_v29 }
 0x1fa   : > { %v4328_v44 = vsel %vm2994_vm4, 1.0, %v6206_v29  ;;  %v1284_v2 = vpop.f32.mrf.mxu0  ;;  %4387 = vmatprep.subr.bf16.mxu0 %v4701_v40  ;;  %v4704_v47 = vld [vmem:[%s6188_s3] sm:$0xff]  }
 0x1fb   : > { %v3035_v5 = vpack.c.bf16 %v4328_v44, %v4327_v42  ;;  %v1356_v18 = vadd.f32 %v1284_v2, %v971_v62 }
 0x1fd   : > { %v2595_v26 = vpop.permute.xlu1 %2594  ;;  %v1663_v0 = vpop.f32.mrf.mxu1  ;;  %4345 = vmatmul.mubr.msk.bf16.gmra.mxu1 %vm453_vm2, %v3035_v5  ;;  %4388 = vmatpush3.bf16.msra.mxu0 %v4702_v63 }
 0x1fe   : > { %vm2611_vm6 = vcmp.eq.s32.totalorder %v2595_v26, %v4966_v33  ;;  %v5860_v36 = vadd.f32 %v1663_v0, %v1353_v19  ;;  %3211 = vmatprep.mubr.bf16.mxu1 %v6205_v53  ;;  %v972_v53 = vadd.f32 %v5641_v58, %v5472_v22  ;;  %v973_v22 = vadd.f32 %v5650_v61, %v5480_v17 }
 0x1ff   : > { %v4298_v59 = vsel %vm2611_vm6, 1.0, %v6206_v29  ;;  %v1665_v52 = vpop.f32.mrf.mxu1  ;;  %4389 = vmatprep.subr.bf16.mxu0 %v4703_v27  ;;  %v974_v26 = vadd.f32 %v5655_v28, %v5485_v41 }
 0x200   : > { %v2651_v19 = vpack.c.bf16 %v4298_v59, %v4297_v35  ;;  %v5871_v4 = vadd.f32 %v1665_v52, %v1354_v31 }
 0x201   : > { %v1667_v8 = vpop.f32.mrf.mxu1  ;;  %4390 = vmatpush3.bf16.msra.mxu0 %v4704_v47 }
 0x202   : > { %v5878_v42 = vadd.f32 %v1667_v8, %v1355_v24  ;;  %v2980_v44 = vpop.permute.xlu1 %2979  ;;  %v1288_v11 = vpop.f32.mrf.mxu0  ;;  %4314 = vmatmul.mubr.msk.bf16.gmra.mxu0 %vm453_vm2, %v2651_v19 }
 0x203   : > { %vm2996_vm8 = vcmp.eq.s32.totalorder %v2980_v44, %v4966_v33  ;;  %v1357_v58 = vadd.f32 %v1288_v11, %v972_v53  ;;  %v1669_v31 = vpop.f32.mrf.mxu1 }
 0x204   : > { %v4330_v24 = vsel %vm2996_vm8, 1.0, %v6206_v29  ;;  %v5889_v5 = vadd.f32 %v1669_v31, %v1356_v18  ;;  %v1290_v1 = vpop.f32.mrf.mxu0  ;;  %v975_v29 = vadd.f32 %v5664_v9, %v5490_v43 }
 0x205   : > { %v3036_v0 = vpack.c.bf16 %v4330_v24, %v4329_v16  ;;  %v1358_v40 = vadd.f32 %v1290_v1, %v973_v22 }
 0x206   : > { %v1292_v63 = vpop.f32.mrf.mxu0 }
 0x207   : > { %v1359_v35 = vadd.f32 %v1292_v63, %v974_v26  ;;  %v1673_v2 = vpop.f32.mrf.mxu1  ;;  %4346 = vmatmul.mubr.msk.bf16.gmra.mxu1 %vm453_vm2, %v3036_v0 }
 0x208   : > { %v5894_v33 = vadd.f32 %v1673_v2, %v1357_v58  ;;  %v1294_v17 = vpop.f32.mrf.mxu0 }
 0x209   : > { %v1675_v61 = vpop.f32.mrf.mxu1  ;;  %v1360_v62 = vadd.f32 %v1294_v17, %v975_v29  ;;  %v955_v29 = vadd.f32 %v5549_v12, %v5575_v20 }
 0x20a   : > { %v5898_v59 = vadd.f32 %v1675_v61, %v1358_v40 }
 0x20b   : > { %v1677_v52 = vpop.f32.mrf.mxu1 }
 0x20c   : > { %v5900_v41 = vadd.f32 %v1677_v52, %v1359_v35  ;;  %v1988_v28 = vpop.f32.mrf.mxu0 }
 0x20d   : > { %v2099_v19 = vadd.f32 %v1988_v28, %v5669_v3  ;;  %v1679_v53 = vpop.f32.mrf.mxu1 }
 0x20e   : > { %v5903_v8 = vadd.f32 %v1679_v53, %v1360_v62  ;;  %v1990_v27 = vpop.f32.mrf.mxu0 }
 0x20f   : > { %v2100_v18 = vadd.f32 %v1990_v27, %v5676_v23 }
 0x210   : > { %v5906_v44 = vpop.f32.mrf.mxu0 }
 0x212   : > { %v5910_v9 = vpop.f32.mrf.mxu0 }
 0x215   : > { %v2373_v11 = vpop.f32.mrf.mxu1 }
 0x216   : > { %v5908_v16 = vadd.f32 %v2373_v11, %v2099_v19 }
 0x217   : > { %v2375_v43 = vpop.f32.mrf.mxu1 }
 0x218   : > { %v5912_v47 = vadd.f32 %v2375_v43, %v2100_v18 }
 0x219   : > { %v5914_v22 = vpop.f32.mrf.mxu1 }
 0x21a   : > { %v1998_v58 = vpop.f32.mrf.mxu0 }
 0x21b   : > { %v2103_v3 = vadd.f32 %v1998_v58, %v5694_v32  ;;  %v5917_v24 = vpop.f32.mrf.mxu1 }
 0x21c   : > { %v2000_v31 = vpop.f32.mrf.mxu0 }
 0x21d   : > { %v2104_v23 = vadd.f32 %v2000_v31, %v5700_v21 }
 0x21e   : > { %v2002_v1 = vpop.f32.mrf.mxu0 }
 0x21f   : > { %v2105_v26 = vadd.f32 %v2002_v1, %v5702_v56  ;;  %v2383_v0 = vpop.f32.mrf.mxu1  ;;  %v1340_v56 = vadd.f32 %v5724_v7, %v955_v29 }
 0x220   : > { %v5921_v40 = vadd.f32 %v2383_v0, %v2103_v3  ;;  %v5923_v35 = vpop.f32.mrf.mxu0 }
 0x221   : > { %v2385_v63 = vpop.f32.mrf.mxu1  ;;  %v1725_v19 = vadd.f32 %v5737_v49, %v1340_v56 }
 0x222   : > { %v5925_v2 = vadd.f32 %v2385_v63, %v2104_v23 }
 0x223   : > { %v2387_v17 = vpop.f32.mrf.mxu1 }
 0x224   : > { %v5927_v61 = vadd.f32 %v2387_v17, %v2105_v26  ;;  %v2008_v32 = vpop.f32.mrf.mxu0 }
 0x225   : > { %v2107_v21 = vadd.f32 %v2008_v32, %v5719_v51  ;;  %v5936_v18 = vpop.f32.mrf.mxu1 }
 0x226   : > { %v2010_v52 = vpop.f32.mrf.mxu0 }
 0x227   : > { %v2108_v62 = vadd.f32 %v2010_v52, %v5726_v34  ;;  %v959_v34 = vadd.f32 %v5564_v54, %v5596_v13 }
 0x228   : > { %v2012_v28 = vpop.f32.mrf.mxu0 }
 0x229   : > { %v2109_v53 = vadd.f32 %v2012_v28, %v5729_v38  ;;  %v1344_v1 = vadd.f32 %v5748_v10, %v959_v34 }
 0x22a   : > { %v2014_v27 = vpop.f32.mrf.mxu0 }
 0x22b   : > { %v2110_v11 = vadd.f32 %v2014_v27, %v1725_v19  ;;  %v1729_v63 = vadd.f32 %v5769_v60, %v1344_v1 }
 0x22d   : > { %v2393_v43 = vpop.f32.mrf.mxu1 }
 0x22e   : > { %v5938_v58 = vadd.f32 %v2393_v43, %v2107_v21 }
 0x22f   : > { %v2395_v12 = vpop.f32.mrf.mxu1 }
 0x230   : > { %v5940_v20 = vadd.f32 %v2395_v12, %v2108_v62 }
 0x231   : > { %v2397_v51 = vpop.f32.mrf.mxu1 }
 0x232   : > { %v5942_v3 = vadd.f32 %v2397_v51, %v2109_v53  ;;  %v2018_v7 = vpop.f32.mrf.mxu0 }
 0x233   : > { %v2111_v49 = vadd.f32 %v2018_v7, %v5744_v50  ;;  %v2399_v38 = vpop.f32.mrf.mxu1 }
 0x234   : > { %v5947_v31 = vadd.f32 %v2399_v38, %v2110_v11  ;;  %v2020_v23 = vpop.f32.mrf.mxu0 }
 0x235   : > { %v2112_v26 = vadd.f32 %v2020_v23, %v5750_v15 }
 0x236   : > { %v2022_v0 = vpop.f32.mrf.mxu0 }
 0x237   : > { %v2113_v17 = vadd.f32 %v2022_v0, %v5752_v30  ;;  %v2403_v32 = vpop.f32.mrf.mxu1 }
 0x238   : > { %v5953_v29 = vadd.f32 %v2403_v32, %v2111_v49  ;;  %v2024_v21 = vpop.f32.mrf.mxu0 }
 0x239   : > { %v2114_v54 = vadd.f32 %v2024_v21, %v1729_v63  ;;  %v2405_v13 = vpop.f32.mrf.mxu1 }
 0x23a   : > { %v5955_v50 = vadd.f32 %v2405_v13, %v2112_v26 }
 0x23b   : > { %v2407_v52 = vpop.f32.mrf.mxu1 }
 0x23c   : > { %v5957_v56 = vadd.f32 %v2407_v52, %v2113_v17  ;;  %v2028_v62 = vpop.f32.mrf.mxu0 }
 0x23d   : > { %v2115_v10 = vadd.f32 %v2028_v62, %v5774_v25  ;;  %v2409_v15 = vpop.f32.mrf.mxu1 }
 0x23e   : > { %v5960_v28 = vadd.f32 %v2409_v15, %v2114_v54  ;;  %v2030_v60 = vpop.f32.mrf.mxu0 }
 0x23f   : > { %v2116_v30 = vadd.f32 %v2030_v60, %v5782_v37 }
 0x240   : > { %v2032_v19 = vpop.f32.mrf.mxu0 }
 0x241   : > { %v2117_v53 = vadd.f32 %v2032_v19, %v5790_v45  ;;  %v4706_v19 = vld [vmem:[%s6190_s5 + $0x30] sm:$0xff]  }
 0x242   : > { %v2034_v27 = vpop.f32.mrf.mxu0 }
 0x243   : > { %v2118_v11 = vadd.f32 %v2034_v27, %v5798_v14 }
 0x245   : > { %v2413_v43 = vpop.f32.mrf.mxu1 }
 0x246   : > { %v5965_v12 = vadd.f32 %v2413_v43, %v2115_v10 }
 0x247   : > { %v2415_v51 = vpop.f32.mrf.mxu1 }
 0x248   : > { %v5967_v7 = vadd.f32 %v2415_v51, %v2116_v30 }
 0x249   : > { %v2417_v34 = vpop.f32.mrf.mxu1 }
 0x24a   : > { %v5969_v25 = vadd.f32 %v2417_v34, %v2117_v53  ;;  %v2038_v49 = vpop.f32.mrf.mxu0 }
 0x24b   : > { %v2119_v38 = vadd.f32 %v2038_v49, %v5812_v48  ;;  %v2419_v23 = vpop.f32.mrf.mxu1 }
 0x24c   : > { %v5972_v37 = vadd.f32 %v2419_v23, %v2118_v11  ;;  %v2040_v1 = vpop.f32.mrf.mxu0 }
 0x24d   : > { %v2120_v45 = vadd.f32 %v2040_v1, %v5821_v46 }
 0x24e   : > { %v2042_v26 = vpop.f32.mrf.mxu0 }
 0x24f   : > { %v2121_v14 = vadd.f32 %v2042_v26, %v5828_v39  ;;  %v2423_v0 = vpop.f32.mrf.mxu1 }
 0x250   : > { %v5976_v63 = vadd.f32 %v2423_v0, %v2119_v38  ;;  %v2044_v17 = vpop.f32.mrf.mxu0 }
 0x251   : > { %v2122_v32 = vadd.f32 %v2044_v17, %v5837_v6  ;;  %v2425_v21 = vpop.f32.mrf.mxu1  ;;  %v4705_v6 = vld [vmem:[%s6190_s5 + $0x38] sm:$0xff]  }
 0x252   : > { %v5979_v54 = vadd.f32 %v2425_v21, %v2120_v45  ;;  %4455 = vmatprep.subr.bf16.mxu1 %v4705_v6 }
 0x253   : > { %v2427_v13 = vpop.f32.mrf.mxu1  ;;  %4456 = vmatpush3.bf16.msra.mxu1 %v4705_v6  ;;  %v6208_v6 = vld [vmem:[#allocation5_spill] sm:$0xff] }
 0x254   : > { %v5981_v48 = vadd.f32 %v2427_v13, %v2121_v14  ;;  %v2048_v52 = vpop.f32.mrf.mxu0  ;;  %4457 = vmatprep.subr.bf16.mxu1 %v4706_v19 }
 0x255   : > { %v2123_v62 = vadd.f32 %v2048_v52, %v5860_v36  ;;  %v2429_v10 = vpop.f32.mrf.mxu1 }
 0x256   : > { %v5984_v46 = vadd.f32 %v2429_v10, %v2122_v32  ;;  %v2050_v15 = vpop.f32.mrf.mxu0  ;;  %v6207_v10 = vlaneseq }
 0x257   : > { %v2124_v39 = vadd.f32 %v2050_v15, %v5871_v4  ;;  %4458 = vmatpush3.bf16.msra.mxu1 %v4706_v19 }
 0x258   : > { %v2052_v60 = vpop.f32.mrf.mxu0  ;;  %v3353_v15 = vshrl.u32 %v6207_v10, 7 }
 0x259   : > { %v2125_v30 = vadd.f32 %v2052_v60, %v5878_v42 }
 0x25a   : > { %v2054_v53 = vpop.f32.mrf.mxu0 }
 0x25b   : > { %v2126_v36 = vadd.f32 %v2054_v53, %v5889_v5  ;;  %v6209_v53 = vld [vmem:[#allocation6_spill] sm:$0xff] }
 0x25d   : > { %v2433_v27 = vpop.f32.mrf.mxu1 }
 0x25e   : > { %v5995_v11 = vadd.f32 %v2433_v27, %v2123_v62 }
 0x25f   : > { %v2435_v4 = vpop.f32.mrf.mxu1 }
 0x260   : > { %v5997_v43 = vadd.f32 %v2435_v4, %v2124_v39 }
 0x261   : > { %v2437_v42 = vpop.f32.mrf.mxu1 }
 0x262   : > { %v5999_v51 = vadd.f32 %v2437_v42, %v2125_v30  ;;  %v2058_v34 = vpop.f32.mrf.mxu0  ;;  %v947_v30 = vadd.f32 %v5511_v57, %v5519_v55 }
 0x263   : > { %v2127_v49 = vadd.f32 %v2058_v34, %v5894_v33  ;;  %v2439_v38 = vpop.f32.mrf.mxu1  ;;  %v3358_v34 = vsub.s32 1, %v3353_v15 }
 0x264   : > { %v6002_v23 = vadd.f32 %v2439_v38, %v2126_v36  ;;  %v2060_v5 = vpop.f32.mrf.mxu0  ;;  %v1332_v19 = vadd.f32 %v6208_v6, %v947_v30  ;;  %v2101_v36 = vadd.f32 %v5906_v44, %v6209_v53  ;;  %v6214_v53 = vld [vmem:[#allocation9_spill] sm:$0xff] }
 0x265   : > { %v2128_v1 = vadd.f32 %v2060_v5, %v5898_v59 }
 0x266   : > { %v2062_v45 = vpop.f32.mrf.mxu0  ;;  %v2486_v57 = vadd.f32 %v5914_v22, %v2101_v36 }
 0x267   : > { %v2129_v26 = vadd.f32 %v2062_v45, %v5900_v41  ;;  %v2443_v14 = vpop.f32.mrf.mxu1  ;;  %v3354_v41 = vsub.s32 0, %v3353_v15 }
 0x268   : > { %v6006_v0 = vadd.f32 %v2443_v14, %v2127_v49  ;;  %v2064_v17 = vpop.f32.mrf.mxu0  ;;  %v6210_v49 = vld [vmem:[#allocation7_spill] sm:$0xff] }
 0x269   : > { %v2130_v32 = vadd.f32 %v2064_v17, %v5903_v8  ;;  %v2445_v21 = vpop.f32.mrf.mxu1  ;;  %v3350_v8 = vld [vmem:[%s6187_s2] sm:$0x3]  ;;  %v1717_v38 = vadd.f32 %v6210_v49, %v1332_v19 }
 0x26a   : > { %v6009_v13 = vadd.f32 %v2445_v21, %v2128_v1  ;;  %v6025_v42 = vrot.slane %v3350_v8, %v3354_v41  ;;  %v6211_v21 = vld [vmem:[#allocation4_spill] sm:$0xff] }
 0x26b   : > { %v2447_v52 = vpop.f32.mrf.mxu1  ;;  %v2102_v45 = vadd.f32 %v5910_v9, %v1717_v38 }
 0x26c   : > { %v6011_v33 = vadd.f32 %v2447_v52, %v2129_v26  ;;  %v2758_v62 = vpop.f32.mrf.mxu0  ;;  %v6212_v52 = vld [vmem:[#allocation3_spill] sm:$0xff] }
 0x26d   : > { %v2449_v39 = vpop.f32.mrf.mxu1  ;;  %v2869_v27 = vadd.f32 %v2758_v62, %v5908_v16  ;;  %v951_v62 = vadd.f32 %v6212_v52, %v6211_v21  ;;  %v2487_v10 = vadd.f32 %v5917_v24, %v2102_v45 }
 0x26e   : > { %v6014_v59 = vadd.f32 %v2449_v39, %v2130_v32  ;;  %v2760_v60 = vpop.f32.mrf.mxu0  ;;  %v6032_v32 = vrot.slane %v3350_v8, %v3358_v34 }
 0x26f   : > { %v2870_v55 = vadd.f32 %v2760_v60, %v5912_v47  ;;  %v6213_v47 = vld [vmem:[#allocation8_spill] sm:$0xff] }
 0x270   : > { %v2762_v4 = vpop.f32.mrf.mxu0  ;;  %v1336_v60 = vadd.f32 %v6213_v47, %v951_v62 }
 0x271   : > { %v2871_v14 = vadd.f32 %v2762_v4, %v2486_v57 }
 0x272   : > { %v2764_v17 = vpop.f32.mrf.mxu0  ;;  %v1721_v36 = vadd.f32 %v6214_v53, %v1336_v60 }
 0x273   : > { %v2872_v41 = vadd.f32 %v2764_v17, %v2487_v10 }
 0x274   : > { %v2106_v49 = vadd.f32 %v5923_v35, %v1721_v36 }
 0x275   : > { %v3143_v5 = vpop.f32.mrf.mxu1 }
 0x276   : > { %v3254_v1 = vadd.f32 %v3143_v5, %v2869_v27 }
 0x277   : > { %v3145_v26 = vpop.f32.mrf.mxu1 }
 0x278   : > { %v3362_v44 = vadd.f32 %v6025_v42, %v3254_v1  ;;  %v3255_v16 = vadd.f32 %v3145_v26, %v2870_v55 }
 0x279   : > { %v3147_v15 = vpop.f32.mrf.mxu1 }
 0x27a   : > { %v3256_v22 = vadd.f32 %v3147_v15, %v2871_v14  ;;  %v2768_v39 = vpop.f32.mrf.mxu0  ;;  %v3426_v9 = vmul.f32 0.01, %v3362_v44  ;;  %vm3394_vm2 = vcmp.gt.f32.partialorder %v3362_v44, 0.0  ;;  %v3363_v6 = vadd.f32 %v6032_v32, %v3255_v16 }
 0x27b   : > { %v3149_v30 = vpop.f32.mrf.mxu1  ;;  %v2873_v24 = vadd.f32 %v2768_v39, %v5921_v40 }
 0x27c   : > { %v3364_v19 = vadd.f32 %v6025_v42, %v3256_v22  ;;  %v2770_v8 = vpop.f32.mrf.mxu0  ;;  %v3257_v27 = vadd.f32 %v3149_v30, %v2872_v41  ;;  %v3458_v38 = vsel %vm3394_vm2, %v3362_v44, %v3426_v9  ;;  %v3427_v55 = vmul.f32 0.01, %v3363_v6 }
 0x27d   : > { %v2874_v45 = vadd.f32 %v2770_v8, %v5925_v2  ;;  %vm3395_vm10 = vcmp.gt.f32.partialorder %v3363_v6, 0.0  ;;  %v2491_v44 = vadd.f32 %v5936_v18, %v2106_v49 }
 0x27e   : > { %vm3396_vm9 = vcmp.gt.f32.partialorder %v3364_v19, 0.0  ;;  %v3428_v4 = vmul.f32 0.01, %v3364_v19  ;;  %v2772_v34 = vpop.f32.mrf.mxu0  ;;  %v3365_v5 = vadd.f32 %v6032_v32, %v3257_v27  ;;  %v3459_v39 = vsel %vm3395_vm10, %v3363_v6, %v3427_v55 }
 0x27f   : > { %v3153_v57 = vpop.f32.mrf.mxu1  ;;  %v2875_v21 = vadd.f32 %v2772_v34, %v5927_v61 }
 0x280   : > { %v3460_v1 = vsel %vm3396_vm9, %v3364_v19, %v3428_v4  ;;  %v3258_v26 = vadd.f32 %v3153_v57, %v2873_v24  ;;  %vm3397_vm11 = vcmp.gt.f32.partialorder %v3365_v5, 0.0  ;;  %v3429_v17 = vmul.f32 0.01, %v3365_v5  ;;  %v2774_v52 = vpop.f32.mrf.mxu0 }
 0x281   : > { %v3490_v14 = vpack.c.bf16 %v3460_v1, %v3458_v38  ;;  %v3155_v16 = vpop.f32.mrf.mxu1  ;;  %v2876_v2 = vadd.f32 %v2774_v52, %v2491_v44 }
 0x282   : > { %v3366_v40 = vadd.f32 %v6025_v42, %v3258_v26  ;;  %v3259_v35 = vadd.f32 %v3155_v16, %v2874_v45  ;;  %v3461_v10 = vsel %vm3397_vm11, %v3365_v5, %v3429_v17 }
 0x283   : > { %v3157_v62 = vpop.f32.mrf.mxu1  ;;  %v3491_v41 = vpack.c.bf16 %v3461_v10, %v3459_v39 }
 0x284   : > { %v3260_v15 = vadd.f32 %v3157_v62, %v2875_v21  ;;  %v2778_v22 = vpop.f32.mrf.mxu0  ;;  %v3367_v47 = vadd.f32 %v6032_v32, %v3259_v35  ;;  %v3430_v9 = vmul.f32 0.01, %v3366_v40  ;;  %vm3398_vm12 = vcmp.gt.f32.partialorder %v3366_v40, 0.0 }
 0x285   : > { %v3159_v60 = vpop.f32.mrf.mxu1  ;;  %3673 = vmatprep.mubr.bf16.mxu0 %v3491_v41  ;;  %v2877_v24 = vadd.f32 %v2778_v22, %v5938_v58 }
 0x286   : > { %v3368_v30 = vadd.f32 %v6025_v42, %v3260_v15  ;;  %v3261_v61 = vadd.f32 %v3159_v60, %v2876_v2  ;;  %v2780_v8 = vpop.f32.mrf.mxu0  ;;  %3674 = vmatmul.mubr.bf16.vlgmr.msra.gmra.mxu0 %v3490_v14  ;;  %v3431_v18 = vmul.f32 0.01, %v3367_v47  ;;  %v3462_v36 = vsel %vm3398_vm12, %v3366_v40, %v3430_v9 }
 0x287   : > { %vm3399_vm14 = vcmp.gt.f32.partialorder %v3367_v47, 0.0  ;;  %v2878_v57 = vadd.f32 %v2780_v8, %v5940_v20 }
 0x288   : > { %vm3400_vm13 = vcmp.gt.f32.partialorder %v3368_v30, 0.0  ;;  %v3432_v19 = vmul.f32 0.01, %v3368_v30  ;;  %v3369_v53 = vadd.f32 %v6032_v32, %v3261_v61  ;;  %v2782_v34 = vpop.f32.mrf.mxu0  ;;  %v3463_v38 = vsel %vm3399_vm14, %v3367_v47, %v3431_v18 }
 0x289   : > { %v2879_v26 = vadd.f32 %v2782_v34, %v5942_v3 }
 0x28a   : > { %v3464_v6 = vsel %vm3400_vm13, %v3368_v30, %v3432_v19  ;;  %vm3401_vm15 = vcmp.gt.f32.partialorder %v3369_v53, 0.0  ;;  %v3433_v27 = vmul.f32 0.01, %v3369_v53  ;;  %v2784_v14 = vpop.f32.mrf.mxu0 }
 0x28b   : > { %v3492_v4 = vpack.c.bf16 %v3464_v6, %v3462_v36  ;;  %v2880_v52 = vadd.f32 %v2784_v14, %v5947_v31 }
 0x28c   : > { %v3465_v5 = vsel %vm3401_vm15, %v3369_v53, %v3433_v27 }
 0x28d   : > { %v3163_v49 = vpop.f32.mrf.mxu1  ;;  %v3493_v1 = vpack.c.bf16 %v3465_v5, %v3463_v38 }
 0x28e   : > { %v3262_v55 = vadd.f32 %v3163_v49, %v2877_v24 }
 0x28f   : > { %v3165_v45 = vpop.f32.mrf.mxu1  ;;  %3681 = vmatprep.mubr.bf16.mxu0 %v3493_v1 }
 0x290   : > { %v3370_v17 = vadd.f32 %v6025_v42, %v3262_v55  ;;  %v3263_v16 = vadd.f32 %v3165_v45, %v2878_v57  ;;  %3682 = vmatmul.mubr.bf16.gmra.mxu0 %v3492_v4 }
 0x291   : > { %v3167_v21 = vpop.f32.mrf.mxu1 }
 0x292   : > { %v3264_v40 = vadd.f32 %v3167_v21, %v2879_v26  ;;  %v2788_v58 = vpop.f32.mrf.mxu0  ;;  %v3434_v35 = vmul.f32 0.01, %v3370_v17  ;;  %vm3402_vm0 = vcmp.gt.f32.partialorder %v3370_v17, 0.0  ;;  %v3371_v20 = vadd.f32 %v6032_v32, %v3263_v16 }
 0x293   : > { %v3169_v44 = vpop.f32.mrf.mxu1  ;;  %v2881_v22 = vadd.f32 %v2788_v58, %v5953_v29 }
 0x294   : > { %v3372_v62 = vadd.f32 %v6025_v42, %v3264_v40  ;;  %v2790_v10 = vpop.f32.mrf.mxu0  ;;  %v3265_v3 = vadd.f32 %v3169_v44, %v2880_v52  ;;  %v3466_v2 = vsel %vm3402_vm0, %v3370_v17, %v3434_v35  ;;  %v3435_v41 = vmul.f32 0.01, %v3371_v20 }
 0x295   : > { %v2882_v9 = vadd.f32 %v2790_v10, %v5955_v50  ;;  %vm3403_vm3 = vcmp.gt.f32.partialorder %v3371_v20, 0.0 }
 0x296   : > { %vm3404_vm1 = vcmp.gt.f32.partialorder %v3372_v62, 0.0  ;;  %v3436_v15 = vmul.f32 0.01, %v3372_v62  ;;  %v2792_v39 = vpop.f32.mrf.mxu0  ;;  %v3373_v47 = vadd.f32 %v6032_v32, %v3265_v3  ;;  %v3467_v34 = vsel %vm3403_vm3, %v3371_v20, %v3435_v41 }
 0x297   : > { %v3173_v60 = vpop.f32.mrf.mxu1  ;;  %v2883_v18 = vadd.f32 %v2792_v39, %v5957_v56 }
 0x298   : > { %v3468_v31 = vsel %vm3404_vm1, %v3372_v62, %v3436_v15  ;;  %v3266_v30 = vadd.f32 %v3173_v60, %v2881_v22  ;;  %vm3405_vm4 = vcmp.gt.f32.partialorder %v3373_v47, 0.0  ;;  %v3437_v61 = vmul.f32 0.01, %v3373_v47  ;;  %v2794_v29 = vpop.f32.mrf.mxu0 }
 0x299   : > { %v3175_v19 = vpop.f32.mrf.mxu1  ;;  %v3494_v8 = vpack.c.bf16 %v3468_v31, %v3466_v2  ;;  %v2884_v49 = vadd.f32 %v2794_v29, %v5960_v28 }
 0x29a   : > { %v3374_v53 = vadd.f32 %v6025_v42, %v3266_v30  ;;  %v3267_v36 = vadd.f32 %v3175_v19, %v2882_v9  ;;  %v3469_v27 = vsel %vm3405_vm4, %v3373_v47, %v3437_v61 }
 0x29b   : > { %v3177_v6 = vpop.f32.mrf.mxu1  ;;  %v3495_v5 = vpack.c.bf16 %v3469_v27, %v3467_v34 }
 0x29c   : > { %v3268_v4 = vadd.f32 %v3177_v6, %v2883_v18  ;;  %v2798_v24 = vpop.f32.mrf.mxu0  ;;  %v3375_v50 = vadd.f32 %v6032_v32, %v3267_v36  ;;  %v3438_v57 = vmul.f32 0.01, %v3374_v53  ;;  %vm3406_vm5 = vcmp.gt.f32.partialorder %v3374_v53, 0.0 }
 0x29d   : > { %v3179_v38 = vpop.f32.mrf.mxu1  ;;  %3689 = vmatprep.mubr.bf16.mxu0 %v3495_v5  ;;  %v2885_v40 = vadd.f32 %v2798_v24, %v5965_v12 }
 0x29e   : > { %v3376_v55 = vadd.f32 %v6025_v42, %v3268_v4  ;;  %v3269_v56 = vadd.f32 %v3179_v38, %v2884_v49  ;;  %v2800_v45 = vpop.f32.mrf.mxu0  ;;  %3690 = vmatmul.mubr.bf16.gmra.mxu0 %v3494_v8  ;;  %v3439_v26 = vmul.f32 0.01, %v3375_v50  ;;  %v3470_v17 = vsel %vm3406_vm5, %v3374_v53, %v3438_v57 }
 0x29f   : > { %vm3407_vm7 = vcmp.gt.f32.partialorder %v3375_v50, 0.0  ;;  %v2886_v20 = vadd.f32 %v2800_v45, %v5967_v7 }
 0x2a0   : > { %vm3408_vm6 = vcmp.gt.f32.partialorder %v3376_v55, 0.0  ;;  %v3440_v1 = vmul.f32 0.01, %v3376_v55  ;;  %v3377_v14 = vadd.f32 %v6032_v32, %v3269_v56  ;;  %v2802_v58 = vpop.f32.mrf.mxu0  ;;  %v3471_v35 = vsel %vm3407_vm7, %v3375_v50, %v3439_v26 }
 0x2a1   : > { %v2887_v15 = vadd.f32 %v2802_v58, %v5969_v25 }
 0x2a2   : > { %v3472_v28 = vsel %vm3408_vm6, %v3376_v55, %v3440_v1  ;;  %vm3409_vm8 = vcmp.gt.f32.partialorder %v3377_v14, 0.0  ;;  %v3441_v16 = vmul.f32 0.01, %v3377_v14  ;;  %v2804_v22 = vpop.f32.mrf.mxu0 }
 0x2a3   : > { %v3496_v21 = vpack.c.bf16 %v3472_v28, %v3470_v17  ;;  %v2888_v41 = vadd.f32 %v2804_v22, %v5972_v37 }
 0x2a4   : > { %v3473_v44 = vsel %vm3409_vm8, %v3377_v14, %v3441_v16 }
 0x2a5   : > { %v3183_v52 = vpop.f32.mrf.mxu1  ;;  %v3497_v10 = vpack.c.bf16 %v3473_v44, %v3471_v35 }
 0x2a6   : > { %v3270_v62 = vadd.f32 %v3183_v52, %v2885_v40 }
 0x2a7   : > { %v3185_v3 = vpop.f32.mrf.mxu1  ;;  %3697 = vmatprep.mubr.bf16.mxu0 %v3497_v10 }
 0x2a8   : > { %v3378_v39 = vadd.f32 %v6025_v42, %v3270_v62  ;;  %v3271_v2 = vadd.f32 %v3185_v3, %v2886_v20  ;;  %3698 = vmatmul.mubr.bf16.gmra.mxu0 %v3496_v21 }
 0x2a9   : > { %v3187_v47 = vpop.f32.mrf.mxu1 }
 0x2aa   : > { %v3272_v60 = vadd.f32 %v3187_v47, %v2887_v15  ;;  %v2808_v12 = vpop.f32.mrf.mxu0  ;;  %v3442_v31 = vmul.f32 0.01, %v3378_v39  ;;  %vm3410_vm2 = vcmp.gt.f32.partialorder %v3378_v39, 0.0  ;;  %v3379_v7 = vadd.f32 %v6032_v32, %v3271_v2 }
 0x2ab   : > { %v3189_v9 = vpop.f32.mrf.mxu1  ;;  %v2889_v8 = vadd.f32 %v2808_v12, %v5976_v63 }
 0x2ac   : > { %v3380_v30 = vadd.f32 %v6025_v42, %v3272_v60  ;;  %v2810_v61 = vpop.f32.mrf.mxu0  ;;  %v3273_v25 = vadd.f32 %v3189_v9, %v2888_v41  ;;  %v3474_v53 = vsel %vm3410_vm2, %v3378_v39, %v3442_v31  ;;  %v3443_v6 = vmul.f32 0.01, %v3379_v7 }
 0x2ad   : > { %v2890_v27 = vadd.f32 %v2810_v61, %v5979_v54  ;;  %vm3411_vm10 = vcmp.gt.f32.partialorder %v3379_v7, 0.0 }
 0x2ae   : > { %vm3412_vm9 = vcmp.gt.f32.partialorder %v3380_v30, 0.0  ;;  %v3444_v19 = vmul.f32 0.01, %v3380_v30  ;;  %v2812_v18 = vpop.f32.mrf.mxu0  ;;  %v3381_v29 = vadd.f32 %v6032_v32, %v3273_v25  ;;  %v3475_v45 = vsel %vm3411_vm10, %v3379_v7, %v3443_v6 }
 0x2af   : > { %v3193_v36 = vpop.f32.mrf.mxu1  ;;  %v2891_v50 = vadd.f32 %v2812_v18, %v5981_v48 }
 0x2b0   : > { %v3476_v37 = vsel %vm3412_vm9, %v3380_v30, %v3444_v19  ;;  %v3274_v4 = vadd.f32 %v3193_v36, %v2889_v8  ;;  %vm3413_vm11 = vcmp.gt.f32.partialorder %v3381_v29, 0.0  ;;  %v3445_v24 = vmul.f32 0.01, %v3381_v29  ;;  %v2814_v63 = vpop.f32.mrf.mxu0 }
 0x2b1   : > { %v3195_v34 = vpop.f32.mrf.mxu1  ;;  %v3498_v49 = vpack.c.bf16 %v3476_v37, %v3474_v53  ;;  %v2892_v26 = vadd.f32 %v2814_v63, %v5984_v46 }
 0x2b2   : > { %v3382_v38 = vadd.f32 %v6025_v42, %v3274_v4  ;;  %v3275_v5 = vadd.f32 %v3195_v34, %v2890_v27  ;;  %v3477_v55 = vsel %vm3413_vm11, %v3381_v29, %v3445_v24 }
 0x2b3   : > { %v3197_v57 = vpop.f32.mrf.mxu1  ;;  %v3499_v17 = vpack.c.bf16 %v3477_v55, %v3475_v45 }
 0x2b4   : > { %v3276_v56 = vadd.f32 %v3197_v57, %v2891_v50  ;;  %v2818_v1 = vpop.f32.mrf.mxu0  ;;  %v3383_v54 = vadd.f32 %v6032_v32, %v3275_v5  ;;  %v3446_v28 = vmul.f32 0.01, %v3382_v38  ;;  %vm3414_vm12 = vcmp.gt.f32.partialorder %v3382_v38, 0.0 }
 0x2b5   : > { %v3199_v14 = vpop.f32.mrf.mxu1  ;;  %3705 = vmatprep.mubr.bf16.mxu0 %v3499_v17  ;;  %v2893_v62 = vadd.f32 %v2818_v1, %v5995_v11 }
 0x2b6   : > { %v3384_v16 = vadd.f32 %v6025_v42, %v3276_v56  ;;  %v3277_v48 = vadd.f32 %v3199_v14, %v2892_v26  ;;  %v2820_v40 = vpop.f32.mrf.mxu0  ;;  %3706 = vmatmul.mubr.bf16.gmra.mxu0 %v3498_v49  ;;  %v3447_v58 = vmul.f32 0.01, %v3383_v54  ;;  %v3478_v35 = vsel %vm3414_vm12, %v3382_v38, %v3446_v28  ;;  %v4707_v49 = vld [vmem:[%s6190_s5 + $0x28] sm:$0xff]   ;;  %v4708_v26 = vld [vmem:[%s6190_s5 + $0x20] sm:$0xff]  }
 0x2b7   : > { %vm3415_vm14 = vcmp.gt.f32.partialorder %v3383_v54, 0.0  ;;  %v2894_v39 = vadd.f32 %v2820_v40, %v5997_v43  ;;  %4459 = vmatprep.subr.bf16.mxu1 %v4707_v49  ;;  %v4709_v40 = vld [vmem:[%s6190_s5 + $0x18] sm:$0xff]  }
 0x2b8   : > { %vm3416_vm13 = vcmp.gt.f32.partialorder %v3384_v16, 0.0  ;;  %v3448_v21 = vmul.f32 0.01, %v3384_v16  ;;  %v3385_v52 = vadd.f32 %v6032_v32, %v3277_v48  ;;  %v2822_v10 = vpop.f32.mrf.mxu0  ;;  %v3479_v15 = vsel %vm3415_vm14, %v3383_v54, %v3447_v58  ;;  %4460 = vmatpush3.bf16.msra.mxu1 %v4707_v49 }
 0x2b9   : > { %v2895_v12 = vadd.f32 %v2822_v10, %v5999_v51  ;;  %4461 = vmatprep.subr.bf16.mxu1 %v4708_v26 }
 0x2ba   : > { %v3480_v46 = vsel %vm3416_vm13, %v3384_v16, %v3448_v21  ;;  %vm3417_vm15 = vcmp.gt.f32.partialorder %v3385_v52, 0.0  ;;  %v3449_v44 = vmul.f32 0.01, %v3385_v52  ;;  %v2824_v41 = vpop.f32.mrf.mxu0 }
 0x2bb   : > { %v3500_v20 = vpack.c.bf16 %v3480_v46, %v3478_v35  ;;  %v2896_v61 = vadd.f32 %v2824_v41, %v6002_v23 }
 0x2bc   : > { %v3481_v22 = vsel %vm3417_vm15, %v3385_v52, %v3449_v44  ;;  %4462 = vmatpush3.bf16.msra.mxu1 %v4708_v26  ;;  %v4710_v44 = vld [vmem:[%s6190_s5 + $0x10] sm:$0xff]  }
 0x2bd   : > { %v3203_v3 = vpop.f32.mrf.mxu1  ;;  %v3501_v47 = vpack.c.bf16 %v3481_v22, %v3479_v15  ;;  %4463 = vmatprep.subr.bf16.mxu1 %v4709_v40  ;;  %v6120_v22 = vld [vmem:[%s6189_s4] ss:$0 sm:$0xff] }
 0x2be   : > { %v3278_v2 = vadd.f32 %v3203_v3, %v2893_v62  ;;  %v4712_v3 = vld [vmem:[%s6190_s5] sm:$0xff]  }
 0x2bf   : > { %v3205_v60 = vpop.f32.mrf.mxu1  ;;  %3713 = vmatprep.mubr.bf16.mxu0 %v3501_v47 }
 0x2c0   : > { %v3386_v31 = vadd.f32 %v6025_v42, %v3278_v2  ;;  %v3279_v9 = vadd.f32 %v3205_v60, %v2894_v39  ;;  %3714 = vmatmul.mubr.bf16.gmra.mxu0 %v3500_v20  ;;  %4464 = vmatpush3.bf16.msra.mxu1 %v4709_v40 }
 0x2c1   : > { %v3207_v7 = vpop.f32.mrf.mxu1  ;;  %4465 = vmatprep.subr.bf16.mxu1 %v4710_v44 }
 0x2c2   : > { %v3280_v30 = vadd.f32 %v3207_v7, %v2895_v12  ;;  %v2828_v11 = vpop.f32.mrf.mxu0  ;;  %v3450_v25 = vmul.f32 0.01, %v3386_v31  ;;  %vm3418_vm0 = vcmp.gt.f32.partialorder %v3386_v31, 0.0  ;;  %v3387_v43 = vadd.f32 %v6032_v32, %v3279_v9 }
 0x2c3   : > { %v3209_v19 = vpop.f32.mrf.mxu1  ;;  %v2897_v29 = vadd.f32 %v2828_v11, %v6006_v0 }
 0x2c4   : > { %v3388_v8 = vadd.f32 %v6025_v42, %v3280_v30  ;;  %v2830_v18 = vpop.f32.mrf.mxu0  ;;  %v3281_v51 = vadd.f32 %v3209_v19, %v2896_v61  ;;  %v3482_v6 = vsel %vm3418_vm0, %v3386_v31, %v3450_v25  ;;  %v3451_v4 = vmul.f32 0.01, %v3387_v43  ;;  %4466 = vmatpush3.bf16.msra.mxu1 %v4710_v44 }
 0x2c5   : > { %v2898_v24 = vadd.f32 %v2830_v18, %v6009_v13  ;;  %vm3419_vm3 = vcmp.gt.f32.partialorder %v3387_v43, 0.0 }
 0x2c6   : > { %vm3420_vm1 = vcmp.gt.f32.partialorder %v3388_v8, 0.0  ;;  %v3452_v53 = vmul.f32 0.01, %v3388_v8  ;;  %v2832_v36 = vpop.f32.mrf.mxu0  ;;  %v3389_v37 = vadd.f32 %v6032_v32, %v3281_v51  ;;  %v3483_v45 = vsel %vm3419_vm3, %v3387_v43, %v3451_v4 }
 0x2c7   : > { %v3213_v27 = vpop.f32.mrf.mxu1  ;;  %v2899_v0 = vadd.f32 %v2832_v36, %v6011_v33 }
 0x2c8   : > { %v3484_v23 = vsel %vm3420_vm1, %v3388_v8, %v3452_v53  ;;  %v3282_v34 = vadd.f32 %v3213_v27, %v2897_v29  ;;  %vm3421_vm4 = vcmp.gt.f32.partialorder %v3389_v37, 0.0  ;;  %v3453_v50 = vmul.f32 0.01, %v3389_v37  ;;  %v2834_v57 = vpop.f32.mrf.mxu0 }
 0x2c9   : > { %v3215_v38 = vpop.f32.mrf.mxu1  ;;  %v3502_v63 = vpack.c.bf16 %v3484_v23, %v3482_v6  ;;  %v2900_v54 = vadd.f32 %v2834_v57, %v6014_v59 }
 0x2ca   : > { %v3390_v5 = vadd.f32 %v6025_v42, %v3282_v34  ;;  %v3283_v55 = vadd.f32 %v3215_v38, %v2898_v24  ;;  %v3485_v1 = vsel %vm3421_vm4, %v3389_v37, %v3453_v50 }
 0x2cb   : > { %v3217_v56 = vpop.f32.mrf.mxu1  ;;  %v3503_v33 = vpack.c.bf16 %v3485_v1, %v3483_v45 }
 0x2cc   : > { %v3284_v13 = vadd.f32 %v3217_v56, %v2899_v0  ;;  %v3391_v14 = vadd.f32 %v6032_v32, %v3283_v55  ;;  %v3454_v28 = vmul.f32 0.01, %v3390_v5  ;;  %vm3422_vm5 = vcmp.gt.f32.partialorder %v3390_v5, 0.0 }
 0x2cd   : > { %v3219_v17 = vpop.f32.mrf.mxu1  ;;  %3721 = vmatprep.mubr.bf16.mxu0 %v3503_v33 }
 0x2ce   : > { %v3392_v16 = vadd.f32 %v6025_v42, %v3284_v13  ;;  %v3285_v48 = vadd.f32 %v3219_v17, %v2900_v54  ;;  %3722 = vmatmul.mubr.bf16.gmra.mxu0 %v3502_v63  ;;  %v3455_v59 = vmul.f32 0.01, %v3391_v14  ;;  %v3486_v52 = vsel %vm3422_vm5, %v3390_v5, %v3454_v28 }
 0x2cf   : > { %vm3423_vm7 = vcmp.gt.f32.partialorder %v3391_v14, 0.0 }
 0x2d0   : > { %vm3424_vm6 = vcmp.gt.f32.partialorder %v3392_v16, 0.0  ;;  %v3456_v21 = vmul.f32 0.01, %v3392_v16  ;;  %v3393_v58 = vadd.f32 %v6032_v32, %v3285_v48  ;;  %v3487_v20 = vsel %vm3423_vm7, %v3391_v14, %v3455_v59  ;;  %v4711_v32 = vld [vmem:[%s6190_s5 + $0x8] sm:$0xff]  }
 0x2d1   : > { %4467 = vmatprep.subr.bf16.mxu1 %v4711_v32 }
 0x2d2   : > { %v3488_v35 = vsel %vm3424_vm6, %v3392_v16, %v3456_v21  ;;  %vm3425_vm8 = vcmp.gt.f32.partialorder %v3393_v58, 0.0  ;;  %v3457_v42 = vmul.f32 0.01, %v3393_v58  ;;  %4468 = vmatpush3.bf16.msra.mxu1 %v4711_v32 }
 0x2d3   : > { %v3504_v46 = vpack.c.bf16 %v3488_v35, %v3486_v52  ;;  %4469 = vmatprep.subr.bf16.mxu1 %v4712_v3 }
 0x2d4   : > { %v3489_v62 = vsel %vm3425_vm8, %v3393_v58, %v3457_v42 }
 0x2d5   : > { %v3505_v10 = vpack.c.bf16 %v3489_v62, %v3487_v20 }
 0x2d6   : > { %4470 = vmatpush3.bf16.msra.mxu1 %v4712_v3 }
 0x2d7   : > { %3729 = vmatprep.mubr.bf16.mxu0 %v3505_v10 }
 0x2d8   : > { %3730 = vmatmul.mubr.bf16.gmra.mxu0 %v3504_v46 }
 0x346   : > { %v4391_v15 = vpop.f32.mrf.mxu0 }
 0x348   : > { %v4392_v39 = vpop.f32.mrf.mxu0 }
 0x349   : > { %v4393_v2 = vadd.f32 %v4392_v39, %v4391_v15 }
 0x34a   : > { %v4394_v47 = vpop.f32.mrf.mxu0 }
 0x34b   : > { %v3676_v60 = vadd.f32 %v4393_v2, %v6120_v22 }
 0x34c   : > { %v4395_v12 = vpop.f32.mrf.mxu0 }
 0x34d   : > { %v4396_v41 = vadd.f32 %v4395_v12, %v4394_v47  ;;  %v3754_v31 = vmul.f32 0.01, %v3676_v60  ;;  %vm3738_vm2 = vcmp.gt.f32.partialorder %v3676_v60, 0.0 }
 0x34f   : > { %v3679_v9 = vadd.f32 %v4396_v41, %v6120_v22  ;;  %v3770_v19 = vsel %vm3738_vm2, %v3676_v60, %v3754_v31 }
 0x350   : > { %v4397_v7 = vpop.f32.mrf.mxu0 }
 0x351   : > { %vm3739_vm9 = vcmp.gt.f32.partialorder %v3679_v9, 0.0  ;;  %v3755_v30 = vmul.f32 0.01, %v3679_v9 }
 0x352   : > { %v4398_v11 = vpop.f32.mrf.mxu0 }
 0x353   : > { %v4399_v61 = vadd.f32 %v4398_v11, %v4397_v7  ;;  %v3771_v43 = vsel %vm3739_vm9, %v3679_v9, %v3755_v30 }
 0x354   : > { %v4400_v25 = vpop.f32.mrf.mxu0  ;;  %v3786_v18 = vpack.c.bf16 %v3771_v43, %v3770_v19 }
 0x355   : > { %v3684_v8 = vadd.f32 %v4399_v61, %v6120_v22 }
 0x356   : > { %v4401_v51 = vpop.f32.mrf.mxu0  ;;  %4471 = vmatprep.mubr.bf16.mxu1 %v3786_v18 }
 0x357   : > { %v4402_v53 = vadd.f32 %v4401_v51, %v4400_v25  ;;  %v3756_v29 = vmul.f32 0.01, %v3684_v8  ;;  %vm3740_vm10 = vcmp.gt.f32.partialorder %v3684_v8, 0.0 }
 0x359   : > { %v3687_v36 = vadd.f32 %v4402_v53, %v6120_v22  ;;  %v3772_v37 = vsel %vm3740_vm10, %v3684_v8, %v3756_v29 }
 0x35b   : > { %vm3741_vm11 = vcmp.gt.f32.partialorder %v3687_v36, 0.0  ;;  %v3757_v6 = vmul.f32 0.01, %v3687_v36 }
 0x35d   : > { %v3773_v27 = vsel %vm3741_vm11, %v3687_v36, %v3757_v6 }
 0x35e   : > { %v3787_v4 = vpack.c.bf16 %v3773_v27, %v3772_v37  ;;  %v4403_v23 = vpop.f32.mrf.mxu0 }
 0x360   : > { %4472 = vmatmul.mubr.bf16.vlgmr.msra.gmra.mxu1 %v3787_v4  ;;  %v4404_v24 = vpop.f32.mrf.mxu0 }
 0x361   : > { %v4405_v34 = vadd.f32 %v4404_v24, %v4403_v23 }
 0x362   : > { %v4406_v49 = vpop.f32.mrf.mxu0 }
 0x363   : > { %v3692_v50 = vadd.f32 %v4405_v34, %v6120_v22 }
 0x364   : > { %v4407_v38 = vpop.f32.mrf.mxu0 }
 0x365   : > { %v4408_v63 = vadd.f32 %v4407_v38, %v4406_v49  ;;  %v3758_v0 = vmul.f32 0.01, %v3692_v50  ;;  %vm3742_vm12 = vcmp.gt.f32.partialorder %v3692_v50, 0.0 }
 0x367   : > { %v3695_v5 = vadd.f32 %v4408_v63, %v6120_v22  ;;  %v3774_v45 = vsel %vm3742_vm12, %v3692_v50, %v3758_v0 }
 0x368   : > { %v4409_v57 = vpop.f32.mrf.mxu0 }
 0x369   : > { %vm3743_vm13 = vcmp.gt.f32.partialorder %v3695_v5, 0.0  ;;  %v3759_v55 = vmul.f32 0.01, %v3695_v5 }
 0x36a   : > { %v4410_v56 = vpop.f32.mrf.mxu0 }
 0x36b   : > { %v4411_v1 = vadd.f32 %v4410_v56, %v4409_v57  ;;  %v3775_v26 = vsel %vm3743_vm13, %v3695_v5, %v3759_v55 }
 0x36c   : > { %v4412_v13 = vpop.f32.mrf.mxu0  ;;  %v3788_v14 = vpack.c.bf16 %v3775_v26, %v3774_v45  ;;  %v6141_v26 = vld [vmem:[%s6191_s6] ss:$0 sm:$0xff] }
 0x36d   : > { %v3700_v54 = vadd.f32 %v4411_v1, %v6120_v22 }
 0x36e   : > { %v4413_v17 = vpop.f32.mrf.mxu0  ;;  %4475 = vmatprep.mubr.bf16.mxu1 %v3788_v14 }
 0x36f   : > { %v4414_v33 = vadd.f32 %v4413_v17, %v4412_v13  ;;  %v3760_v28 = vmul.f32 0.01, %v3700_v54  ;;  %vm3744_vm14 = vcmp.gt.f32.partialorder %v3700_v54, 0.0 }
 0x371   : > { %v3703_v16 = vadd.f32 %v4414_v33, %v6120_v22  ;;  %v3776_v21 = vsel %vm3744_vm14, %v3700_v54, %v3760_v28 }
 0x373   : > { %vm3745_vm15 = vcmp.gt.f32.partialorder %v3703_v16, 0.0  ;;  %v3761_v48 = vmul.f32 0.01, %v3703_v16 }
 0x375   : > { %v3777_v40 = vsel %vm3745_vm15, %v3703_v16, %v3761_v48 }
 0x376   : > { %v3789_v59 = vpack.c.bf16 %v3777_v40, %v3776_v21  ;;  %v4415_v58 = vpop.f32.mrf.mxu0 }
 0x378   : > { %4476 = vmatmul.mubr.bf16.gmra.mxu1 %v3789_v59  ;;  %v4416_v52 = vpop.f32.mrf.mxu0 }
 0x379   : > { %v4417_v35 = vadd.f32 %v4416_v52, %v4415_v58 }
 0x37a   : > { %v4418_v42 = vpop.f32.mrf.mxu0 }
 0x37b   : > { %v3708_v46 = vadd.f32 %v4417_v35, %v6120_v22 }
 0x37c   : > { %v4419_v44 = vpop.f32.mrf.mxu0 }
 0x37d   : > { %v4420_v20 = vadd.f32 %v4419_v44, %v4418_v42  ;;  %v3762_v62 = vmul.f32 0.01, %v3708_v46  ;;  %vm3746_vm0 = vcmp.gt.f32.partialorder %v3708_v46, 0.0 }
 0x37f   : > { %v3711_v10 = vadd.f32 %v4420_v20, %v6120_v22  ;;  %v3778_v47 = vsel %vm3746_vm0, %v3708_v46, %v3762_v62 }
 0x380   : > { %v4421_v32 = vpop.f32.mrf.mxu0 }
 0x381   : > { %vm3747_vm1 = vcmp.gt.f32.partialorder %v3711_v10, 0.0  ;;  %v3763_v3 = vmul.f32 0.01, %v3711_v10 }
 0x382   : > { %v4422_v15 = vpop.f32.mrf.mxu0 }
 0x383   : > { %v4423_v39 = vadd.f32 %v4422_v15, %v4421_v32  ;;  %v3779_v60 = vsel %vm3747_vm1, %v3711_v10, %v3763_v3 }
 0x384   : > { %v4424_v2 = vpop.f32.mrf.mxu0  ;;  %v3790_v41 = vpack.c.bf16 %v3779_v60, %v3778_v47 }
 0x385   : > { %v3716_v12 = vadd.f32 %v4423_v39, %v6120_v22 }
 0x386   : > { %v4425_v31 = vpop.f32.mrf.mxu0  ;;  %4479 = vmatprep.mubr.bf16.mxu1 %v3790_v41 }
 0x387   : > { %v4426_v9 = vadd.f32 %v4425_v31, %v4424_v2  ;;  %v3764_v7 = vmul.f32 0.01, %v3716_v12  ;;  %vm3748_vm3 = vcmp.gt.f32.partialorder %v3716_v12, 0.0 }
 0x389   : > { %v3719_v30 = vadd.f32 %v4426_v9, %v6120_v22  ;;  %v3780_v61 = vsel %vm3748_vm3, %v3716_v12, %v3764_v7 }
 0x38b   : > { %vm3749_vm4 = vcmp.gt.f32.partialorder %v3719_v30, 0.0  ;;  %v3765_v11 = vmul.f32 0.01, %v3719_v30 }
 0x38d   : > { %v3781_v25 = vsel %vm3749_vm4, %v3719_v30, %v3765_v11 }
 0x38e   : > { %v3791_v19 = vpack.c.bf16 %v3781_v25, %v3780_v61  ;;  %v4427_v43 = vpop.f32.mrf.mxu0 }
 0x390   : > { %4480 = vmatmul.mubr.bf16.gmra.mxu1 %v3791_v19  ;;  %v4428_v8 = vpop.f32.mrf.mxu0 }
 0x391   : > { %v4429_v18 = vadd.f32 %v4428_v8, %v4427_v43 }
 0x392   : > { %v4430_v51 = vpop.f32.mrf.mxu0 }
 0x393   : > { %v3724_v53 = vadd.f32 %v4429_v18, %v6120_v22 }
 0x394   : > { %v4431_v29 = vpop.f32.mrf.mxu0 }
 0x395   : > { %v4432_v36 = vadd.f32 %v4431_v29, %v4430_v51  ;;  %v3766_v6 = vmul.f32 0.01, %v3724_v53  ;;  %vm3750_vm5 = vcmp.gt.f32.partialorder %v3724_v53, 0.0 }
 0x397   : > { %v3727_v37 = vadd.f32 %v4432_v36, %v6120_v22  ;;  %v3782_v49 = vsel %vm3750_vm5, %v3724_v53, %v3766_v6 }
 0x398   : > { %v4433_v27 = vpop.f32.mrf.mxu0 }
 0x399   : > { %vm3751_vm6 = vcmp.gt.f32.partialorder %v3727_v37, 0.0  ;;  %v3767_v4 = vmul.f32 0.01, %v3727_v37 }
 0x39a   : > { %v4434_v23 = vpop.f32.mrf.mxu0 }
 0x39b   : > { %v4435_v24 = vadd.f32 %v4434_v23, %v4433_v27  ;;  %v3783_v50 = vsel %vm3751_vm6, %v3727_v37, %v3767_v4 }
 0x39c   : > { %v4436_v34 = vpop.f32.mrf.mxu0  ;;  %v3792_v63 = vpack.c.bf16 %v3783_v50, %v3782_v49 }
 0x39d   : > { %v3732_v38 = vadd.f32 %v4435_v24, %v6120_v22 }
 0x39e   : > { %v4437_v0 = vpop.f32.mrf.mxu0  ;;  %4483 = vmatprep.mubr.bf16.mxu1 %v3792_v63 }
 0x39f   : > { %v4438_v5 = vadd.f32 %v4437_v0, %v4436_v34  ;;  %v3768_v57 = vmul.f32 0.01, %v3732_v38  ;;  %vm3752_vm7 = vcmp.gt.f32.partialorder %v3732_v38, 0.0 }
 0x3a1   : > { %v3735_v55 = vadd.f32 %v4438_v5, %v6120_v22  ;;  %v3784_v1 = vsel %vm3752_vm7, %v3732_v38, %v3768_v57 }
 0x3a3   : > { %vm3753_vm8 = vcmp.gt.f32.partialorder %v3735_v55, 0.0  ;;  %v3769_v56 = vmul.f32 0.01, %v3735_v55 }
 0x3a5   : > { %v3785_v13 = vsel %vm3753_vm8, %v3735_v55, %v3769_v56 }
 0x3a6   : > { %v3793_v45 = vpack.c.bf16 %v3785_v13, %v3784_v1 }
 0x3a8   : > { %4484 = vmatmul.mubr.bf16.gmra.mxu1 %v3793_v45 }
 0x420   : > { %v4473_v54 = vpop.f32.mrf.mxu1 }
 0x421   : > { %v3908_v14 = vadd.f32 %v4473_v54, %v6141_v26 }
 0x422   : > { %v3899_v17 = vpop.f32.mrf.mxu1 }
 0x423   : > { %vm3964_vm2 = vcmp.gt.f32.partialorder %v3908_v14, 0.0  ;;  %v3980_v22 = vmul.f32 0.01, %v3908_v14  ;;  %v3900_v33 = vadd.f32 %v6141_v26, %v3899_v17 }
 0x424   : > { %v4474_v28 = vpop.f32.mrf.mxu1 }
 0x425   : > { %v3996_v16 = vsel %vm3964_vm2, %v3908_v14, %v3980_v22  ;;  %vm3962_vm9 = vcmp.gt.f32.partialorder %v3900_v33, 0.0  ;;  %v3978_v48 = vmul.f32 0.01, %v3900_v33  ;;  %v3911_v21 = vadd.f32 %v4474_v28, %v6141_v26 }
 0x426   : > { %4012 = vst [vmem:[%s6149_s18 + $0x10] sm:$0xff] %v3996_v16  ;;  %v3902_v40 = vpop.f32.mrf.mxu1 }
 0x427   : > { %v3994_v59 = vsel %vm3962_vm9, %v3900_v33, %v3978_v48  ;;  %vm3965_vm10 = vcmp.gt.f32.partialorder %v3911_v21, 0.0  ;;  %v3981_v58 = vmul.f32 0.01, %v3911_v21  ;;  %v3903_v52 = vadd.f32 %v6141_v26, %v3902_v40 }
 0x428   : > { %4010 = vst [vmem:[%s6149_s18] sm:$0xff] %v3994_v59 }
 0x429   : > { %v3997_v35 = vsel %vm3965_vm10, %v3911_v21, %v3981_v58  ;;  %vm3963_vm11 = vcmp.gt.f32.partialorder %v3903_v52, 0.0  ;;  %v3979_v42 = vmul.f32 0.01, %v3903_v52 }
 0x42a   : > { %4013 = vst [vmem:[%s6149_s18 + $0x18] sm:$0xff] %v3997_v35 }
 0x42b   : > { %v3995_v46 = vsel %vm3963_vm11, %v3903_v52, %v3979_v42 }
 0x42c   : > { %4011 = vst [vmem:[%s6149_s18 + $0x8] sm:$0xff] %v3995_v46 }
 0x438   : > { %v4477_v44 = vpop.f32.mrf.mxu1 }
 0x439   : > { %v3924_v20 = vadd.f32 %v4477_v44, %v6141_v26 }
 0x43a   : > { %v3915_v62 = vpop.f32.mrf.mxu1 }
 0x43b   : > { %vm3968_vm12 = vcmp.gt.f32.partialorder %v3924_v20, 0.0  ;;  %v3984_v10 = vmul.f32 0.01, %v3924_v20  ;;  %v3916_v32 = vadd.f32 %v6141_v26, %v3915_v62 }
 0x43c   : > { %v4478_v3 = vpop.f32.mrf.mxu1 }
 0x43d   : > { %v4000_v15 = vsel %vm3968_vm12, %v3924_v20, %v3984_v10  ;;  %vm3966_vm13 = vcmp.gt.f32.partialorder %v3916_v32, 0.0  ;;  %v3982_v39 = vmul.f32 0.01, %v3916_v32  ;;  %v3927_v2 = vadd.f32 %v4478_v3, %v6141_v26 }
 0x43e   : > { %4016 = vst [vmem:[%s6149_s18 + $0x30] sm:$0xff] %v4000_v15  ;;  %v3918_v47 = vpop.f32.mrf.mxu1 }
 0x43f   : > { %v3998_v60 = vsel %vm3966_vm13, %v3916_v32, %v3982_v39  ;;  %vm3969_vm14 = vcmp.gt.f32.partialorder %v3927_v2, 0.0  ;;  %v3985_v12 = vmul.f32 0.01, %v3927_v2  ;;  %v3919_v41 = vadd.f32 %v6141_v26, %v3918_v47 }
 0x440   : > { %4014 = vst [vmem:[%s6149_s18 + $0x20] sm:$0xff] %v3998_v60 }
 0x441   : > { %v4001_v31 = vsel %vm3969_vm14, %v3927_v2, %v3985_v12  ;;  %vm3967_vm15 = vcmp.gt.f32.partialorder %v3919_v41, 0.0  ;;  %v3983_v9 = vmul.f32 0.01, %v3919_v41 }
 0x442   : > { %4017 = vst [vmem:[%s6149_s18 + $0x38] sm:$0xff] %v4001_v31 }
 0x443   : > { %v3999_v7 = vsel %vm3967_vm15, %v3919_v41, %v3983_v9 }
 0x444   : > { %4015 = vst [vmem:[%s6149_s18 + $0x28] sm:$0xff] %v3999_v7 }
 0x450   : > { %v4481_v30 = vpop.f32.mrf.mxu1 }
 0x451   : > { %v3940_v11 = vadd.f32 %v4481_v30, %v6141_v26 }
 0x452   : > { %v3931_v61 = vpop.f32.mrf.mxu1 }
 0x453   : > { %vm3972_vm0 = vcmp.gt.f32.partialorder %v3940_v11, 0.0  ;;  %v3988_v25 = vmul.f32 0.01, %v3940_v11  ;;  %v3932_v19 = vadd.f32 %v6141_v26, %v3931_v61 }
 0x454   : > { %v4482_v43 = vpop.f32.mrf.mxu1 }
 0x455   : > { %v4004_v8 = vsel %vm3972_vm0, %v3940_v11, %v3988_v25  ;;  %vm3970_vm1 = vcmp.gt.f32.partialorder %v3932_v19, 0.0  ;;  %v3986_v18 = vmul.f32 0.01, %v3932_v19  ;;  %v3943_v51 = vadd.f32 %v4482_v43, %v6141_v26 }
 0x456   : > { %4020 = vst [vmem:[%s6149_s18 + $0x50] sm:$0xff] %v4004_v8  ;;  %v3934_v53 = vpop.f32.mrf.mxu1 }
 0x457   : > { %v4002_v29 = vsel %vm3970_vm1, %v3932_v19, %v3986_v18  ;;  %vm3973_vm3 = vcmp.gt.f32.partialorder %v3943_v51, 0.0  ;;  %v3989_v36 = vmul.f32 0.01, %v3943_v51  ;;  %v3935_v6 = vadd.f32 %v6141_v26, %v3934_v53 }
 0x458   : > { %4018 = vst [vmem:[%s6149_s18 + $0x40] sm:$0xff] %v4002_v29 }
 0x459   : > { %v4005_v37 = vsel %vm3973_vm3, %v3943_v51, %v3989_v36  ;;  %vm3971_vm4 = vcmp.gt.f32.partialorder %v3935_v6, 0.0  ;;  %v3987_v27 = vmul.f32 0.01, %v3935_v6 }
 0x45a   : > { %4021 = vst [vmem:[%s6149_s18 + $0x58] sm:$0xff] %v4005_v37 }
 0x45b   : > { %v4003_v4 = vsel %vm3971_vm4, %v3935_v6, %v3987_v27 }
 0x45c   : > { %4019 = vst [vmem:[%s6149_s18 + $0x48] sm:$0xff] %v4003_v4 }
 0x468   : > { %v4485_v23 = vpop.f32.mrf.mxu1 }
 0x469   : > { %v3956_v24 = vadd.f32 %v4485_v23, %v6141_v26 }
 0x46a   : > { %v3947_v34 = vpop.f32.mrf.mxu1 }
 0x46b   : > { %vm3976_vm5 = vcmp.gt.f32.partialorder %v3956_v24, 0.0  ;;  %v3992_v49 = vmul.f32 0.01, %v3956_v24  ;;  %v3948_v50 = vadd.f32 %v6141_v26, %v3947_v34 }
 0x46c   : > { %v4486_v38 = vpop.f32.mrf.mxu1 }
 0x46d   : > { %v4008_v63 = vsel %vm3976_vm5, %v3956_v24, %v3992_v49  ;;  %vm3974_vm6 = vcmp.gt.f32.partialorder %v3948_v50, 0.0  ;;  %v3990_v0 = vmul.f32 0.01, %v3948_v50  ;;  %v3959_v5 = vadd.f32 %v4486_v38, %v6141_v26 }
 0x46e   : > { %4024 = vst [vmem:[%s6149_s18 + $0x70] sm:$0xff] %v4008_v63  ;;  %v3950_v57 = vpop.f32.mrf.mxu1 }
 0x46f   : > { %v4006_v55 = vsel %vm3974_vm6, %v3948_v50, %v3990_v0  ;;  %vm3977_vm7 = vcmp.gt.f32.partialorder %v3959_v5, 0.0  ;;  %v3993_v56 = vmul.f32 0.01, %v3959_v5  ;;  %v3951_v1 = vadd.f32 %v6141_v26, %v3950_v57 }
 0x470   : > { %4022 = vst [vmem:[%s6149_s18 + $0x60] sm:$0xff] %v4006_v55 }
 0x471   : > { %v4009_v13 = vsel %vm3977_vm7, %v3959_v5, %v3993_v56  ;;  %vm3975_vm8 = vcmp.gt.f32.partialorder %v3951_v1, 0.0  ;;  %v3991_v45 = vmul.f32 0.01, %v3951_v1 }
 0x472   : > { %4025 = vst [vmem:[%s6149_s18 + $0x78] sm:$0xff] %v4009_v13 }
 0x473   : > { %v4007_v54 = vsel %vm3975_vm8, %v3951_v1, %v3991_v45 }
 0x474   : > { %4023 = vst [vmem:[%s6149_s18 + $0x68] sm:$0xff] %v4007_v54 }
 0x475 PF: > { %s17_s24 = sadd.s32 1, %s4731_s24  }
 0x476   : > { %p14_p4 = scmp.ge.s32.totalorder %s17_s24, 4  }
 0x478   :  { %16 = sbr.rel (!%p14_p4) target bundleno = 1 (0x1), region = 78 }

</bundles_post_ra>
